<compile_context>
chip_gen: v7x
topology: tpu7x:2x2x1
jax: 0.10.0
libtpu: 0.0.40
codegen_flags: <defaults>
</compile_context>

<pallas_src>
import numpy as np
import jax
import jax.numpy as jnp
from jax import lax
from jax.experimental import pallas as pl
from jax.experimental.pallas import tpu as pltpu

EPS = 1e-5
F32 = jnp.float32
BF16 = jnp.bfloat16
HI = jax.lax.Precision.HIGHEST
DEF = jax.lax.Precision.DEFAULT

KSZ = 5
IN_TAB = 18          # tabular features
IN_TS = 3            # time-series channels
TS_LEN = 46          # time-series length
CONV3_PAD = 8        # conv3 out-channels zero-padded 4 -> 8 (tile-aligned reshape)
IN_CH = IN_TAB + 12  # 30 features entering the dense stack


# ------------------------- host-side constant builders -------------------------

def _round8(n):
    return ((n + 7) // 8) * 8


def pad_mat(L, p):
    """Replicate ('edge') padding along length as a (L, L+2p) 0/1 selection matrix."""
    M = np.zeros((L, L + 2 * p), np.float32)
    for i in range(L + 2 * p):
        M[int(np.clip(i - p, 0, L - 1)), i] = 1.0
    return M


def pool_mat(L, w, ceil):
    """Non-overlapping avg pool as (L, Lout); partial last window divides by its true size."""
    Lo = -(-L // w) if ceil else L // w
    M = np.zeros((L, Lo), np.float32)
    for l in range(Lo):
        lo, hi = l * w, min((l + 1) * w, L)
        M[lo:hi, l] = 1.0 / (hi - lo)
    return M


class _BlobBuilder:
    """Packs many small 2-D f32 arrays into one (R, width) blob with 8-aligned row offsets."""

    def __init__(self, width):
        self.width = width
        self.blocks = []
        self.layout = {}
        self.off = 0

    def add(self, name, arr):
        arr = np.asarray(arr, np.float32)
        assert arr.ndim == 2 and arr.shape[1] <= self.width, (name, arr.shape)
        r, c = arr.shape
        block = np.zeros((_round8(r), self.width), np.float32)
        block[:r, :c] = arr
        self.layout[name] = (self.off, r, c)
        self.blocks.append(block)
        self.off += block.shape[0]

    def finish(self):
        return np.concatenate(self.blocks, axis=0), self.layout


# ------------------------------- Pallas kernel ---------------------------------

def make_kernel(layout, block_num, fc_num, width, batch):
    def get(ref, name):
        off, r, c = layout[name]
        return ref[off:off + r, :c]

    def mm(a, b):  # 2-D matmul, bf16 operands, f32 accumulation
        return jnp.dot(a.astype(BF16), b.astype(BF16),
                       precision=DEF, preferred_element_type=F32)

    def bmm(a, b):  # batched (B, M, K) @ (B, K, N) -> (B, M, N)
        return lax.dot_general(a.astype(BF16), b.astype(BF16),
                               dimension_numbers=(((2,), (1,)), ((0,), (0,))),
                               precision=DEF, preferred_element_type=F32)

    def kernel(x1_ref, xcol_ref, p_ref, o_ref, slab):
        B = batch

        # ---------------- ConvBlock (BN folded into weights/biases) ----------------
        # conv1: single im2col batched matmul (im2col built by the XLA wrapper)
        w = jnp.broadcast_to(get(p_ref, 'c1_w'), (B, 32, IN_TS * KSZ))
        h = bmm(w, xcol_ref[...])                                   # (B, 32, 46)
        h = jnp.maximum(h + get(p_ref, 'c1_b')[None], 0.0)
        # pool(2) composed with next layer's replicate pad, as one 2-D matmul
        h = mm(h.reshape(B * 32, 46), get(p_ref, 'pp2')).reshape(B, 32, 27)

        # conv2: 5 unrolled taps
        acc = None
        for k in range(KSZ):
            w = jnp.broadcast_to(get(p_ref, f'c2_w{k}'), (B, 16, 32))
            term = bmm(w, h[:, :, k:k + 23])
            acc = term if acc is None else acc + term
        h = jnp.maximum(acc + get(p_ref, 'c2_b')[None], 0.0)        # (B, 16, 23)
        h = mm(h.reshape(B * 16, 23), get(p_ref, 'pp3')).reshape(B, 16, 15)

        # conv3 (output channels zero-padded 4 -> 8 so the reshape below is tile aligned)
        acc = None
        for k in range(KSZ):
            w = jnp.broadcast_to(get(p_ref, f'c3_w{k}'), (B, CONV3_PAD, 16))
            term = bmm(w, h[:, :, k:k + 11])
            acc = term if acc is None else acc + term
        h = jnp.maximum(acc + get(p_ref, 'c3_b')[None], 0.0)        # (B, 8, 11)

        # final avg pool (win 4, ceil) + gather channel rows back to batch rows
        pooled = mm(h.reshape(B * CONV3_PAD, 11), get(p_ref, 'p3'))  # (B*8, 3), row b*8+o
        feats = mm(get(p_ref, 'astk'), pooled)                       # (4B, 3),  row o*B+b

        # ---------- BatchNorm1d(30) on cat(x1, conv.view(B,-1)) into the slab ----------
        ns, nt = get(p_ref, 'n_s'), get(p_ref, 'n_t')                # (1, 30) each
        slab[:, 0:IN_TAB] = x1_ref[...] * ns[:, 0:IN_TAB] + nt[:, 0:IN_TAB]
        for o in range(4):
            c0 = IN_TAB + 3 * o
            slab[:, c0:c0 + 3] = (feats[o * B:(o + 1) * B, :]
                                  * ns[:, c0:c0 + 3] + nt[:, c0:c0 + 3])

        # ---------- Dense blocks (dense concat == lane-offset writes into slab) ----------
        for bk in range(block_num):
            din = IN_CH + width * bk
            z = slab[:, 0:din]
            for li in (1, 2, 3):
                z = jnp.maximum(mm(z, get(p_ref, f'b{bk}_w{li}'))
                                + get(p_ref, f'b{bk}_b{li}'), 0.0)
            slab[:, din:din + width] = z

        # ---------- FC blocks: BN(ReLU(Linear)) ----------
        y = slab[:, 0:IN_CH + width * block_num]
        for fi in range(fc_num):
            y = jnp.maximum(mm(y, get(p_ref, f'f{fi}_w')) + get(p_ref, f'f{fi}_b'), 0.0)
            y = y * get(p_ref, f'f{fi}_s') + get(p_ref, f'f{fi}_t')
        o_ref[...] = y

    return kernel


# ------------------------------ wrapper (glue) ---------------------------------

def build_forward(packed, batch):
    layout = packed['layout']
    block_num, fc_num = packed['block_num'], packed['fc_num']
    width, fc_channel = packed['width'], packed['fc_channel']
    slab_cols = IN_CH + width * block_num
    kernel = make_kernel(layout, block_num, fc_num, width, batch)

    def forward(x, blob):
        B = x.shape[0]
        # torch.tensor_split(x, [18, 157], dim=1) on a (B, 156) input
        x1 = x[:, :IN_TAB]
        x2 = x[:, IN_TAB:IN_TAB + IN_TS * TS_LEN].reshape(B, IN_TS, TS_LEN)
        # replicate pad + im2col of the raw conv input (cheap XLA prep, fused)
        xpad = jnp.pad(x2, ((0, 0), (0, 0), (2, 2)), mode='edge')
        xcol = jnp.stack([xpad[:, :, k:k + TS_LEN] for k in range(KSZ)], axis=2)
        xcol = xcol.reshape(B, IN_TS * KSZ, TS_LEN)                  # (B, 15, 46), col c*5+k
        return pl.pallas_call(
            kernel,
            out_shape=jax.ShapeDtypeStruct((B, fc_channel), F32),
            scratch_shapes=[pltpu.VMEM((B, slab_cols), F32)],
        )(x1, xcol, blob)

    return forward


# ------------------------- parameters (deterministic) ---------------------------

def init_params(key, width=16, block_num=2, fc_num=1, fc_channel=32):
    in_channel = IN_CH
    filters = [32, 16, 4]
    keys = iter(jax.random.split(key, 256))

    def nrm(shape, scale):
        return scale * jax.random.normal(next(keys), shape, F32)

    def bn(c):
        return dict(gamma=1.0 + nrm((c,), 0.1), beta=nrm((c,), 0.1),
                    mean=jnp.zeros((c,), F32), var=jnp.ones((c,), F32))

    raw = {'width': width, 'block_num': block_num, 'fc_num': fc_num}
    conv, cin = [], IN_TS
    for co in filters:
        conv.append(dict(w=nrm((co, cin, KSZ), 0.2), b=nrm((co,), 0.1), bn=bn(co)))
        cin = co
    raw['conv'] = conv
    raw['norm'] = bn(in_channel)
    blocks = []
    for bk in range(block_num):
        din = bk * width + in_channel
        layers = []
        for (o, i) in [(width, din), (width, width), (width, width)]:
            layers.append(dict(w=nrm((o, i), 0.2), b=nrm((o,), 0.1), bn=bn(o)))
        blocks.append(layers)
    raw['blocks'] = blocks
    fcs, fin = [], block_num * width + in_channel
    for fk in range(fc_num):
        i = fin if fk == 0 else fc_channel
        fcs.append(dict(w=nrm((fc_channel, i), 0.2), b=nrm((fc_channel,), 0.1),
                        bn=bn(fc_channel)))
    raw['fcs'] = fcs
    return raw


def fold_params(raw, batch):
    width, block_num, fc_num = raw['width'], raw['block_num'], raw['fc_num']

    def bn_st(bn):
        s = np.asarray(bn['gamma'], np.float32) / np.sqrt(np.asarray(bn['var'], np.float32) + EPS)
        t = np.asarray(bn['beta'], np.float32) - np.asarray(bn['mean'], np.float32) * s
        return s, t

    bb = _BlobBuilder(max(64, CONV3_PAD * batch))

    # compile-time pad/pool selection matrices ride in the same single-DMA blob
    bb.add('pp2', pool_mat(46, 2, False) @ pad_mat(23, 2))   # pool1 ∘ pad2  (46, 27)
    bb.add('pp3', pool_mat(23, 2, False) @ pad_mat(11, 2))   # pool2 ∘ pad3  (23, 15)
    bb.add('p3', pool_mat(11, 4, True))                      # ceil-mode pool (11, 3)
    astk = np.zeros((4 * batch, CONV3_PAD * batch), np.float32)
    for o in range(4):
        for b in range(batch):
            astk[o * batch + b, b * CONV3_PAD + o] = 1.0     # row (b,o) -> row o*B+b
    bb.add('astk', astk)

    # conv layers with BN folded
    convs = []
    for st in raw['conv']:
        s, t = bn_st(st['bn'])
        w = np.asarray(st['w'], np.float32) * s[:, None, None]   # (O, C, K)
        b = np.asarray(st['b'], np.float32) * s + t
        convs.append((w, b))
    w1, b1 = convs[0]
    bb.add('c1_w', w1.reshape(w1.shape[0], -1))              # (32, 15), col = c*5+k
    bb.add('c1_b', b1[:, None])
    w2, b2 = convs[1]
    for k in range(KSZ):
        bb.add(f'c2_w{k}', w2[:, :, k])                      # (16, 32)
    bb.add('c2_b', b2[:, None])
    w3, b3 = convs[2]
    w3p = np.zeros((CONV3_PAD, w3.shape[1], KSZ), np.float32)
    w3p[:4] = w3
    b3p = np.zeros((CONV3_PAD,), np.float32)
    b3p[:4] = b3
    for k in range(KSZ):
        bb.add(f'c3_w{k}', w3p[:, :, k])                     # (8, 16)
    bb.add('c3_b', b3p[:, None])

    s, t = bn_st(raw['norm'])
    bb.add('n_s', s[None, :])
    bb.add('n_t', t[None, :])

    def slab_reorder(wt, n_h3):
        # torch concat order [h3_{n-1}, ..., h3_0, h0]  ->  slab order [h0, h3_0, ..., h3_{n-1}]
        parts = [wt[width * n_h3: width * n_h3 + IN_CH]]
        for m in range(n_h3):
            j = n_h3 - 1 - m
            parts.append(wt[width * j: width * (j + 1)])
        return np.concatenate(parts, axis=0)

    for bk, blk in enumerate(raw['blocks']):
        for li, ly in enumerate(blk):
            s, t = bn_st(ly['bn'])
            wt = (np.asarray(ly['w'], np.float32) * s[:, None]).T
            bias = (np.asarray(ly['b'], np.float32) * s + t)[None, :]
            if li == 0 and bk > 0:
                wt = slab_reorder(wt, bk)
            bb.add(f'b{bk}_w{li + 1}', wt)
            bb.add(f'b{bk}_b{li + 1}', bias)

    for fi, ly in enumerate(raw['fcs']):
        s, t = bn_st(ly['bn'])
        wt = np.asarray(ly['w'], np.float32).T
        if fi == 0:
            wt = slab_reorder(wt, block_num)
        bb.add(f'f{fi}_w', wt)
        bb.add(f'f{fi}_b', np.asarray(ly['b'], np.float32)[None, :])
        bb.add(f'f{fi}_s', s[None, :])
        bb.add(f'f{fi}_t', t[None, :])

    blob, layout = bb.finish()
    return {'blob': jnp.asarray(blob), 'layout': layout,
            'block_num': block_num, 'fc_num': fc_num, 'width': width,
            'fc_channel': int(raw['fcs'][0]['w'].shape[0])}


# --------------------------- pure-JAX reference ---------------------------------

def reference_forward(x, raw):
    B = x.shape[0]

    def bn_eval(y, bn, axis):
        shp = [1] * y.ndim
        shp[axis] = -1
        return ((y - bn['mean'].reshape(shp)) / jnp.sqrt(bn['var'].reshape(shp) + EPS)
                * bn['gamma'].reshape(shp) + bn['beta'].reshape(shp))

    x1 = x[:, :IN_TAB]
    h = x[:, IN_TAB:IN_TAB + IN_TS * TS_LEN].reshape(B, IN_TS, TS_LEN)
    pool_cfg = [(2, False), (2, False), (4, True)]
    for st, (win, ceil) in zip(raw['conv'], pool_cfg):
        hp = jnp.pad(h, ((0, 0), (0, 0), (2, 2)), mode='edge')
        y = lax.conv_general_dilated(hp, st['w'], (1,), 'VALID',
                                     dimension_numbers=('NCH', 'OIH', 'NCH'),
                                     precision=HI)
        y = y + st['b'][None, :, None]
        y = jnp.maximum(bn_eval(y, st['bn'], 1), 0.0)
        L = y.shape[2]
        nfull = L // win
        parts = [y[:, :, :nfull * win].reshape(B, y.shape[1], nfull, win).mean(-1)]
        if ceil and L % win:
            parts.append(y[:, :, nfull * win:].mean(-1, keepdims=True))
        h = jnp.concatenate(parts, axis=-1) if len(parts) > 1 else parts[0]
    out = jnp.concatenate([x1, h.reshape(B, -1)], axis=1)
    out = bn_eval(out, raw['norm'], 1)
    for blk in raw['blocks']:
        o = out
        for ly in blk:
            o = jnp.maximum(bn_eval(jnp.dot(o, ly['w'].T, precision=HI) + ly['b'], ly['bn'], 1), 0.0)
        out = jnp.concatenate([o, out], axis=1)
    for ly in raw['fcs']:
        out = bn_eval(jnp.maximum(jnp.dot(out, ly['w'].T, precision=HI) + ly['b'], 0.0), ly['bn'], 1)
    return out


# ----------------------------------- main ---------------------------------------

if __name__ == "__main__":
    key = jax.random.PRNGKey(0)
    kx, kp = jax.random.split(key)

    B = 8
    # x: 18 tabular features + 3*46 flattened time-series features = 156
    x = jax.random.normal(kx, (B, 156), F32)

    raw = init_params(kp, width=16, block_num=2, fc_num=1, fc_channel=32)
    packed = fold_params(raw, B)

    fwd = jax.jit(build_forward(packed, B))
    out = jax.block_until_ready(fwd(x, packed['blob']))

    ref = jax.block_until_ready(reference_forward(x, raw))
    assert out.shape == (B, 32), out.shape
    # Kernel matmuls use bf16 operands (f32 accumulation) per the perf guidance, so the
    # tolerance vs. the f32/HIGHEST reference is relaxed accordingly.
    np.testing.assert_allclose(np.asarray(out), np.asarray(ref), rtol=2e-2, atol=3e-2)
    print("KERNEL_OK")
</pallas_src>

<mosaic_0001>
module attributes {stable_mosaic.version = 11 : i64} {
  func.func @kernel(%arg0: memref<8x18xf32, #tpu.memory_space<vmem>>, %arg1: memref<8x15x46xf32, #tpu.memory_space<vmem>>, %arg2: memref<624x64xf32, #tpu.memory_space<vmem>>, %arg3: memref<8x32xf32, #tpu.memory_space<vmem>>, %arg4: memref<8x62xf32, #tpu.memory_space<vmem>>) attributes {dimension_semantics = [], scalar_prefetch = 0 : i64, scratch_operands = 1 : i64, tpu.core_type = #tpu.core_type<tc>} {
    %c120 = arith.constant 120 : index
    %c0 = arith.constant 0 : index
    %0 = vector.load %arg2[%c120, %c0] : memref<624x64xf32, #tpu.memory_space<vmem>>, vector<32x15xf32>
    %1 = vector.shape_cast %0 : vector<32x15xf32> to vector<1x32x15xf32>
    %2 = vector.broadcast %1 : vector<1x32x15xf32> to vector<8x32x15xf32>
    %c0_0 = arith.constant 0 : index
    %c0_1 = arith.constant 0 : index
    %c0_2 = arith.constant 0 : index
    %3 = vector.load %arg1[%c0_0, %c0_1, %c0_2] : memref<8x15x46xf32, #tpu.memory_space<vmem>>, vector<8x15x46xf32>
    %4 = arith.truncf %2 : vector<8x32x15xf32> to vector<8x32x15xbf16>
    %5 = arith.truncf %3 : vector<8x15x46xf32> to vector<8x15x46xbf16>
    %cst = arith.constant dense<0.000000e+00> : vector<8x32x46xf32>
    %6 = tpu.matmul %4, %5, %cst {dimension_numbers = #tpu.dot_dimension_numbers<[2], [1], [1], [2], [0, 0, 0, 1, 1, 2], [0], [0]>} : vector<8x32x15xbf16>, vector<8x15x46xbf16>, vector<8x32x46xf32> -> vector<8x32x46xf32>
    %c152 = arith.constant 152 : index
    %c0_3 = arith.constant 0 : index
    %7 = vector.load %arg2[%c152, %c0_3] : memref<624x64xf32, #tpu.memory_space<vmem>>, vector<32x1xf32>
    %8 = vector.shape_cast %7 : vector<32x1xf32> to vector<1x32x1xf32>
    %9 = vector.broadcast %8 : vector<1x32x1xf32> to vector<8x32x46xf32>
    %10 = arith.addf %6, %9 : vector<8x32x46xf32>
    %cst_4 = arith.constant 0.000000e+00 : f32
    %11 = vector.broadcast %cst_4 : f32 to vector<8x32x46xf32>
    %12 = arith.maximumf %10, %11 : vector<8x32x46xf32>
    %13 = vector.shape_cast %12 : vector<8x32x46xf32> to vector<256x46xf32>
    %c0_5 = arith.constant 0 : index
    %c0_6 = arith.constant 0 : index
    %14 = vector.load %arg2[%c0_5, %c0_6] : memref<624x64xf32, #tpu.memory_space<vmem>>, vector<46x27xf32>
    %15 = arith.truncf %13 : vector<256x46xf32> to vector<256x46xbf16>
    %16 = arith.truncf %14 : vector<46x27xf32> to vector<46x27xbf16>
    %cst_7 = arith.constant dense<0.000000e+00> : vector<256x27xf32>
    %17 = tpu.matmul %15, %16, %cst_7 {dimension_numbers = #tpu.dot_dimension_numbers<[1], [0], [0], [1], [0, 0, 1, 1], [], []>} : vector<256x46xbf16>, vector<46x27xbf16>, vector<256x27xf32> -> vector<256x27xf32>
    %18 = vector.shape_cast %17 : vector<256x27xf32> to vector<8x32x27xf32>
    %c184 = arith.constant 184 : index
    %c0_8 = arith.constant 0 : index
    %19 = vector.load %arg2[%c184, %c0_8] : memref<624x64xf32, #tpu.memory_space<vmem>>, vector<16x32xf32>
    %20 = vector.shape_cast %19 : vector<16x32xf32> to vector<1x16x32xf32>
    %21 = vector.broadcast %20 : vector<1x16x32xf32> to vector<8x16x32xf32>
    %22 = vector.extract_strided_slice %18 {offsets = [0, 0, 0], sizes = [8, 32, 23], strides = [1, 1, 1]} : vector<8x32x27xf32> to vector<8x32x23xf32>
    %23 = arith.truncf %21 : vector<8x16x32xf32> to vector<8x16x32xbf16>
    %24 = arith.truncf %22 : vector<8x32x23xf32> to vector<8x32x23xbf16>
    %cst_9 = arith.constant dense<0.000000e+00> : vector<8x16x23xf32>
    %25 = tpu.matmul %23, %24, %cst_9 {dimension_numbers = #tpu.dot_dimension_numbers<[2], [1], [1], [2], [0, 0, 0, 1, 1, 2], [0], [0]>} : vector<8x16x32xbf16>, vector<8x32x23xbf16>, vector<8x16x23xf32> -> vector<8x16x23xf32>
    %c200 = arith.constant 200 : index
    %c0_10 = arith.constant 0 : index
    %26 = vector.load %arg2[%c200, %c0_10] : memref<624x64xf32, #tpu.memory_space<vmem>>, vector<16x32xf32>
    %27 = vector.shape_cast %26 : vector<16x32xf32> to vector<1x16x32xf32>
    %28 = vector.broadcast %27 : vector<1x16x32xf32> to vector<8x16x32xf32>
    %29 = vector.extract_strided_slice %18 {offsets = [0, 0, 1], sizes = [8, 32, 23], strides = [1, 1, 1]} : vector<8x32x27xf32> to vector<8x32x23xf32>
    %30 = arith.truncf %28 : vector<8x16x32xf32> to vector<8x16x32xbf16>
    %31 = arith.truncf %29 : vector<8x32x23xf32> to vector<8x32x23xbf16>
    %cst_11 = arith.constant dense<0.000000e+00> : vector<8x16x23xf32>
    %32 = tpu.matmul %30, %31, %cst_11 {dimension_numbers = #tpu.dot_dimension_numbers<[2], [1], [1], [2], [0, 0, 0, 1, 1, 2], [0], [0]>} : vector<8x16x32xbf16>, vector<8x32x23xbf16>, vector<8x16x23xf32> -> vector<8x16x23xf32>
    %33 = arith.addf %25, %32 : vector<8x16x23xf32>
    %c216 = arith.constant 216 : index
    %c0_12 = arith.constant 0 : index
    %34 = vector.load %arg2[%c216, %c0_12] : memref<624x64xf32, #tpu.memory_space<vmem>>, vector<16x32xf32>
    %35 = vector.shape_cast %34 : vector<16x32xf32> to vector<1x16x32xf32>
    %36 = vector.broadcast %35 : vector<1x16x32xf32> to vector<8x16x32xf32>
    %37 = vector.extract_strided_slice %18 {offsets = [0, 0, 2], sizes = [8, 32, 23], strides = [1, 1, 1]} : vector<8x32x27xf32> to vector<8x32x23xf32>
    %38 = arith.truncf %36 : vector<8x16x32xf32> to vector<8x16x32xbf16>
    %39 = arith.truncf %37 : vector<8x32x23xf32> to vector<8x32x23xbf16>
    %cst_13 = arith.constant dense<0.000000e+00> : vector<8x16x23xf32>
    %40 = tpu.matmul %38, %39, %cst_13 {dimension_numbers = #tpu.dot_dimension_numbers<[2], [1], [1], [2], [0, 0, 0, 1, 1, 2], [0], [0]>} : vector<8x16x32xbf16>, vector<8x32x23xbf16>, vector<8x16x23xf32> -> vector<8x16x23xf32>
    %41 = arith.addf %33, %40 : vector<8x16x23xf32>
    %c232 = arith.constant 232 : index
    %c0_14 = arith.constant 0 : index
    %42 = vector.load %arg2[%c232, %c0_14] : memref<624x64xf32, #tpu.memory_space<vmem>>, vector<16x32xf32>
    %43 = vector.shape_cast %42 : vector<16x32xf32> to vector<1x16x32xf32>
    %44 = vector.broadcast %43 : vector<1x16x32xf32> to vector<8x16x32xf32>
    %45 = vector.extract_strided_slice %18 {offsets = [0, 0, 3], sizes = [8, 32, 23], strides = [1, 1, 1]} : vector<8x32x27xf32> to vector<8x32x23xf32>
    %46 = arith.truncf %44 : vector<8x16x32xf32> to vector<8x16x32xbf16>
    %47 = arith.truncf %45 : vector<8x32x23xf32> to vector<8x32x23xbf16>
    %cst_15 = arith.constant dense<0.000000e+00> : vector<8x16x23xf32>
    %48 = tpu.matmul %46, %47, %cst_15 {dimension_numbers = #tpu.dot_dimension_numbers<[2], [1], [1], [2], [0, 0, 0, 1, 1, 2], [0], [0]>} : vector<8x16x32xbf16>, vector<8x32x23xbf16>, vector<8x16x23xf32> -> vector<8x16x23xf32>
    %49 = arith.addf %41, %48 : vector<8x16x23xf32>
    %c248 = arith.constant 248 : index
    %c0_16 = arith.constant 0 : index
    %50 = vector.load %arg2[%c248, %c0_16] : memref<624x64xf32, #tpu.memory_space<vmem>>, vector<16x32xf32>
    %51 = vector.shape_cast %50 : vector<16x32xf32> to vector<1x16x32xf32>
    %52 = vector.broadcast %51 : vector<1x16x32xf32> to vector<8x16x32xf32>
    %53 = vector.extract_strided_slice %18 {offsets = [0, 0, 4], sizes = [8, 32, 23], strides = [1, 1, 1]} : vector<8x32x27xf32> to vector<8x32x23xf32>
    %54 = arith.truncf %52 : vector<8x16x32xf32> to vector<8x16x32xbf16>
    %55 = arith.truncf %53 : vector<8x32x23xf32> to vector<8x32x23xbf16>
    %cst_17 = arith.constant dense<0.000000e+00> : vector<8x16x23xf32>
    %56 = tpu.matmul %54, %55, %cst_17 {dimension_numbers = #tpu.dot_dimension_numbers<[2], [1], [1], [2], [0, 0, 0, 1, 1, 2], [0], [0]>} : vector<8x16x32xbf16>, vector<8x32x23xbf16>, vector<8x16x23xf32> -> vector<8x16x23xf32>
    %57 = arith.addf %49, %56 : vector<8x16x23xf32>
    %c264 = arith.constant 264 : index
    %c0_18 = arith.constant 0 : index
    %58 = vector.load %arg2[%c264, %c0_18] : memref<624x64xf32, #tpu.memory_space<vmem>>, vector<16x1xf32>
    %59 = vector.shape_cast %58 : vector<16x1xf32> to vector<1x16x1xf32>
    %60 = vector.broadcast %59 : vector<1x16x1xf32> to vector<8x16x23xf32>
    %61 = arith.addf %57, %60 : vector<8x16x23xf32>
    %cst_19 = arith.constant 0.000000e+00 : f32
    %62 = vector.broadcast %cst_19 : f32 to vector<8x16x23xf32>
    %63 = arith.maximumf %61, %62 : vector<8x16x23xf32>
    %64 = vector.shape_cast %63 : vector<8x16x23xf32> to vector<128x23xf32>
    %c48 = arith.constant 48 : index
    %c0_20 = arith.constant 0 : index
    %65 = vector.load %arg2[%c48, %c0_20] : memref<624x64xf32, #tpu.memory_space<vmem>>, vector<23x15xf32>
    %66 = arith.truncf %64 : vector<128x23xf32> to vector<128x23xbf16>
    %67 = arith.truncf %65 : vector<23x15xf32> to vector<23x15xbf16>
    %cst_21 = arith.constant dense<0.000000e+00> : vector<128x15xf32>
    %68 = tpu.matmul %66, %67, %cst_21 {dimension_numbers = #tpu.dot_dimension_numbers<[1], [0], [0], [1], [0, 0, 1, 1], [], []>} : vector<128x23xbf16>, vector<23x15xbf16>, vector<128x15xf32> -> vector<128x15xf32>
    %69 = vector.shape_cast %68 : vector<128x15xf32> to vector<8x16x15xf32>
    %c280 = arith.constant 280 : index
    %c0_22 = arith.constant 0 : index
    %70 = vector.load %arg2[%c280, %c0_22] : memref<624x64xf32, #tpu.memory_space<vmem>>, vector<8x16xf32>
    %71 = vector.shape_cast %70 : vector<8x16xf32> to vector<1x8x16xf32>
    %72 = vector.broadcast %71 : vector<1x8x16xf32> to vector<8x8x16xf32>
    %73 = vector.extract_strided_slice %69 {offsets = [0, 0, 0], sizes = [8, 16, 11], strides = [1, 1, 1]} : vector<8x16x15xf32> to vector<8x16x11xf32>
    %74 = arith.truncf %72 : vector<8x8x16xf32> to vector<8x8x16xbf16>
    %75 = arith.truncf %73 : vector<8x16x11xf32> to vector<8x16x11xbf16>
    %cst_23 = arith.constant dense<0.000000e+00> : vector<8x8x11xf32>
    %76 = tpu.matmul %74, %75, %cst_23 {dimension_numbers = #tpu.dot_dimension_numbers<[2], [1], [1], [2], [0, 0, 0, 1, 1, 2], [0], [0]>} : vector<8x8x16xbf16>, vector<8x16x11xbf16>, vector<8x8x11xf32> -> vector<8x8x11xf32>
    %c288 = arith.constant 288 : index
    %c0_24 = arith.constant 0 : index
    %77 = vector.load %arg2[%c288, %c0_24] : memref<624x64xf32, #tpu.memory_space<vmem>>, vector<8x16xf32>
    %78 = vector.shape_cast %77 : vector<8x16xf32> to vector<1x8x16xf32>
    %79 = vector.broadcast %78 : vector<1x8x16xf32> to vector<8x8x16xf32>
    %80 = vector.extract_strided_slice %69 {offsets = [0, 0, 1], sizes = [8, 16, 11], strides = [1, 1, 1]} : vector<8x16x15xf32> to vector<8x16x11xf32>
    %81 = arith.truncf %79 : vector<8x8x16xf32> to vector<8x8x16xbf16>
    %82 = arith.truncf %80 : vector<8x16x11xf32> to vector<8x16x11xbf16>
    %cst_25 = arith.constant dense<0.000000e+00> : vector<8x8x11xf32>
    %83 = tpu.matmul %81, %82, %cst_25 {dimension_numbers = #tpu.dot_dimension_numbers<[2], [1], [1], [2], [0, 0, 0, 1, 1, 2], [0], [0]>} : vector<8x8x16xbf16>, vector<8x16x11xbf16>, vector<8x8x11xf32> -> vector<8x8x11xf32>
    %84 = arith.addf %76, %83 : vector<8x8x11xf32>
    %c296 = arith.constant 296 : index
    %c0_26 = arith.constant 0 : index
    %85 = vector.load %arg2[%c296, %c0_26] : memref<624x64xf32, #tpu.memory_space<vmem>>, vector<8x16xf32>
    %86 = vector.shape_cast %85 : vector<8x16xf32> to vector<1x8x16xf32>
    %87 = vector.broadcast %86 : vector<1x8x16xf32> to vector<8x8x16xf32>
    %88 = vector.extract_strided_slice %69 {offsets = [0, 0, 2], sizes = [8, 16, 11], strides = [1, 1, 1]} : vector<8x16x15xf32> to vector<8x16x11xf32>
    %89 = arith.truncf %87 : vector<8x8x16xf32> to vector<8x8x16xbf16>
    %90 = arith.truncf %88 : vector<8x16x11xf32> to vector<8x16x11xbf16>
    %cst_27 = arith.constant dense<0.000000e+00> : vector<8x8x11xf32>
    %91 = tpu.matmul %89, %90, %cst_27 {dimension_numbers = #tpu.dot_dimension_numbers<[2], [1], [1], [2], [0, 0, 0, 1, 1, 2], [0], [0]>} : vector<8x8x16xbf16>, vector<8x16x11xbf16>, vector<8x8x11xf32> -> vector<8x8x11xf32>
    %92 = arith.addf %84, %91 : vector<8x8x11xf32>
    %c304 = arith.constant 304 : index
    %c0_28 = arith.constant 0 : index
    %93 = vector.load %arg2[%c304, %c0_28] : memref<624x64xf32, #tpu.memory_space<vmem>>, vector<8x16xf32>
    %94 = vector.shape_cast %93 : vector<8x16xf32> to vector<1x8x16xf32>
    %95 = vector.broadcast %94 : vector<1x8x16xf32> to vector<8x8x16xf32>
    %96 = vector.extract_strided_slice %69 {offsets = [0, 0, 3], sizes = [8, 16, 11], strides = [1, 1, 1]} : vector<8x16x15xf32> to vector<8x16x11xf32>
    %97 = arith.truncf %95 : vector<8x8x16xf32> to vector<8x8x16xbf16>
    %98 = arith.truncf %96 : vector<8x16x11xf32> to vector<8x16x11xbf16>
    %cst_29 = arith.constant dense<0.000000e+00> : vector<8x8x11xf32>
    %99 = tpu.matmul %97, %98, %cst_29 {dimension_numbers = #tpu.dot_dimension_numbers<[2], [1], [1], [2], [0, 0, 0, 1, 1, 2], [0], [0]>} : vector<8x8x16xbf16>, vector<8x16x11xbf16>, vector<8x8x11xf32> -> vector<8x8x11xf32>
    %100 = arith.addf %92, %99 : vector<8x8x11xf32>
    %c312 = arith.constant 312 : index
    %c0_30 = arith.constant 0 : index
    %101 = vector.load %arg2[%c312, %c0_30] : memref<624x64xf32, #tpu.memory_space<vmem>>, vector<8x16xf32>
    %102 = vector.shape_cast %101 : vector<8x16xf32> to vector<1x8x16xf32>
    %103 = vector.broadcast %102 : vector<1x8x16xf32> to vector<8x8x16xf32>
    %104 = vector.extract_strided_slice %69 {offsets = [0, 0, 4], sizes = [8, 16, 11], strides = [1, 1, 1]} : vector<8x16x15xf32> to vector<8x16x11xf32>
    %105 = arith.truncf %103 : vector<8x8x16xf32> to vector<8x8x16xbf16>
    %106 = arith.truncf %104 : vector<8x16x11xf32> to vector<8x16x11xbf16>
    %cst_31 = arith.constant dense<0.000000e+00> : vector<8x8x11xf32>
    %107 = tpu.matmul %105, %106, %cst_31 {dimension_numbers = #tpu.dot_dimension_numbers<[2], [1], [1], [2], [0, 0, 0, 1, 1, 2], [0], [0]>} : vector<8x8x16xbf16>, vector<8x16x11xbf16>, vector<8x8x11xf32> -> vector<8x8x11xf32>
    %108 = arith.addf %100, %107 : vector<8x8x11xf32>
    %c320 = arith.constant 320 : index
    %c0_32 = arith.constant 0 : index
    %109 = vector.load %arg2[%c320, %c0_32] : memref<624x64xf32, #tpu.memory_space<vmem>>, vector<8x1xf32>
    %110 = vector.shape_cast %109 : vector<8x1xf32> to vector<1x8x1xf32>
    %111 = vector.broadcast %110 : vector<1x8x1xf32> to vector<8x8x11xf32>
    %112 = arith.addf %108, %111 : vector<8x8x11xf32>
    %cst_33 = arith.constant 0.000000e+00 : f32
    %113 = vector.broadcast %cst_33 : f32 to vector<8x8x11xf32>
    %114 = arith.maximumf %112, %113 : vector<8x8x11xf32>
    %115 = vector.shape_cast %114 : vector<8x8x11xf32> to vector<64x11xf32>
    %c72 = arith.constant 72 : index
    %c0_34 = arith.constant 0 : index
    %116 = vector.load %arg2[%c72, %c0_34] : memref<624x64xf32, #tpu.memory_space<vmem>>, vector<11x3xf32>
    %117 = arith.truncf %115 : vector<64x11xf32> to vector<64x11xbf16>
    %118 = arith.truncf %116 : vector<11x3xf32> to vector<11x3xbf16>
    %cst_35 = arith.constant dense<0.000000e+00> : vector<64x3xf32>
    %119 = tpu.matmul %117, %118, %cst_35 {dimension_numbers = #tpu.dot_dimension_numbers<[1], [0], [0], [1], [0, 0, 1, 1], [], []>} : vector<64x11xbf16>, vector<11x3xbf16>, vector<64x3xf32> -> vector<64x3xf32>
    %c88 = arith.constant 88 : index
    %c0_36 = arith.constant 0 : index
    %120 = vector.load %arg2[%c88, %c0_36] : memref<624x64xf32, #tpu.memory_space<vmem>>, vector<32x64xf32>
    %121 = arith.truncf %120 : vector<32x64xf32> to vector<32x64xbf16>
    %122 = arith.truncf %119 : vector<64x3xf32> to vector<64x3xbf16>
    %cst_37 = arith.constant dense<0.000000e+00> : vector<32x3xf32>
    %123 = tpu.matmul %121, %122, %cst_37 {dimension_numbers = #tpu.dot_dimension_numbers<[1], [0], [0], [1], [0, 0, 1, 1], [], []>} : vector<32x64xbf16>, vector<64x3xbf16>, vector<32x3xf32> -> vector<32x3xf32>
    %c328 = arith.constant 328 : index
    %c0_38 = arith.constant 0 : index
    %124 = vector.load %arg2[%c328, %c0_38] : memref<624x64xf32, #tpu.memory_space<vmem>>, vector<1x30xf32>
    %c336 = arith.constant 336 : index
    %c0_39 = arith.constant 0 : index
    %125 = vector.load %arg2[%c336, %c0_39] : memref<624x64xf32, #tpu.memory_space<vmem>>, vector<1x30xf32>
    %c0_40 = arith.constant 0 : index
    %c0_41 = arith.constant 0 : index
    %126 = vector.load %arg0[%c0_40, %c0_41] : memref<8x18xf32, #tpu.memory_space<vmem>>, vector<8x18xf32>
    %127 = vector.extract_strided_slice %124 {offsets = [0, 0], sizes = [1, 18], strides = [1, 1]} : vector<1x30xf32> to vector<1x18xf32>
    %128 = vector.broadcast %127 : vector<1x18xf32> to vector<8x18xf32>
    %129 = arith.mulf %126, %128 : vector<8x18xf32>
    %130 = vector.extract_strided_slice %125 {offsets = [0, 0], sizes = [1, 18], strides = [1, 1]} : vector<1x30xf32> to vector<1x18xf32>
    %131 = vector.broadcast %130 : vector<1x18xf32> to vector<8x18xf32>
    %132 = arith.addf %129, %131 : vector<8x18xf32>
    %c0_42 = arith.constant 0 : index
    %c0_43 = arith.constant 0 : index
    %133 = vector.load %arg4[%c0_42, %c0_43] : memref<8x62xf32, #tpu.memory_space<vmem>>, vector<8x18xf32>
    tpu.vector_store %arg4[%c0_42, %c0_43], %132 {strides = array<i32>} : memref<8x62xf32, #tpu.memory_space<vmem>>, vector<8x18xf32>,
    %134 = vector.extract_strided_slice %123 {offsets = [0, 0], sizes = [8, 3], strides = [1, 1]} : vector<32x3xf32> to vector<8x3xf32>
    %135 = vector.extract_strided_slice %124 {offsets = [0, 18], sizes = [1, 3], strides = [1, 1]} : vector<1x30xf32> to vector<1x3xf32>
    %136 = vector.broadcast %135 : vector<1x3xf32> to vector<8x3xf32>
    %137 = arith.mulf %134, %136 : vector<8x3xf32>
    %138 = vector.extract_strided_slice %125 {offsets = [0, 18], sizes = [1, 3], strides = [1, 1]} : vector<1x30xf32> to vector<1x3xf32>
    %139 = vector.broadcast %138 : vector<1x3xf32> to vector<8x3xf32>
    %140 = arith.addf %137, %139 : vector<8x3xf32>
    %c0_44 = arith.constant 0 : index
    %c18 = arith.constant 18 : index
    %141 = vector.load %arg4[%c0_44, %c18] : memref<8x62xf32, #tpu.memory_space<vmem>>, vector<8x3xf32>
    tpu.vector_store %arg4[%c0_44, %c18], %140 {strides = array<i32>} : memref<8x62xf32, #tpu.memory_space<vmem>>, vector<8x3xf32>,
    %142 = vector.extract_strided_slice %123 {offsets = [8, 0], sizes = [8, 3], strides = [1, 1]} : vector<32x3xf32> to vector<8x3xf32>
    %143 = vector.extract_strided_slice %124 {offsets = [0, 21], sizes = [1, 3], strides = [1, 1]} : vector<1x30xf32> to vector<1x3xf32>
    %144 = vector.broadcast %143 : vector<1x3xf32> to vector<8x3xf32>
    %145 = arith.mulf %142, %144 : vector<8x3xf32>
    %146 = vector.extract_strided_slice %125 {offsets = [0, 21], sizes = [1, 3], strides = [1, 1]} : vector<1x30xf32> to vector<1x3xf32>
    %147 = vector.broadcast %146 : vector<1x3xf32> to vector<8x3xf32>
    %148 = arith.addf %145, %147 : vector<8x3xf32>
    %c0_45 = arith.constant 0 : index
    %c21 = arith.constant 21 : index
    %149 = vector.load %arg4[%c0_45, %c21] : memref<8x62xf32, #tpu.memory_space<vmem>>, vector<8x3xf32>
    tpu.vector_store %arg4[%c0_45, %c21], %148 {strides = array<i32>} : memref<8x62xf32, #tpu.memory_space<vmem>>, vector<8x3xf32>,
    %150 = vector.extract_strided_slice %123 {offsets = [16, 0], sizes = [8, 3], strides = [1, 1]} : vector<32x3xf32> to vector<8x3xf32>
    %151 = vector.extract_strided_slice %124 {offsets = [0, 24], sizes = [1, 3], strides = [1, 1]} : vector<1x30xf32> to vector<1x3xf32>
    %152 = vector.broadcast %151 : vector<1x3xf32> to vector<8x3xf32>
    %153 = arith.mulf %150, %152 : vector<8x3xf32>
    %154 = vector.extract_strided_slice %125 {offsets = [0, 24], sizes = [1, 3], strides = [1, 1]} : vector<1x30xf32> to vector<1x3xf32>
    %155 = vector.broadcast %154 : vector<1x3xf32> to vector<8x3xf32>
    %156 = arith.addf %153, %155 : vector<8x3xf32>
    %c0_46 = arith.constant 0 : index
    %c24 = arith.constant 24 : index
    %157 = vector.load %arg4[%c0_46, %c24] : memref<8x62xf32, #tpu.memory_space<vmem>>, vector<8x3xf32>
    tpu.vector_store %arg4[%c0_46, %c24], %156 {strides = array<i32>} : memref<8x62xf32, #tpu.memory_space<vmem>>, vector<8x3xf32>,
    %158 = vector.extract_strided_slice %123 {offsets = [24, 0], sizes = [8, 3], strides = [1, 1]} : vector<32x3xf32> to vector<8x3xf32>
    %159 = vector.extract_strided_slice %124 {offsets = [0, 27], sizes = [1, 3], strides = [1, 1]} : vector<1x30xf32> to vector<1x3xf32>
    %160 = vector.broadcast %159 : vector<1x3xf32> to vector<8x3xf32>
    %161 = arith.mulf %158, %160 : vector<8x3xf32>
    %162 = vector.extract_strided_slice %125 {offsets = [0, 27], sizes = [1, 3], strides = [1, 1]} : vector<1x30xf32> to vector<1x3xf32>
    %163 = vector.broadcast %162 : vector<1x3xf32> to vector<8x3xf32>
    %164 = arith.addf %161, %163 : vector<8x3xf32>
    %c0_47 = arith.constant 0 : index
    %c27 = arith.constant 27 : index
    %165 = vector.load %arg4[%c0_47, %c27] : memref<8x62xf32, #tpu.memory_space<vmem>>, vector<8x3xf32>
    tpu.vector_store %arg4[%c0_47, %c27], %164 {strides = array<i32>} : memref<8x62xf32, #tpu.memory_space<vmem>>, vector<8x3xf32>,
    %c0_48 = arith.constant 0 : index
    %c0_49 = arith.constant 0 : index
    %166 = vector.load %arg4[%c0_48, %c0_49] : memref<8x62xf32, #tpu.memory_space<vmem>>, vector<8x30xf32>
    %c344 = arith.constant 344 : index
    %c0_50 = arith.constant 0 : index
    %167 = vector.load %arg2[%c344, %c0_50] : memref<624x64xf32, #tpu.memory_space<vmem>>, vector<30x16xf32>
    %168 = arith.truncf %166 : vector<8x30xf32> to vector<8x30xbf16>
    %169 = arith.truncf %167 : vector<30x16xf32> to vector<30x16xbf16>
    %cst_51 = arith.constant dense<0.000000e+00> : vector<8x16xf32>
    %170 = tpu.matmul %168, %169, %cst_51 {dimension_numbers = #tpu.dot_dimension_numbers<[1], [0], [0], [1], [0, 0, 1, 1], [], []>} : vector<8x30xbf16>, vector<30x16xbf16>, vector<8x16xf32> -> vector<8x16xf32>
    %c376 = arith.constant 376 : index
    %c0_52 = arith.constant 0 : index
    %171 = vector.load %arg2[%c376, %c0_52] : memref<624x64xf32, #tpu.memory_space<vmem>>, vector<1x16xf32>
    %172 = vector.broadcast %171 : vector<1x16xf32> to vector<8x16xf32>
    %173 = arith.addf %170, %172 : vector<8x16xf32>
    %cst_53 = arith.constant 0.000000e+00 : f32
    %174 = vector.broadcast %cst_53 : f32 to vector<8x16xf32>
    %175 = arith.maximumf %173, %174 : vector<8x16xf32>
    %c384 = arith.constant 384 : index
    %c0_54 = arith.constant 0 : index
    %176 = vector.load %arg2[%c384, %c0_54] : memref<624x64xf32, #tpu.memory_space<vmem>>, vector<16x16xf32>
    %177 = arith.truncf %175 : vector<8x16xf32> to vector<8x16xbf16>
    %178 = arith.truncf %176 : vector<16x16xf32> to vector<16x16xbf16>
    %cst_55 = arith.constant dense<0.000000e+00> : vector<8x16xf32>
    %179 = tpu.matmul %177, %178, %cst_55 {dimension_numbers = #tpu.dot_dimension_numbers<[1], [0], [0], [1], [0, 0, 1, 1], [], []>} : vector<8x16xbf16>, vector<16x16xbf16>, vector<8x16xf32> -> vector<8x16xf32>
    %c400 = arith.constant 400 : index
    %c0_56 = arith.constant 0 : index
    %180 = vector.load %arg2[%c400, %c0_56] : memref<624x64xf32, #tpu.memory_space<vmem>>, vector<1x16xf32>
    %181 = vector.broadcast %180 : vector<1x16xf32> to vector<8x16xf32>
    %182 = arith.addf %179, %181 : vector<8x16xf32>
    %cst_57 = arith.constant 0.000000e+00 : f32
    %183 = vector.broadcast %cst_57 : f32 to vector<8x16xf32>
    %184 = arith.maximumf %182, %183 : vector<8x16xf32>
    %c408 = arith.constant 408 : index
    %c0_58 = arith.constant 0 : index
    %185 = vector.load %arg2[%c408, %c0_58] : memref<624x64xf32, #tpu.memory_space<vmem>>, vector<16x16xf32>
    %186 = arith.truncf %184 : vector<8x16xf32> to vector<8x16xbf16>
    %187 = arith.truncf %185 : vector<16x16xf32> to vector<16x16xbf16>
    %cst_59 = arith.constant dense<0.000000e+00> : vector<8x16xf32>
    %188 = tpu.matmul %186, %187, %cst_59 {dimension_numbers = #tpu.dot_dimension_numbers<[1], [0], [0], [1], [0, 0, 1, 1], [], []>} : vector<8x16xbf16>, vector<16x16xbf16>, vector<8x16xf32> -> vector<8x16xf32>
    %c424 = arith.constant 424 : index
    %c0_60 = arith.constant 0 : index
    %189 = vector.load %arg2[%c424, %c0_60] : memref<624x64xf32, #tpu.memory_space<vmem>>, vector<1x16xf32>
    %190 = vector.broadcast %189 : vector<1x16xf32> to vector<8x16xf32>
    %191 = arith.addf %188, %190 : vector<8x16xf32>
    %cst_61 = arith.constant 0.000000e+00 : f32
    %192 = vector.broadcast %cst_61 : f32 to vector<8x16xf32>
    %193 = arith.maximumf %191, %192 : vector<8x16xf32>
    %c0_62 = arith.constant 0 : index
    %c30 = arith.constant 30 : index
    %194 = vector.load %arg4[%c0_62, %c30] : memref<8x62xf32, #tpu.memory_space<vmem>>, vector<8x16xf32>
    tpu.vector_store %arg4[%c0_62, %c30], %193 {strides = array<i32>} : memref<8x62xf32, #tpu.memory_space<vmem>>, vector<8x16xf32>,
    %c0_63 = arith.constant 0 : index
    %c0_64 = arith.constant 0 : index
    %195 = vector.load %arg4[%c0_63, %c0_64] : memref<8x62xf32, #tpu.memory_space<vmem>>, vector<8x46xf32>
    %c432 = arith.constant 432 : index
    %c0_65 = arith.constant 0 : index
    %196 = vector.load %arg2[%c432, %c0_65] : memref<624x64xf32, #tpu.memory_space<vmem>>, vector<46x16xf32>
    %197 = arith.truncf %195 : vector<8x46xf32> to vector<8x46xbf16>
    %198 = arith.truncf %196 : vector<46x16xf32> to vector<46x16xbf16>
    %cst_66 = arith.constant dense<0.000000e+00> : vector<8x16xf32>
    %199 = tpu.matmul %197, %198, %cst_66 {dimension_numbers = #tpu.dot_dimension_numbers<[1], [0], [0], [1], [0, 0, 1, 1], [], []>} : vector<8x46xbf16>, vector<46x16xbf16>, vector<8x16xf32> -> vector<8x16xf32>
    %c480 = arith.constant 480 : index
    %c0_67 = arith.constant 0 : index
    %200 = vector.load %arg2[%c480, %c0_67] : memref<624x64xf32, #tpu.memory_space<vmem>>, vector<1x16xf32>
    %201 = vector.broadcast %200 : vector<1x16xf32> to vector<8x16xf32>
    %202 = arith.addf %199, %201 : vector<8x16xf32>
    %cst_68 = arith.constant 0.000000e+00 : f32
    %203 = vector.broadcast %cst_68 : f32 to vector<8x16xf32>
    %204 = arith.maximumf %202, %203 : vector<8x16xf32>
    %c488 = arith.constant 488 : index
    %c0_69 = arith.constant 0 : index
    %205 = vector.load %arg2[%c488, %c0_69] : memref<624x64xf32, #tpu.memory_space<vmem>>, vector<16x16xf32>
    %206 = arith.truncf %204 : vector<8x16xf32> to vector<8x16xbf16>
    %207 = arith.truncf %205 : vector<16x16xf32> to vector<16x16xbf16>
    %cst_70 = arith.constant dense<0.000000e+00> : vector<8x16xf32>
    %208 = tpu.matmul %206, %207, %cst_70 {dimension_numbers = #tpu.dot_dimension_numbers<[1], [0], [0], [1], [0, 0, 1, 1], [], []>} : vector<8x16xbf16>, vector<16x16xbf16>, vector<8x16xf32> -> vector<8x16xf32>
    %c504 = arith.constant 504 : index
    %c0_71 = arith.constant 0 : index
    %209 = vector.load %arg2[%c504, %c0_71] : memref<624x64xf32, #tpu.memory_space<vmem>>, vector<1x16xf32>
    %210 = vector.broadcast %209 : vector<1x16xf32> to vector<8x16xf32>
    %211 = arith.addf %208, %210 : vector<8x16xf32>
    %cst_72 = arith.constant 0.000000e+00 : f32
    %212 = vector.broadcast %cst_72 : f32 to vector<8x16xf32>
    %213 = arith.maximumf %211, %212 : vector<8x16xf32>
    %c512 = arith.constant 512 : index
    %c0_73 = arith.constant 0 : index
    %214 = vector.load %arg2[%c512, %c0_73] : memref<624x64xf32, #tpu.memory_space<vmem>>, vector<16x16xf32>
    %215 = arith.truncf %213 : vector<8x16xf32> to vector<8x16xbf16>
    %216 = arith.truncf %214 : vector<16x16xf32> to vector<16x16xbf16>
    %cst_74 = arith.constant dense<0.000000e+00> : vector<8x16xf32>
    %217 = tpu.matmul %215, %216, %cst_74 {dimension_numbers = #tpu.dot_dimension_numbers<[1], [0], [0], [1], [0, 0, 1, 1], [], []>} : vector<8x16xbf16>, vector<16x16xbf16>, vector<8x16xf32> -> vector<8x16xf32>
    %c528 = arith.constant 528 : index
    %c0_75 = arith.constant 0 : index
    %218 = vector.load %arg2[%c528, %c0_75] : memref<624x64xf32, #tpu.memory_space<vmem>>, vector<1x16xf32>
    %219 = vector.broadcast %218 : vector<1x16xf32> to vector<8x16xf32>
    %220 = arith.addf %217, %219 : vector<8x16xf32>
    %cst_76 = arith.constant 0.000000e+00 : f32
    %221 = vector.broadcast %cst_76 : f32 to vector<8x16xf32>
    %222 = arith.maximumf %220, %221 : vector<8x16xf32>
    %c0_77 = arith.constant 0 : index
    %c46 = arith.constant 46 : index
    %223 = vector.load %arg4[%c0_77, %c46] : memref<8x62xf32, #tpu.memory_space<vmem>>, vector<8x16xf32>
    tpu.vector_store %arg4[%c0_77, %c46], %222 {strides = array<i32>} : memref<8x62xf32, #tpu.memory_space<vmem>>, vector<8x16xf32>,
    %c0_78 = arith.constant 0 : index
    %c0_79 = arith.constant 0 : index
    %224 = vector.load %arg4[%c0_78, %c0_79] : memref<8x62xf32, #tpu.memory_space<vmem>>, vector<8x62xf32>
    %c536 = arith.constant 536 : index
    %c0_80 = arith.constant 0 : index
    %225 = vector.load %arg2[%c536, %c0_80] : memref<624x64xf32, #tpu.memory_space<vmem>>, vector<62x32xf32>
    %226 = arith.truncf %224 : vector<8x62xf32> to vector<8x62xbf16>
    %227 = arith.truncf %225 : vector<62x32xf32> to vector<62x32xbf16>
    %cst_81 = arith.constant dense<0.000000e+00> : vector<8x32xf32>
    %228 = tpu.matmul %226, %227, %cst_81 {dimension_numbers = #tpu.dot_dimension_numbers<[1], [0], [0], [1], [0, 0, 1, 1], [], []>} : vector<8x62xbf16>, vector<62x32xbf16>, vector<8x32xf32> -> vector<8x32xf32>
    %c600 = arith.constant 600 : index
    %c0_82 = arith.constant 0 : index
    %229 = vector.load %arg2[%c600, %c0_82] : memref<624x64xf32, #tpu.memory_space<vmem>>, vector<1x32xf32>
    %230 = vector.broadcast %229 : vector<1x32xf32> to vector<8x32xf32>
    %231 = arith.addf %228, %230 : vector<8x32xf32>
    %cst_83 = arith.constant 0.000000e+00 : f32
    %232 = vector.broadcast %cst_83 : f32 to vector<8x32xf32>
    %233 = arith.maximumf %231, %232 : vector<8x32xf32>
    %c608 = arith.constant 608 : index
    %c0_84 = arith.constant 0 : index
    %234 = vector.load %arg2[%c608, %c0_84] : memref<624x64xf32, #tpu.memory_space<vmem>>, vector<1x32xf32>
    %235 = vector.broadcast %234 : vector<1x32xf32> to vector<8x32xf32>
    %236 = arith.mulf %233, %235 : vector<8x32xf32>
    %c616 = arith.constant 616 : index
    %c0_85 = arith.constant 0 : index
    %237 = vector.load %arg2[%c616, %c0_85] : memref<624x64xf32, #tpu.memory_space<vmem>>, vector<1x32xf32>
    %238 = vector.broadcast %237 : vector<1x32xf32> to vector<8x32xf32>
    %239 = arith.addf %236, %238 : vector<8x32xf32>
    %c0_86 = arith.constant 0 : index
    %c0_87 = arith.constant 0 : index
    %240 = vector.load %arg3[%c0_86, %c0_87] : memref<8x32xf32, #tpu.memory_space<vmem>>, vector<8x32xf32>
    tpu.vector_store %arg3[%c0_86, %c0_87], %239 {strides = array<i32>} : memref<8x32xf32, #tpu.memory_space<vmem>>, vector<8x32xf32>,
    return
  }
}

</mosaic_0001>

<bundles_post_ra>
// kernel: forward.1
= control target key start
LH: loop header
LB: loop body
LE: loop exit
PB: predicated region body
PF: predicated region fallthrough
CT: control target
= control target key end

     0   :  { %vm77_vm0 = vcmask 1046528   ;;  %vm78_vm1 = vcmask 1047552   ;;  %v6569_v3 = vmov 65535   ;;  %vm70_vm2 = vcmask 121856   ;;  %s7833_s0 = inlined_call_operand.vmem [shape: f32[8,18], index: 0, kind: input, shape index: {}]   ;;  %s7834_s1 = inlined_call_operand.vmem [shape: f32[8,15,46], index: 1, kind: input, shape index: {}]   ;;  %s7835_s2 = inlined_call_operand.vmem [shape: f32[624,64], index: 2, kind: input, shape index: {}]   ;;  %s7836_s3 = inlined_call_operand.hbm [shape: f32[8,32], index: 3, kind: output, shape index: {}]  }
   0x1   :  { %v20_v0 = vld [vmem:[%s7834_s1] sm:$0xff]  ;;  %v21_v1 = vld [vmem:[%s7834_s1 + $0x8] sm:$0x7f]  ;;  %v79_v4 = vsel %vm77_vm0, 4294967295, %v6569_v3  ;;  %v22_v5 = vld [vmem:[%s7834_s1 + $0x10] sm:$0xff]  ;;  %v6570_v18 = vmov 0  }
   0x2   :  { %v38_v2 = vpack.c.bf16 %v21_v1, %v20_v0  ;;  %v23_v6 = vld [vmem:[%s7834_s1 + $0x18] sm:$0x7f]  ;;  %v80_v8 = vsel %vm78_vm1, %v79_v4, 0  ;;  %v17_v10 = vld [vmem:[%s7835_s2 + $0x80] sm:$0xff]  ;;  %v18_v11 = vld [vmem:[%s7835_s2 + $0x88] sm:$0xff]  ;;  %6543 = vset.pattern.permute.xlu0 %v6570_v18  ;;  %6544 = vset.pattern.permute.xlu1 %v6570_v18 }
   0x3   :  { %v16_v7 = vld [vmem:[%s7835_s2 + $0x78] sm:$0xff]  ;;  %v39_v9 = vpack.c.bf16 %v23_v6, %v22_v5  ;;  %v19_v12 = vld [vmem:[%s7835_s2 + $0x90] sm:$0xff]  ;;  %v24_v15 = vld [vmem:[%s7834_s1 + $0x20] sm:$0xff] }
   0x4   :  { %v82_v13 = vand.u32 %v80_v8, %v38_v2  ;;  %v6634_v14 = vpack.c.bf16 %v17_v10, %v16_v7  ;;  %v25_v16 = vld [vmem:[%s7834_s1 + $0x28] sm:$0x7f]  ;;  %v26_v17 = vld [vmem:[%s7834_s1 + $0x30] sm:$0xff]  ;;  %v27_v21 = vld [vmem:[%s7834_s1 + $0x38] sm:$0x7f]  ;;  %v37_v24 = vpack.c.bf16 %v19_v12, %v18_v11 }
   0x5   :  { %v134_v19 = vand.u32 %v80_v8, %v39_v9  ;;  %v40_v20 = vpack.c.bf16 %v25_v16, %v24_v15  ;;  %v28_v22 = vld [vmem:[%s7834_s1 + $0x40] sm:$0xff]  ;;  %v29_v23 = vld [vmem:[%s7834_s1 + $0x48] sm:$0x7f]  ;;  %v41_v25 = vpack.c.bf16 %v27_v21, %v26_v17  ;;  %v30_v27 = vld [vmem:[%s7834_s1 + $0x50] sm:$0xff] }
   0x6   :  { %5781 = vmatprep.subr.bf16.mxu0 %v82_v13  ;;  %5783 = vmatprep.mubr.msk.bf16.mxu0 %vm70_vm2, %v6634_v14  ;;  %v42_v26 = vpack.c.bf16 %v29_v23, %v28_v22  ;;  %v31_v28 = vld [vmem:[%s7834_s1 + $0x58] sm:$0x7f] }
   0x7   :  { %5787 = vmatprep.subr.bf16.mxu1 %v134_v19  ;;  %5782 = vmatpush3.bf16.msra.mxu0 %v82_v13  ;;  %v186_v29 = vand.u32 %v80_v8, %v40_v20  ;;  %v43_v30 = vpack.c.bf16 %v31_v28, %v30_v27  ;;  %v238_v31 = vand.u32 %v80_v8, %v41_v25  ;;  %v46_v32 = vld [vmem:[%s7835_s2 + $0x98] sm:$0xff] }
   0x8   :  { %5788 = vmatpush3.bf16.msra.mxu1 %v134_v19  ;;  %5789 = vmatprep.mubr.msk.bf16.mxu1 %vm70_vm2, %v6634_v14  ;;  %v290_v33 = vand.u32 %v80_v8, %v42_v26 }
   0x9   :  { %5793 = vmatprep.subr.bf16.mxu0 %v186_v29  ;;  %52 = vperm.xlu0 %6543, %v46_v32  }
   0xa   :  { %8 = vsyncpa [#allocation4], 0  ;;  %5784 = vmatmul.mubr.msk.bf16.vlgmr.msra.gmra.mrb[0].mxu0 %vm70_vm2, %v37_v24  ;;  %5799 = vmatprep.subr.bf16.mxu1 %v238_v31  ;;  %v342_v34 = vand.u32 %v80_v8, %v43_v30  ;;  %v32_v35 = vld [vmem:[%s7834_s1 + $0x60] sm:$0xff]  ;;  %v33_v36 = vld [vmem:[%s7834_s1 + $0x68] sm:$0x7f]  ;;  %vm554_vm3 = vcmask 375808  }
   0xb   :  { %5790 = vmatmul.mubr.msk.bf16.vlgmr.msra.gmra.mrb[0].mxu1 %vm70_vm2, %v37_v24  ;;  %5794 = vmatpush3.bf16.msra.mxu0 %v186_v29  ;;  %v34_v37 = vld [vmem:[%s7834_s1 + $0x70] sm:$0xff]  ;;  %v35_v38 = vld [vmem:[%s7834_s1 + $0x78] sm:$0x7f]  ;;  %v48_v39 = vld [vmem:[%s7835_s2 + $0xa8] sm:$0xff]  ;;  %v44_v41 = vpack.c.bf16 %v33_v36, %v32_v35  ;;  %vm6572_vm4 = vmmov 0   ;;  %s6573_s17 = smov 127  }
   0xc   :  { %5800 = vmatpush3.bf16.msra.mxu1 %v238_v31  ;;  %5795 = vmatprep.mubr.msk.bf16.mxu0 %vm70_vm2, %v6634_v14  ;;  %v47_v40 = vld [vmem:[%s7835_s2 + $0xa0] sm:$0xff]  ;;  %v45_v42 = vpack.c.bf16 %v35_v38, %v34_v37  ;;  %v49_v43 = vld [vmem:[%s7835_s2 + $0xb0] sm:$0xff]  ;;  %v530_v47 = vld [vmem:[%s7835_s2 + $0x8] sm:$0xff]  ;;  %vm797_vm5 = vcmask 261120   ;;  %s6574_s22 = smov 126   ;;  %s6575_s23 = smov 125  }
   0xd   :  { %5801 = vmatprep.mubr.msk.bf16.mxu1 %vm70_vm2, %v6634_v14  ;;  %5805 = vmatprep.subr.bf16.mxu0 %v290_v33  ;;  %v394_v44 = vand.u32 %v80_v8, %v44_v41  ;;  %v529_v46 = vld [vmem:[%s7835_s2] sm:$0xff]  ;;  %v531_v49 = vld [vmem:[%s7835_s2 + $0x10] sm:$0xff]  ;;  %v532_v50 = vld [vmem:[%s7835_s2 + $0x18] sm:$0xff]  ;;  %s6576_s28 = smov 124   ;;  %vm2792_vm6 = vcmask 1042432   ;;  %vm2793_vm7 = vcmask 1043456  }
   0xe   :  { %5811 = vmatprep.subr.bf16.mxu1 %v342_v34  ;;  %62 = vperm.xlu1 %6544, %v48_v39   ;;  %v446_v45 = vand.u32 %v80_v8, %v45_v42  ;;  %v551_v48 = vpack.c.bf16 %v530_v47, %v529_v46  ;;  %v552_v51 = vpack.c.bf16 %v532_v50, %v531_v49  ;;  %v533_v52 = vld [vmem:[%s7835_s2 + $0x20] sm:$0xff]  ;;  %v534_v53 = vld [vmem:[%s7835_s2 + $0x28] sm:$0x3f]  ;;  %vm2767_vm8 = vcmask 187392   ;;  %s6577_s18 = smov 110   ;;  %s6578_s19 = smov 107  }
   0xf   :  { %57 = vperm.xlu0 %6543, %v47_v40   ;;  %v553_v54 = vpack.c.bf16 %v534_v53, %v533_v52  ;;  %vm2912_vm9 = vcmask 130048   ;;  %vm4700_vm10 = vcmask 1044480   ;;  %vm4701_vm11 = vcmask 1045504   ;;  %s6579_s24 = smov 104   ;;  %s6580_s25 = smov 101  }
  0x10   :  { %vm4687_vm12 = vcmask 89088   ;;  %vm4782_vm13 = vcmask 523264   ;;  %vm4851_vm14 = vcmask 146432   ;;  %s6581_s8 = smov 18   ;;  %s6582_s9 = smov 21   ;;  %vm4867_vm15 = vcmask 171152  }
  0x11   :  { %v604_v55 = vsel %vm77_vm0, %v553_v54, 0  ;;  %s6583_s10 = smov 24   ;;  %s6584_s11 = smov 27   ;;  %vm4881_vm1 = vcmask 195752  }
  0x12   :  { %5796 = vmatmul.mubr.msk.bf16.vlgmr.msra.gmra.mrb[4].mxu0 %vm70_vm2, %v37_v24  ;;  %67 = vperm.xlu1 %6544, %v49_v43  }
  0x13   :  { %5802 = vmatmul.mubr.msk.bf16.vlgmr.msra.gmra.mrb[4].mxu1 %vm70_vm2, %v37_v24  ;;  %5806 = vmatpush3.bf16.msra.mxu0 %v290_v33 }
  0x14   :  { %5812 = vmatpush3.bf16.msra.mxu1 %v342_v34  ;;  %5807 = vmatprep.mubr.msk.bf16.mxu0 %vm70_vm2, %v6634_v14 }
  0x15   :  { %5813 = vmatprep.mubr.msk.bf16.mxu1 %vm70_vm2, %v6634_v14  ;;  %5817 = vmatprep.subr.bf16.mxu0 %v394_v44 }
  0x16   :  { %5823 = vmatprep.subr.bf16.mxu1 %v446_v45 }
  0x1a   :  { %5808 = vmatmul.mubr.msk.bf16.vlgmr.msra.gmra.mrb[8].mxu0 %vm70_vm2, %v37_v24 }
  0x1b   :  { %5814 = vmatmul.mubr.msk.bf16.vlgmr.msra.gmra.mrb[8].mxu1 %vm70_vm2, %v37_v24  ;;  %5818 = vmatpush3.bf16.msra.mxu0 %v394_v44 }
  0x1c   :  { %5824 = vmatpush3.bf16.msra.mxu1 %v446_v45  ;;  %5819 = vmatprep.mubr.msk.bf16.mxu0 %vm70_vm2, %v6634_v14 }
  0x1d   :  { %5825 = vmatprep.mubr.msk.bf16.mxu1 %vm70_vm2, %v6634_v14  ;;  %5829 = vmatprep.subr.bf16.mxu0 %v551_v48 }
  0x22   :  { %5820 = vmatmul.mubr.msk.bf16.vlgmr.msra.gmra.mrb[12].mxu0 %vm70_vm2, %v37_v24 }
  0x23   :  { %5826 = vmatmul.mubr.msk.bf16.vlgmr.msra.gmra.mrb[12].mxu1 %vm70_vm2, %v37_v24  ;;  %5830 = vmatpush3.bf16.msra.mxu0 %v551_v48  ;;  %vm4895_vm2 = vcmask 220352  }
  0x24   :  { %5831 = vmatprep.subr.bf16.mxu0 %v552_v51 }
  0x27   :  { %5832 = vmatpush3.bf16.msra.mxu0 %v552_v51 }
  0x28   :  { %6523 = vmatprep.subr.msk.bf16.mxu0 %vm77_vm0, %v553_v54 }
  0x2b   :  { %5834 = vmatpush3.bf16.msra.mxu0 %v604_v55 }
  0x88   :  { %v6728_v56 = vpop.permute.xlu0 %52 }
  0x8d   :  { %v6730_v57 = vpop.permute.xlu1 %62 }
  0x8e   :  { %v6732_v58 = vpop.permute.xlu0 %57 }
  0x91   :  { %v6734_v59 = vpop.permute.xlu1 %67 }
  0xdd   :  { %v5785_v60 = vpop.f32.mrb[0].mxu0 }
  0xde   :  { %v127_v61 = vadd.f32 %v5785_v60, %v6730_v57  ;;  %v5791_v62 = vpop.f32.mrb[0].mxu1  ;;  %v118_v63 = vpop.f32.mrb[1].mxu0 }
  0xdf   :  { %v179_v0 = vadd.f32 %v5791_v62, %v6730_v57  ;;  %v119_v1 = vadd.f32 %v118_v63, %v6728_v56  ;;  %v170_v2 = vpop.f32.mrb[1].mxu1  ;;  %v5786_v4 = vpop.f32.mrb[2].mxu0 }
  0xe0   :  { %v171_v5 = vadd.f32 %v170_v2, %v6728_v56  ;;  %v130_v6 = vadd.f32 %v5786_v4, %v6734_v59  ;;  %v5792_v7 = vpop.f32.mrb[2].mxu1  ;;  %v121_v8 = vpop.f32.mrb[3].mxu0  ;;  %v499_v12 = vmax.f32 %v127_v61, 0.0 }
  0xe1   :  { %v182_v9 = vadd.f32 %v5792_v7, %v6734_v59  ;;  %v122_v10 = vadd.f32 %v121_v8, %v6732_v58  ;;  %v173_v11 = vpop.f32.mrb[3].mxu1  ;;  %v503_v15 = vmax.f32 %v179_v0, 0.0  ;;  %v497_v16 = vmax.f32 %v119_v1, 0.0 }
  0xe2   :  { %v500_v13 = vmax.f32 %v130_v6, 0.0  ;;  %v174_v14 = vadd.f32 %v173_v11, %v6732_v58  ;;  %v501_v19 = vmax.f32 %v171_v5, 0.0 }
  0xe3   :  { %v504_v17 = vmax.f32 %v182_v9, 0.0  ;;  %v498_v18 = vmax.f32 %v122_v10, 0.0 }
  0xe4   :  { %v536_v20 = vpack.c.bf16 %v500_v13, %v499_v12  ;;  %v502_v21 = vmax.f32 %v174_v14, 0.0 }
  0xe5   :  { %v538_v22 = vpack.c.bf16 %v504_v17, %v503_v15  ;;  %v535_v23 = vpack.c.bf16 %v498_v18, %v497_v16  ;;  %v5797_v24 = vpop.f32.mrb[4].mxu0 }
  0xe6   :  { %v537_v25 = vpack.c.bf16 %v502_v21, %v501_v19  ;;  %v231_v26 = vadd.f32 %v5797_v24, %v6730_v57  ;;  %v5803_v27 = vpop.f32.mrb[4].mxu1  ;;  %v222_v28 = vpop.f32.mrb[5].mxu0 }
  0xe7   :  { %v283_v29 = vadd.f32 %v5803_v27, %v6730_v57  ;;  %v223_v30 = vadd.f32 %v222_v28, %v6728_v56  ;;  %v274_v31 = vpop.f32.mrb[5].mxu1  ;;  %v5798_v32 = vpop.f32.mrb[6].mxu0  ;;  %5835 = vmatprep.mubr.msk.bf16.mxu0 %vm554_vm3, %v535_v23 }
  0xe8   :  { %v275_v33 = vadd.f32 %v274_v31, %v6728_v56  ;;  %v234_v34 = vadd.f32 %v5798_v32, %v6734_v59  ;;  %v5804_v35 = vpop.f32.mrb[6].mxu1  ;;  %v225_v36 = vpop.f32.mrb[7].mxu0  ;;  %5836 = vmatmul.mubr.msk.bf16.vlgmr.msra.gmra.mrb[16].mxu0 %vm554_vm3, %v536_v20  ;;  %v507_v40 = vmax.f32 %v231_v26, 0.0 }
  0xe9   :  { %v286_v37 = vadd.f32 %v5804_v35, %v6734_v59  ;;  %v226_v38 = vadd.f32 %v225_v36, %v6732_v58  ;;  %v277_v39 = vpop.f32.mrb[7].mxu1  ;;  %5839 = vmatprep.mubr.msk.bf16.mxu0 %vm554_vm3, %v537_v25  ;;  %v511_v43 = vmax.f32 %v283_v29, 0.0  ;;  %v505_v44 = vmax.f32 %v223_v30, 0.0 }
  0xea   :  { %v508_v41 = vmax.f32 %v234_v34, 0.0  ;;  %v278_v42 = vadd.f32 %v277_v39, %v6732_v58  ;;  %v509_v47 = vmax.f32 %v275_v33, 0.0 }
  0xeb   :  { %v512_v45 = vmax.f32 %v286_v37, 0.0  ;;  %v506_v46 = vmax.f32 %v226_v38, 0.0 }
  0xec   :  { %v540_v48 = vpack.c.bf16 %v508_v41, %v507_v40  ;;  %v510_v49 = vmax.f32 %v278_v42, 0.0 }
  0xed   :  { %v6755_v50 = vpack.c.bf16 %v512_v45, %v511_v43  ;;  %v539_v51 = vpack.c.bf16 %v506_v46, %v505_v44  ;;  %v5809_v52 = vpop.f32.mrb[8].mxu0 }
  0xee   :  { %v541_v53 = vpack.c.bf16 %v510_v49, %v509_v47  ;;  %v335_v54 = vadd.f32 %v5809_v52, %v6730_v57  ;;  %v5815_v55 = vpop.f32.mrb[8].mxu1  ;;  %v326_v60 = vpop.f32.mrb[9].mxu0 }
  0xef   :  { %v387_v61 = vadd.f32 %v5815_v55, %v6730_v57  ;;  %v327_v62 = vadd.f32 %v326_v60, %v6728_v56  ;;  %v378_v63 = vpop.f32.mrb[9].mxu1  ;;  %v5810_v0 = vpop.f32.mrb[10].mxu0 }
  0xf0   :  { %v379_v1 = vadd.f32 %v378_v63, %v6728_v56  ;;  %v338_v2 = vadd.f32 %v5810_v0, %v6734_v59  ;;  %v5816_v4 = vpop.f32.mrb[10].mxu1  ;;  %v329_v5 = vpop.f32.mrb[11].mxu0  ;;  %5840 = vmatmul.mubr.msk.bf16.gmra.mrb[20].mxu0 %vm554_vm3, %v538_v22  ;;  %v515_v9 = vmax.f32 %v335_v54, 0.0  ;;  %v767_v63 = vld [vmem:[%s7835_s2 + $0xb8] sm:$0xff]  ;;  %v768_v0 = vld [vmem:[%s7835_s2 + $0xc0] sm:$0xff] }
  0xf1   :  { %v390_v6 = vadd.f32 %v5816_v4, %v6734_v59  ;;  %v330_v7 = vadd.f32 %v329_v5, %v6732_v58  ;;  %v381_v8 = vpop.f32.mrb[11].mxu1  ;;  %5843 = vmatprep.mubr.msk.bf16.mxu0 %vm554_vm3, %v539_v51  ;;  %v519_v12 = vmax.f32 %v387_v61, 0.0  ;;  %v513_v13 = vmax.f32 %v327_v62, 0.0 }
  0xf2   :  { %v516_v10 = vmax.f32 %v338_v2, 0.0  ;;  %v382_v11 = vadd.f32 %v381_v8, %v6732_v58  ;;  %v517_v16 = vmax.f32 %v379_v1, 0.0  ;;  %v6817_v4 = vpack.c.bf16 %v768_v0, %v767_v63 }
  0xf3   :  { %v520_v14 = vmax.f32 %v390_v6, 0.0  ;;  %v514_v15 = vmax.f32 %v330_v7, 0.0 }
  0xf4   :  { %v544_v17 = vpack.c.bf16 %v516_v10, %v515_v9  ;;  %v518_v18 = vmax.f32 %v382_v11, 0.0 }
  0xf5   :  { %v546_v19 = vpack.c.bf16 %v520_v14, %v519_v12  ;;  %v543_v20 = vpack.c.bf16 %v514_v15, %v513_v13  ;;  %v5821_v21 = vpop.f32.mrb[12].mxu0 }
  0xf6   :  { %v545_v22 = vpack.c.bf16 %v518_v18, %v517_v16  ;;  %v439_v23 = vadd.f32 %v5821_v21, %v6730_v57  ;;  %v5827_v24 = vpop.f32.mrb[12].mxu1  ;;  %v430_v25 = vpop.f32.mrb[13].mxu0 }
  0xf7   :  { %v491_v26 = vadd.f32 %v5827_v24, %v6730_v57  ;;  %v431_v27 = vadd.f32 %v430_v25, %v6728_v56  ;;  %v482_v28 = vpop.f32.mrb[13].mxu1  ;;  %v5822_v29 = vpop.f32.mrb[14].mxu0 }
  0xf8   :  { %v483_v30 = vadd.f32 %v482_v28, %v6728_v56  ;;  %v442_v31 = vadd.f32 %v5822_v29, %v6734_v59  ;;  %v5828_v32 = vpop.f32.mrb[14].mxu1  ;;  %v433_v33 = vpop.f32.mrb[15].mxu0  ;;  %5844 = vmatmul.mubr.msk.bf16.gmra.mrb[24].mxu0 %vm554_vm3, %v540_v48  ;;  %v523_v57 = vmax.f32 %v439_v23, 0.0 }
  0xf9   :  { %v494_v34 = vadd.f32 %v5828_v32, %v6734_v59  ;;  %v434_v35 = vadd.f32 %v433_v33, %v6732_v58  ;;  %v485_v36 = vpop.f32.mrb[15].mxu1  ;;  %5847 = vmatprep.mubr.msk.bf16.mxu0 %vm554_vm3, %v541_v53  ;;  %v527_v39 = vmax.f32 %v491_v26, 0.0  ;;  %v521_v40 = vmax.f32 %v431_v27, 0.0 }
  0xfa   :  { %v524_v37 = vmax.f32 %v442_v31, 0.0  ;;  %v486_v38 = vadd.f32 %v485_v36, %v6732_v58  ;;  %v525_v42 = vmax.f32 %v483_v30, 0.0  ;;  %v6571_v58 = vmov 0.0  }
  0xfb   :  { %v528_v56 = vmax.f32 %v494_v34, 0.0  ;;  %v522_v41 = vmax.f32 %v434_v35, 0.0  ;;  %5939 = vmatprep.subr.bf16.mxu0 %v6571_v58  ;;  %5867 = vmatprep.subr.bf16.mxu1 %v6571_v58 }
  0xfc   :  { %v548_v43 = vpack.c.bf16 %v524_v37, %v523_v57  ;;  %v526_v44 = vmax.f32 %v486_v38, 0.0  ;;  %5871 = vmatprep.mubr.msk.bf16.mxu1 %vm6572_vm4, %v6571_v58 }
  0xfd   :  { %v550_v45 = vpack.c.bf16 %v528_v56, %v527_v39  ;;  %v547_v46 = vpack.c.bf16 %v522_v41, %v521_v40  ;;  %v786_v39 = vld [vmem:[%s7835_s2 + $0xc8] sm:$0xff]  ;;  %v787_v40 = vld [vmem:[%s7835_s2 + $0xd0] sm:$0xff] }
  0xfe   :  { %v549_v47 = vpack.c.bf16 %v526_v44, %v525_v42  ;;  %v6964_v41 = vpack.c.bf16 %v787_v40, %v786_v39 }
 0x100   :  { %5848 = vmatmul.mubr.msk.bf16.gmra.mrb[28].mxu0 %vm554_vm3, %v6755_v50 }
 0x101   :  { %5851 = vmatprep.mubr.msk.bf16.mxu0 %vm554_vm3, %v543_v20 }
 0x108   :  { %5852 = vmatmul.mubr.msk.bf16.gmra.mrb[32].mxu0 %vm554_vm3, %v544_v17 }
 0x109   :  { %5855 = vmatprep.mubr.msk.bf16.mxu0 %vm554_vm3, %v545_v22 }
 0x110   :  { %5856 = vmatmul.mubr.msk.bf16.gmra.mrb[36].mxu0 %vm554_vm3, %v546_v19 }
 0x111   :  { %5859 = vmatprep.mubr.msk.bf16.mxu0 %vm554_vm3, %v547_v46 }
 0x118   :  { %5860 = vmatmul.mubr.msk.bf16.gmra.mrb[40].mxu0 %vm554_vm3, %v548_v43 }
 0x119   :  { %5863 = vmatprep.mubr.msk.bf16.mxu0 %vm554_vm3, %v549_v47 }
 0x120   :  { %5864 = vmatmul.mubr.msk.bf16.gmra.mrb[44].mxu0 %vm554_vm3, %v550_v45 }
 0x121   :  { %5943 = vmatprep.mubr.msk.bf16.mxu0 %vm6572_vm4, %v6571_v58 }
 0x1bb   :  { %v5837_v59 = vpop.f32.mrb[16].mxu0 }
 0x1bc   :  { %v640_v48 = vpop.f32.mrb[17].mxu0 }
 0x1bd   :  { %v5838_v49 = vpop.f32.mrb[18].mxu0 }
 0x1be   :  { %v6793_v50 = vpack.c.bf16 %v5838_v49, %v5837_v59  ;;  %v643_v51 = vpop.f32.mrb[19].mxu0  ;;  %v2711_v49 = vld [vmem:[%s7835_s2 + $0x110] sm:$0xff] }
 0x1bf   :  { %v6795_v52 = vpack.c.bf16 %v643_v51, %v640_v48  ;;  %v2710_v51 = vld [vmem:[%s7835_s2 + $0x108] sm:$0xff] }
 0x1c0   :  { %793 = vrot.lane.b32.xlu1 %v6793_v50, %s6573_s17 }
 0x1c1   :  { %791 = vrot.lane.b32.xlu0 %v6795_v52, %s6573_s17 }
 0x1c3   :  { %v5841_v53 = vpop.f32.mrb[20].mxu0 }
 0x1c4   :  { %v656_v54 = vpop.f32.mrb[21].mxu0 }
 0x1c5   :  { %v5842_v55 = vpop.f32.mrb[22].mxu0 }
 0x1c6   :  { %v6801_v60 = vpack.c.bf16 %v5842_v55, %v5841_v53  ;;  %v659_v61 = vpop.f32.mrb[23].mxu0 }
 0x1c7   :  { %v6803_v62 = vpack.c.bf16 %v659_v61, %v656_v54 }
 0x1c8   :  { %846 = vrot.lane.b32.xlu1 %v6801_v60, %s6573_s17 }
 0x1c9   :  { %844 = vrot.lane.b32.xlu0 %v6803_v62, %s6573_s17  ;;  %5940 = vmatpush3.bf16.msra.mxu0 %v6803_v62 }
 0x1ca   :  { %5941 = vmatprep.subr.bf16.mxu0 %v6571_v58 }
 0x1cb   :  { %v5845_v1 = vpop.f32.mrb[24].mxu0 }
 0x1cc   :  { %v672_v2 = vpop.f32.mrb[25].mxu0 }
 0x1cd   :  { %v5846_v5 = vpop.f32.mrb[26].mxu0  ;;  %5942 = vmatpush3.bf16.msra.mxu0 %v6801_v60 }
 0x1ce   :  { %v6820_v6 = vpack.c.bf16 %v5846_v5, %v5845_v1  ;;  %v675_v7 = vpop.f32.mrb[27].mxu0  ;;  %5955 = vmatprep.subr.bf16.mxu0 %v6571_v58  ;;  %v1516_v1 = vld [vmem:[%s7835_s2 + $0xd8] sm:$0xff] }
 0x1cf   :  { %v6823_v8 = vpack.c.bf16 %v675_v7, %v672_v2  ;;  %v1517_v2 = vld [vmem:[%s7835_s2 + $0xe0] sm:$0xff] }
 0x1d0   :  { %895 = vrot.lane.b32.xlu1 %v6820_v6, %s6573_s17  ;;  %5944 = vmatmul.mubr.msk.bf16.vlgmr.msra.gmra.mrb[48].mxu0 %vm797_vm5, %v6817_v4  ;;  %v7060_v7 = vpack.c.bf16 %v1517_v2, %v1516_v1 }
 0x1d1   :  { %893 = vrot.lane.b32.xlu0 %v6823_v8, %s6573_s17  ;;  %5959 = vmatprep.mubr.msk.bf16.mxu0 %vm6572_vm4, %v6571_v58 }
 0x1d3   :  { %v5849_v9 = vpop.f32.mrb[28].mxu0 }
 0x1d4   :  { %v688_v10 = vpop.f32.mrb[29].mxu0 }
 0x1d5   :  { %v5850_v11 = vpop.f32.mrb[30].mxu0 }
 0x1d6   :  { %v6833_v12 = vpack.c.bf16 %v5850_v11, %v5849_v9  ;;  %v691_v13 = vpop.f32.mrb[31].mxu0 }
 0x1d7   :  { %v6835_v14 = vpack.c.bf16 %v691_v13, %v688_v10 }
 0x1d8   :  { %944 = vrot.lane.b32.xlu1 %v6833_v12, %s6573_s17 }
 0x1d9   :  { %942 = vrot.lane.b32.xlu0 %v6835_v14, %s6573_s17  ;;  %5956 = vmatpush3.bf16.msra.mxu0 %v6835_v14 }
 0x1da   :  { %5957 = vmatprep.subr.bf16.mxu0 %v6571_v58 }
 0x1db   :  { %v5853_v15 = vpop.f32.mrb[32].mxu0 }
 0x1dc   :  { %v704_v16 = vpop.f32.mrb[33].mxu0 }
 0x1dd   :  { %v5854_v17 = vpop.f32.mrb[34].mxu0  ;;  %5958 = vmatpush3.bf16.msra.mxu0 %v6833_v12 }
 0x1de   :  { %v6844_v18 = vpack.c.bf16 %v5854_v17, %v5853_v15  ;;  %v707_v19 = vpop.f32.mrb[35].mxu0  ;;  %5971 = vmatprep.subr.bf16.mxu0 %v6571_v58 }
 0x1df   :  { %v6847_v20 = vpack.c.bf16 %v707_v19, %v704_v16  ;;  %v1914_v19 = vld [vmem:[%s7835_s2 + $0xe8] sm:$0xff] }
 0x1e0   :  { %993 = vrot.lane.b32.xlu1 %v6844_v18, %s6573_s17  ;;  %5960 = vmatmul.mubr.msk.bf16.vlgmr.msra.gmra.mrb[52].mxu0 %vm797_vm5, %v6817_v4 }
 0x1e1   :  { %991 = vrot.lane.b32.xlu0 %v6847_v20, %s6573_s17  ;;  %5975 = vmatprep.mubr.msk.bf16.mxu0 %vm6572_vm4, %v6571_v58 }
 0x1e3   :  { %v5857_v21 = vpop.f32.mrb[36].mxu0 }
 0x1e4   :  { %v720_v22 = vpop.f32.mrb[37].mxu0 }
 0x1e5   :  { %v5858_v23 = vpop.f32.mrb[38].mxu0 }
 0x1e6   :  { %v6857_v24 = vpack.c.bf16 %v5858_v23, %v5857_v21  ;;  %v723_v25 = vpop.f32.mrb[39].mxu0 }
 0x1e7   :  { %v6859_v26 = vpack.c.bf16 %v723_v25, %v720_v22 }
 0x1e8   :  { %1042 = vrot.lane.b32.xlu1 %v6857_v24, %s6573_s17 }
 0x1e9   :  { %1040 = vrot.lane.b32.xlu0 %v6859_v26, %s6573_s17  ;;  %5972 = vmatpush3.bf16.msra.mxu0 %v6859_v26 }
 0x1ea   :  { %5973 = vmatprep.subr.bf16.mxu0 %v6571_v58 }
 0x1eb   :  { %v5861_v27 = vpop.f32.mrb[40].mxu0 }
 0x1ec   :  { %v736_v28 = vpop.f32.mrb[41].mxu0 }
 0x1ed   :  { %v5862_v29 = vpop.f32.mrb[42].mxu0  ;;  %5974 = vmatpush3.bf16.msra.mxu0 %v6857_v24 }
 0x1ee   :  { %v6868_v30 = vpack.c.bf16 %v5862_v29, %v5861_v27  ;;  %v739_v31 = vpop.f32.mrb[43].mxu0  ;;  %5987 = vmatprep.subr.bf16.mxu0 %v6571_v58 }
 0x1ef   :  { %v6871_v32 = vpack.c.bf16 %v739_v31, %v736_v28 }
 0x1f0   :  { %1091 = vrot.lane.b32.xlu1 %v6868_v30, %s6573_s17  ;;  %5976 = vmatmul.mubr.msk.bf16.vlgmr.msra.gmra.mrb[56].mxu0 %vm797_vm5, %v6817_v4 }
 0x1f1   :  { %1089 = vrot.lane.b32.xlu0 %v6871_v32, %s6573_s17  ;;  %5991 = vmatprep.mubr.msk.bf16.mxu0 %vm6572_vm4, %v6571_v58 }
 0x1f3   :  { %v5865_v33 = vpop.f32.mrb[44].mxu0 }
 0x1f4   :  { %v752_v34 = vpop.f32.mrb[45].mxu0 }
 0x1f5   :  { %v5866_v35 = vpop.f32.mrb[46].mxu0 }
 0x1f6   :  { %v6881_v36 = vpack.c.bf16 %v5866_v35, %v5865_v33  ;;  %v755_v57 = vpop.f32.mrb[47].mxu0 }
 0x1f7   :  { %v6883_v37 = vpack.c.bf16 %v755_v57, %v752_v34 }
 0x1f8   :  { %1140 = vrot.lane.b32.xlu1 %v6881_v36, %s6573_s17 }
 0x1f9   :  { %1138 = vrot.lane.b32.xlu0 %v6883_v37, %s6573_s17  ;;  %5988 = vmatpush3.bf16.msra.mxu0 %v6883_v37 }
 0x1fa   :  { %5989 = vmatprep.subr.bf16.mxu0 %v6571_v58 }
 0x1fc   :  { %1569 = vrot.lane.b32.xlu1 %v6803_v62, %s6574_s22 }
 0x1fd   :  { %1519 = vrot.lane.b32.xlu0 %v6795_v52, %s6574_s22  ;;  %5990 = vmatpush3.bf16.msra.mxu0 %v6881_v36 }
 0x1fe   :  { %6003 = vmatprep.subr.bf16.mxu0 %v6571_v58 }
 0x200   :  { %1571 = vrot.lane.b32.xlu1 %v6801_v60, %s6574_s22  ;;  %5992 = vmatmul.mubr.msk.bf16.vlgmr.msra.gmra.mrb[60].mxu0 %vm797_vm5, %v6817_v4 }
 0x201   :  { %1521 = vrot.lane.b32.xlu0 %v6793_v50, %s6574_s22  ;;  %6007 = vmatprep.mubr.msk.bf16.mxu0 %vm6572_vm4, %v6571_v58 }
 0x204   :  { %1663 = vrot.lane.b32.xlu1 %v6835_v14, %s6574_s22 }
 0x205   :  { %1616 = vrot.lane.b32.xlu0 %v6823_v8, %s6574_s22 }
 0x208   :  { %1665 = vrot.lane.b32.xlu1 %v6833_v12, %s6574_s22 }
 0x209   :  { %1618 = vrot.lane.b32.xlu0 %v6820_v6, %s6574_s22 }
 0x20c   :  { %1757 = vrot.lane.b32.xlu1 %v6859_v26, %s6574_s22 }
 0x20d   :  { %1710 = vrot.lane.b32.xlu0 %v6847_v20, %s6574_s22 }
 0x210   :  { %1759 = vrot.lane.b32.xlu1 %v6857_v24, %s6574_s22 }
 0x211   :  { %1712 = vrot.lane.b32.xlu0 %v6844_v18, %s6574_s22 }
 0x214   :  { %1851 = vrot.lane.b32.xlu1 %v6883_v37, %s6574_s22 }
 0x215   :  { %1804 = vrot.lane.b32.xlu0 %v6871_v32, %s6574_s22 }
 0x218   :  { %1853 = vrot.lane.b32.xlu1 %v6881_v36, %s6574_s22 }
 0x219   :  { %1806 = vrot.lane.b32.xlu0 %v6868_v30, %s6574_s22 }
 0x21c   :  { %1967 = vrot.lane.b32.xlu1 %v6803_v62, %s6575_s23 }
 0x21d   :  { %1917 = vrot.lane.b32.xlu0 %v6795_v52, %s6575_s23 }
 0x220   :  { %1969 = vrot.lane.b32.xlu1 %v6801_v60, %s6575_s23 }
 0x221   :  { %1919 = vrot.lane.b32.xlu0 %v6793_v50, %s6575_s23 }
 0x224   :  { %2061 = vrot.lane.b32.xlu1 %v6835_v14, %s6575_s23 }
 0x225   :  { %2014 = vrot.lane.b32.xlu0 %v6823_v8, %s6575_s23 }
 0x228   :  { %2063 = vrot.lane.b32.xlu1 %v6833_v12, %s6575_s23 }
 0x229   :  { %2016 = vrot.lane.b32.xlu0 %v6820_v6, %s6575_s23 }
 0x22c   :  { %2155 = vrot.lane.b32.xlu1 %v6859_v26, %s6575_s23 }
 0x22d   :  { %2108 = vrot.lane.b32.xlu0 %v6847_v20, %s6575_s23 }
 0x230   :  { %2157 = vrot.lane.b32.xlu1 %v6857_v24, %s6575_s23 }
 0x231   :  { %2110 = vrot.lane.b32.xlu0 %v6844_v18, %s6575_s23 }
 0x232   :  { %v794_v56 = vpop.permute.xlu1 %793 }
 0x233   :  { %v792_v38 = vpop.permute.xlu0 %791 }
 0x234   :  { %5868 = vmatpush3.bf16.msra.mxu1 %v792_v38  ;;  %2249 = vrot.lane.b32.xlu1 %v6883_v37, %s6575_s23  ;;  %v2313_v38 = vld [vmem:[%s7835_s2 + $0x100] sm:$0xff] }
 0x235   :  { %2202 = vrot.lane.b32.xlu0 %v6871_v32, %s6575_s23  ;;  %5869 = vmatprep.subr.bf16.mxu1 %v6571_v58 }
 0x238   :  { %5870 = vmatpush3.bf16.msra.mxu1 %v794_v56  ;;  %2251 = vrot.lane.b32.xlu1 %v6881_v36, %s6575_s23 }
 0x239   :  { %2204 = vrot.lane.b32.xlu0 %v6868_v30, %s6575_s23  ;;  %5875 = vmatprep.subr.bf16.mxu1 %v6571_v58 }
 0x23a   :  { %v847_v43 = vpop.permute.xlu1 %846 }
 0x23b   :  { %5872 = vmatmul.mubr.msk.bf16.vlgmr.msra.gmra.mrb[16].mxu1 %vm797_vm5, %v6964_v41  ;;  %v845_v42 = vpop.permute.xlu0 %844 }
 0x23c   :  { %5876 = vmatpush3.bf16.msra.mxu1 %v845_v42  ;;  %2365 = vrot.lane.b32.xlu1 %v6803_v62, %s6576_s28 }
 0x23d   :  { %2315 = vrot.lane.b32.xlu0 %v6795_v52, %s6576_s28  ;;  %5877 = vmatprep.subr.bf16.mxu1 %v6571_v58 }
 0x23e   :  { %5879 = vmatprep.mubr.msk.bf16.mxu1 %vm6572_vm4, %v6571_v58 }
 0x240   :  { %5878 = vmatpush3.bf16.msra.mxu1 %v847_v43  ;;  %2367 = vrot.lane.b32.xlu1 %v6801_v60, %s6576_s28 }
 0x241   :  { %2317 = vrot.lane.b32.xlu0 %v6793_v50, %s6576_s28  ;;  %5883 = vmatprep.subr.bf16.mxu1 %v6571_v58 }
 0x242   :  { %v896_v45 = vpop.permute.xlu1 %895 }
 0x243   :  { %5880 = vmatmul.mubr.msk.bf16.vlgmr.msra.gmra.mrb[20].mxu1 %vm797_vm5, %v6964_v41  ;;  %v894_v44 = vpop.permute.xlu0 %893 }
 0x244   :  { %5884 = vmatpush3.bf16.msra.mxu1 %v894_v44  ;;  %2459 = vrot.lane.b32.xlu1 %v6835_v14, %s6576_s28 }
 0x245   :  { %2412 = vrot.lane.b32.xlu0 %v6823_v8, %s6576_s28  ;;  %5885 = vmatprep.subr.bf16.mxu1 %v6571_v58 }
 0x246   :  { %5887 = vmatprep.mubr.msk.bf16.mxu1 %vm6572_vm4, %v6571_v58 }
 0x248   :  { %5886 = vmatpush3.bf16.msra.mxu1 %v896_v45  ;;  %2461 = vrot.lane.b32.xlu1 %v6833_v12, %s6576_s28 }
 0x249   :  { %2414 = vrot.lane.b32.xlu0 %v6820_v6, %s6576_s28  ;;  %5891 = vmatprep.subr.bf16.mxu1 %v6571_v58 }
 0x24a   :  { %v945_v47 = vpop.permute.xlu1 %944 }
 0x24b   :  { %5888 = vmatmul.mubr.msk.bf16.vlgmr.msra.gmra.mrb[24].mxu1 %vm797_vm5, %v6964_v41  ;;  %v943_v46 = vpop.permute.xlu0 %942 }
 0x24c   :  { %5892 = vmatpush3.bf16.msra.mxu1 %v943_v46  ;;  %2553 = vrot.lane.b32.xlu1 %v6859_v26, %s6576_s28 }
 0x24d   :  { %2506 = vrot.lane.b32.xlu0 %v6847_v20, %s6576_s28  ;;  %5893 = vmatprep.subr.bf16.mxu1 %v6571_v58 }
 0x24e   :  { %5895 = vmatprep.mubr.msk.bf16.mxu1 %vm6572_vm4, %v6571_v58 }
 0x250   :  { %5894 = vmatpush3.bf16.msra.mxu1 %v945_v47  ;;  %2555 = vrot.lane.b32.xlu1 %v6857_v24, %s6576_s28 }
 0x251   :  { %2508 = vrot.lane.b32.xlu0 %v6844_v18, %s6576_s28  ;;  %5899 = vmatprep.subr.bf16.mxu1 %v6571_v58 }
 0x252   :  { %v994_v48 = vpop.permute.xlu1 %993 }
 0x253   :  { %5896 = vmatmul.mubr.msk.bf16.vlgmr.msra.gmra.mrb[28].mxu1 %vm797_vm5, %v6964_v41  ;;  %v992_v59 = vpop.permute.xlu0 %991 }
 0x254   :  { %5900 = vmatpush3.bf16.msra.mxu1 %v992_v59  ;;  %2647 = vrot.lane.b32.xlu1 %v6883_v37, %s6576_s28  ;;  %v2312_v37 = vld [vmem:[%s7835_s2 + $0xf8] sm:$0xff] }
 0x255   :  { %2600 = vrot.lane.b32.xlu0 %v6871_v32, %s6576_s28  ;;  %5901 = vmatprep.subr.bf16.mxu1 %v6571_v58  ;;  %v7210_v40 = vpack.c.bf16 %v2313_v38, %v2312_v37  ;;  %v2794_v37 = vsel %vm2792_vm6, 4294967295, %v6569_v3  ;;  %vm4909_vm6 = vcmask 244952  }
 0x256   :  { %5903 = vmatprep.mubr.msk.bf16.mxu1 %vm6572_vm4, %v6571_v58  ;;  %v2795_v38 = vsel %vm2793_vm7, %v2794_v37, 0  ;;  %vm4924_vm7 = vcmask 244736  }
 0x258   :  { %5902 = vmatpush3.bf16.msra.mxu1 %v994_v48  ;;  %2649 = vrot.lane.b32.xlu1 %v6881_v36, %s6576_s28 }
 0x259   :  { %2602 = vrot.lane.b32.xlu0 %v6868_v30, %s6576_s28  ;;  %5907 = vmatprep.subr.bf16.mxu1 %v6571_v58 }
 0x25a   :  { %v1043_v54 = vpop.permute.xlu1 %1042 }
 0x25b   :  { %5904 = vmatmul.mubr.msk.bf16.vlgmr.msra.gmra.mrb[32].mxu1 %vm797_vm5, %v6964_v41  ;;  %v1041_v53 = vpop.permute.xlu0 %1040 }
 0x25c   :  { %5908 = vmatpush3.bf16.msra.mxu1 %v1041_v53  ;;  %2719 = vperm.xlu1 %6544, %v2711_v49  }
 0x25d   :  { %2714 = vperm.xlu0 %6543, %v2710_v51   ;;  %5909 = vmatprep.subr.bf16.mxu1 %v6571_v58 }
 0x25e   :  { %5911 = vmatprep.mubr.msk.bf16.mxu1 %vm6572_vm4, %v6571_v58 }
 0x260   :  { %5910 = vmatpush3.bf16.msra.mxu1 %v1043_v54 }
 0x261   :  { %5915 = vmatprep.subr.bf16.mxu1 %v6571_v58 }
 0x262   :  { %v1092_v60 = vpop.permute.xlu1 %1091 }
 0x263   :  { %5912 = vmatmul.mubr.msk.bf16.vlgmr.msra.gmra.mrb[36].mxu1 %vm797_vm5, %v6964_v41  ;;  %v1090_v55 = vpop.permute.xlu0 %1089 }
 0x264   :  { %5916 = vmatpush3.bf16.msra.mxu1 %v1090_v55  ;;  %5919 = vmatprep.mubr.msk.bf16.mxu1 %vm6572_vm4, %v6571_v58 }
 0x265   :  { %5917 = vmatprep.subr.bf16.mxu1 %v6571_v58 }
 0x268   :  { %5918 = vmatpush3.bf16.msra.mxu1 %v1092_v60 }
 0x269   :  { %5923 = vmatprep.subr.bf16.mxu1 %v6571_v58 }
 0x26a   :  { %v1141_v61 = vpop.permute.xlu1 %1140 }
 0x26b   :  { %5920 = vmatmul.mubr.msk.bf16.vlgmr.msra.gmra.mrb[40].mxu1 %vm797_vm5, %v6964_v41  ;;  %v1139_v62 = vpop.permute.xlu0 %1138 }
 0x26c   :  { %5924 = vmatpush3.bf16.msra.mxu1 %v1139_v62  ;;  %5927 = vmatprep.mubr.msk.bf16.mxu1 %vm6572_vm4, %v6571_v58 }
 0x26d   :  { %5925 = vmatprep.subr.bf16.mxu1 %v6571_v58 }
 0x26e   :  { %v1570_v63 = vpop.permute.xlu1 %1569 }
 0x26f   :  { %v7050_v0 = vpop.permute.xlu0 %1519  ;;  %6004 = vmatpush3.bf16.msra.mxu0 %v1570_v63 }
 0x270   :  { %5926 = vmatpush3.bf16.msra.mxu1 %v1141_v61  ;;  %6005 = vmatprep.subr.bf16.mxu0 %v6571_v58 }
 0x271   :  { %5931 = vmatprep.subr.bf16.mxu1 %v6571_v58 }
 0x272   :  { %v1572_v5 = vpop.permute.xlu1 %1571 }
 0x273   :  { %5928 = vmatmul.mubr.msk.bf16.vlgmr.msra.gmra.mrb[44].mxu1 %vm797_vm5, %v6964_v41  ;;  %v7064_v9 = vpop.permute.xlu0 %1521  ;;  %6006 = vmatpush3.bf16.msra.mxu0 %v1572_v5 }
 0x274   :  { %5932 = vmatpush3.bf16.msra.mxu1 %v6795_v52  ;;  %6019 = vmatprep.subr.bf16.mxu0 %v6571_v58 }
 0x275   :  { %5933 = vmatprep.subr.bf16.mxu1 %v6571_v58  ;;  %5935 = vmatprep.mubr.msk.bf16.mxu1 %vm6572_vm4, %v6571_v58 }
 0x276   :  { %v1664_v10 = vpop.permute.xlu1 %1663  ;;  %6008 = vmatmul.mubr.msk.bf16.vlgmr.msra.gmra.mrb[64].mxu0 %vm797_vm5, %v7060_v7 }
 0x277   :  { %v7073_v11 = vpop.permute.xlu0 %1616  ;;  %6020 = vmatpush3.bf16.msra.mxu0 %v1664_v10  ;;  %6023 = vmatprep.mubr.msk.bf16.mxu0 %vm6572_vm4, %v6571_v58 }
 0x278   :  { %5934 = vmatpush3.bf16.msra.mxu1 %v6793_v50  ;;  %6021 = vmatprep.subr.bf16.mxu0 %v6571_v58 }
 0x279   :  { %5947 = vmatprep.subr.bf16.mxu1 %v6571_v58 }
 0x27a   :  { %v1666_v52 = vpop.permute.xlu1 %1665 }
 0x27b   :  { %5936 = vmatmul.mubr.msk.bf16.vlgmr.msra.gmra.mrb[48].mxu1 %vm797_vm5, %v6817_v4  ;;  %v7082_v12 = vpop.permute.xlu0 %1618  ;;  %6022 = vmatpush3.bf16.msra.mxu0 %v1666_v52 }
 0x27c   :  { %5948 = vmatpush3.bf16.msra.mxu1 %v6823_v8  ;;  %6035 = vmatprep.subr.bf16.mxu0 %v6571_v58 }
 0x27d   :  { %5949 = vmatprep.subr.bf16.mxu1 %v6571_v58  ;;  %5951 = vmatprep.mubr.msk.bf16.mxu1 %vm6572_vm4, %v6571_v58 }
 0x27e   :  { %v1758_v50 = vpop.permute.xlu1 %1757  ;;  %6024 = vmatmul.mubr.msk.bf16.vlgmr.msra.gmra.mrb[68].mxu0 %vm797_vm5, %v7060_v7 }
 0x27f   :  { %v7091_v13 = vpop.permute.xlu0 %1710  ;;  %6036 = vmatpush3.bf16.msra.mxu0 %v1758_v50  ;;  %6039 = vmatprep.mubr.msk.bf16.mxu0 %vm6572_vm4, %v6571_v58 }
 0x280   :  { %5950 = vmatpush3.bf16.msra.mxu1 %v6820_v6  ;;  %6037 = vmatprep.subr.bf16.mxu0 %v6571_v58 }
 0x281   :  { %5963 = vmatprep.subr.bf16.mxu1 %v6571_v58 }
 0x282   :  { %v1760_v8 = vpop.permute.xlu1 %1759 }
 0x283   :  { %5952 = vmatmul.mubr.msk.bf16.vlgmr.msra.gmra.mrb[52].mxu1 %vm797_vm5, %v6817_v4  ;;  %v7100_v14 = vpop.permute.xlu0 %1712  ;;  %6038 = vmatpush3.bf16.msra.mxu0 %v1760_v8 }
 0x284   :  { %5964 = vmatpush3.bf16.msra.mxu1 %v6847_v20  ;;  %6051 = vmatprep.subr.bf16.mxu0 %v6571_v58  ;;  %v1915_v20 = vld [vmem:[%s7835_s2 + $0xf0] sm:$0xff] }
 0x285   :  { %5965 = vmatprep.subr.bf16.mxu1 %v6571_v58  ;;  %5967 = vmatprep.mubr.msk.bf16.mxu1 %vm6572_vm4, %v6571_v58  ;;  %v7138_v22 = vpack.c.bf16 %v1915_v20, %v1914_v19 }
 0x286   :  { %v1852_v6 = vpop.permute.xlu1 %1851  ;;  %6040 = vmatmul.mubr.msk.bf16.vlgmr.msra.gmra.mrb[72].mxu0 %vm797_vm5, %v7060_v7 }
 0x287   :  { %6052 = vmatpush3.bf16.msra.mxu0 %v1852_v6  ;;  %6055 = vmatprep.mubr.msk.bf16.mxu0 %vm6572_vm4, %v6571_v58  ;;  %v7113_v15 = vpop.permute.xlu0 %1804 }
 0x288   :  { %5966 = vmatpush3.bf16.msra.mxu1 %v6844_v18  ;;  %6053 = vmatprep.subr.bf16.mxu0 %v6571_v58 }
 0x289   :  { %5979 = vmatprep.subr.bf16.mxu1 %v6571_v58 }
 0x28a   :  { %v1854_v16 = vpop.permute.xlu1 %1853 }
 0x28b   :  { %5968 = vmatmul.mubr.msk.bf16.vlgmr.msra.gmra.mrb[56].mxu1 %vm797_vm5, %v6817_v4  ;;  %6054 = vmatpush3.bf16.msra.mxu0 %v1854_v16  ;;  %v7125_v18 = vpop.permute.xlu0 %1806 }
 0x28c   :  { %5980 = vmatpush3.bf16.msra.mxu1 %v6871_v32  ;;  %6067 = vmatprep.subr.bf16.mxu0 %v6571_v58 }
 0x28d   :  { %5981 = vmatprep.subr.bf16.mxu1 %v6571_v58  ;;  %5983 = vmatprep.mubr.msk.bf16.mxu1 %vm6572_vm4, %v6571_v58 }
 0x28e   :  { %v1968_v17 = vpop.permute.xlu1 %1967  ;;  %6056 = vmatmul.mubr.msk.bf16.vlgmr.msra.gmra.mrb[76].mxu0 %vm797_vm5, %v7060_v7 }
 0x28f   :  { %6068 = vmatpush3.bf16.msra.mxu0 %v1968_v17  ;;  %6071 = vmatprep.mubr.msk.bf16.mxu0 %vm6572_vm4, %v6571_v58  ;;  %v7144_v23 = vpop.permute.xlu0 %1917 }
 0x290   :  { %5982 = vmatpush3.bf16.msra.mxu1 %v6868_v30  ;;  %6069 = vmatprep.subr.bf16.mxu0 %v6571_v58 }
 0x291   :  { %5995 = vmatprep.subr.bf16.mxu1 %v6571_v58 }
 0x292   :  { %v1970_v21 = vpop.permute.xlu1 %1969 }
 0x293   :  { %5984 = vmatmul.mubr.msk.bf16.vlgmr.msra.gmra.mrb[60].mxu1 %vm797_vm5, %v6817_v4  ;;  %6070 = vmatpush3.bf16.msra.mxu0 %v1970_v21  ;;  %v7156_v25 = vpop.permute.xlu0 %1919 }
 0x294   :  { %5996 = vmatpush3.bf16.msra.mxu1 %v7050_v0  ;;  %6083 = vmatprep.subr.bf16.mxu0 %v6571_v58 }
 0x295   :  { %5997 = vmatprep.subr.bf16.mxu1 %v6571_v58  ;;  %5999 = vmatprep.mubr.msk.bf16.mxu1 %vm6572_vm4, %v6571_v58 }
 0x296   :  { %v2062_v24 = vpop.permute.xlu1 %2061  ;;  %6072 = vmatmul.mubr.msk.bf16.vlgmr.msra.gmra.mrb[80].mxu0 %vm797_vm5, %v7138_v22 }
 0x297   :  { %6084 = vmatpush3.bf16.msra.mxu0 %v2062_v24  ;;  %6087 = vmatprep.mubr.msk.bf16.mxu0 %vm6572_vm4, %v6571_v58  ;;  %v2015_v27 = vpop.permute.xlu0 %2014 }
 0x298   :  { %5998 = vmatpush3.bf16.msra.mxu1 %v7064_v9  ;;  %6085 = vmatprep.subr.bf16.mxu0 %v6571_v58 }
 0x299   :  { %6011 = vmatprep.subr.bf16.mxu1 %v6571_v58 }
 0x29a   :  { %v2064_v4 = vpop.permute.xlu1 %2063 }
 0x29b   :  { %6000 = vmatmul.mubr.msk.bf16.vlgmr.msra.gmra.mrb[64].mxu1 %vm797_vm5, %v7060_v7  ;;  %6086 = vmatpush3.bf16.msra.mxu0 %v2064_v4  ;;  %v2017_v34 = vpop.permute.xlu0 %2016 }
 0x29c   :  { %6012 = vmatpush3.bf16.msra.mxu1 %v7073_v11  ;;  %6099 = vmatprep.subr.bf16.mxu0 %v6571_v58 }
 0x29d   :  { %6013 = vmatprep.subr.bf16.mxu1 %v6571_v58  ;;  %6015 = vmatprep.mubr.msk.bf16.mxu1 %vm6572_vm4, %v6571_v58 }
 0x29e   :  { %v2156_v26 = vpop.permute.xlu1 %2155  ;;  %6088 = vmatmul.mubr.msk.bf16.vlgmr.msra.gmra.mrb[84].mxu0 %vm797_vm5, %v7138_v22 }
 0x29f   :  { %6100 = vmatpush3.bf16.msra.mxu0 %v2156_v26  ;;  %6103 = vmatprep.mubr.msk.bf16.mxu0 %vm6572_vm4, %v6571_v58  ;;  %v2109_v36 = vpop.permute.xlu0 %2108 }
 0x2a0   :  { %6014 = vmatpush3.bf16.msra.mxu1 %v7082_v12  ;;  %6101 = vmatprep.subr.bf16.mxu0 %v6571_v58 }
 0x2a1   :  { %6027 = vmatprep.subr.bf16.mxu1 %v6571_v58 }
 0x2a2   :  { %v2158_v28 = vpop.permute.xlu1 %2157 }
 0x2a3   :  { %6016 = vmatmul.mubr.msk.bf16.vlgmr.msra.gmra.mrb[68].mxu1 %vm797_vm5, %v7060_v7  ;;  %6102 = vmatpush3.bf16.msra.mxu0 %v2158_v28  ;;  %v7174_v29 = vpop.f32.mrb[48].mxu0  ;;  %v2111_v56 = vpop.permute.xlu0 %2110 }
 0x2a4   :  { %6028 = vmatpush3.bf16.msra.mxu1 %v7091_v13  ;;  %6115 = vmatprep.subr.bf16.mxu0 %v6571_v58  ;;  %v5945_v30 = vpop.f32.mrb[49].mxu0 }
 0x2a5   :  { %6029 = vmatprep.subr.bf16.mxu1 %v6571_v58  ;;  %6031 = vmatprep.mubr.msk.bf16.mxu1 %vm6572_vm4, %v6571_v58  ;;  %v7181_v31 = vpop.f32.mrb[50].mxu0 }
 0x2a6   :  { %v2250_v32 = vpop.permute.xlu1 %2249  ;;  %6104 = vmatmul.mubr.msk.bf16.vlgmr.msra.gmra.mrb[88].mxu0 %vm797_vm5, %v7138_v22  ;;  %v5946_v33 = vpop.f32.mrb[51].mxu0 }
 0x2a7   :  { %6116 = vmatpush3.bf16.msra.mxu0 %v2250_v32  ;;  %6119 = vmatprep.mubr.msk.bf16.mxu0 %vm6572_vm4, %v6571_v58  ;;  %v2203_v46 = vpop.permute.xlu0 %2202  ;;  %v2755_v33 = vld [vmem:[%s7835_s2 + $0x38] sm:$0xff] }
 0x2a8   :  { %6030 = vmatpush3.bf16.msra.mxu1 %v7100_v14  ;;  %6117 = vmatprep.subr.bf16.mxu0 %v6571_v58 }
 0x2a9   :  { %6043 = vmatprep.subr.bf16.mxu1 %v6571_v58 }
 0x2aa   :  { %v2252_v35 = vpop.permute.xlu1 %2251 }
 0x2ab   :  { %6032 = vmatmul.mubr.msk.bf16.vlgmr.msra.gmra.mrb[72].mxu1 %vm797_vm5, %v7060_v7  ;;  %6118 = vmatpush3.bf16.msra.mxu0 %v2252_v35  ;;  %v2205_v48 = vpop.permute.xlu0 %2204 }
 0x2ac   :  { %6044 = vmatpush3.bf16.msra.mxu1 %v7113_v15  ;;  %6131 = vmatprep.subr.bf16.mxu0 %v6571_v58 }
 0x2ad   :  { %6045 = vmatprep.subr.bf16.mxu1 %v6571_v58  ;;  %6047 = vmatprep.mubr.msk.bf16.mxu1 %vm6572_vm4, %v6571_v58 }
 0x2ae   :  { %v2366_v57 = vpop.permute.xlu1 %2365  ;;  %6120 = vmatmul.mubr.msk.bf16.vlgmr.msra.gmra.mrb[92].mxu0 %vm797_vm5, %v7138_v22 }
 0x2af   :  { %6132 = vmatpush3.bf16.msra.mxu0 %v2366_v57  ;;  %6135 = vmatprep.mubr.msk.bf16.mxu0 %vm6572_vm4, %v6571_v58  ;;  %v2316_v54 = vpop.permute.xlu0 %2315 }
 0x2b0   :  { %6046 = vmatpush3.bf16.msra.mxu1 %v7125_v18  ;;  %6133 = vmatprep.subr.bf16.mxu0 %v6571_v58 }
 0x2b1   :  { %6059 = vmatprep.subr.bf16.mxu1 %v6571_v58 }
 0x2b2   :  { %v2368_v39 = vpop.permute.xlu1 %2367 }
 0x2b3   :  { %6048 = vmatmul.mubr.msk.bf16.vlgmr.msra.gmra.mrb[76].mxu1 %vm797_vm5, %v7060_v7  ;;  %6134 = vmatpush3.bf16.msra.mxu0 %v2368_v39  ;;  %v7214_v41 = vpop.f32.mrb[52].mxu0  ;;  %v2318_v63 = vpop.permute.xlu0 %2317 }
 0x2b4   :  { %6060 = vmatpush3.bf16.msra.mxu1 %v7144_v23  ;;  %6147 = vmatprep.subr.bf16.mxu0 %v6571_v58  ;;  %v5961_v42 = vpop.f32.mrb[53].mxu0 }
 0x2b5   :  { %6061 = vmatprep.subr.bf16.mxu1 %v6571_v58  ;;  %6063 = vmatprep.mubr.msk.bf16.mxu1 %vm6572_vm4, %v6571_v58  ;;  %v7221_v43 = vpop.f32.mrb[54].mxu0 }
 0x2b6   :  { %v2460_v44 = vpop.permute.xlu1 %2459  ;;  %6136 = vmatmul.mubr.msk.bf16.vlgmr.msra.gmra.mrb[96].mxu0 %vm797_vm5, %v7210_v40  ;;  %v5962_v45 = vpop.f32.mrb[55].mxu0 }
 0x2b7   :  { %6148 = vmatpush3.bf16.msra.mxu0 %v2460_v44  ;;  %6151 = vmatprep.mubr.msk.bf16.mxu0 %vm6572_vm4, %v6571_v58  ;;  %v2413_v0 = vpop.permute.xlu0 %2412 }
 0x2b8   :  { %6062 = vmatpush3.bf16.msra.mxu1 %v7156_v25  ;;  %6149 = vmatprep.subr.bf16.mxu0 %v6571_v58 }
 0x2b9   :  { %6075 = vmatprep.subr.bf16.mxu1 %v6571_v58 }
 0x2ba   :  { %v2462_v47 = vpop.permute.xlu1 %2461 }
 0x2bb   :  { %6064 = vmatmul.mubr.msk.bf16.vlgmr.msra.gmra.mrb[80].mxu1 %vm797_vm5, %v7138_v22  ;;  %6150 = vmatpush3.bf16.msra.mxu0 %v2462_v47  ;;  %v2415_v9 = vpop.permute.xlu0 %2414 }
 0x2bc   :  { %6076 = vmatpush3.bf16.msra.mxu1 %v2015_v27  ;;  %6163 = vmatprep.subr.bf16.mxu0 %v6571_v58 }
 0x2bd   :  { %6077 = vmatprep.subr.bf16.mxu1 %v6571_v58  ;;  %6079 = vmatprep.mubr.msk.bf16.mxu1 %vm6572_vm4, %v6571_v58 }
 0x2be   :  { %v2554_v59 = vpop.permute.xlu1 %2553  ;;  %6152 = vmatmul.mubr.msk.bf16.vlgmr.msra.gmra.mrb[100].mxu0 %vm797_vm5, %v7210_v40 }
 0x2bf   :  { %6164 = vmatpush3.bf16.msra.mxu0 %v2554_v59  ;;  %6167 = vmatprep.mubr.msk.bf16.mxu0 %vm6572_vm4, %v6571_v58  ;;  %v2507_v10 = vpop.permute.xlu0 %2506 }
 0x2c0   :  { %6078 = vmatpush3.bf16.msra.mxu1 %v2017_v34  ;;  %6165 = vmatprep.subr.bf16.mxu0 %v6571_v58 }
 0x2c1   :  { %6091 = vmatprep.subr.bf16.mxu1 %v6571_v58 }
 0x2c2   :  { %v2556_v49 = vpop.permute.xlu1 %2555 }
 0x2c3   :  { %6080 = vmatmul.mubr.msk.bf16.vlgmr.msra.gmra.mrb[84].mxu1 %vm797_vm5, %v7138_v22  ;;  %6166 = vmatpush3.bf16.msra.mxu0 %v2556_v49  ;;  %v7244_v51 = vpop.f32.mrb[56].mxu0  ;;  %v2509_v11 = vpop.permute.xlu0 %2508 }
 0x2c4   :  { %6092 = vmatpush3.bf16.msra.mxu1 %v2109_v36  ;;  %6179 = vmatprep.subr.bf16.mxu0 %v6571_v58  ;;  %v5977_v53 = vpop.f32.mrb[57].mxu0  ;;  %v2756_v36 = vld [vmem:[%s7835_s2 + $0x40] sm:$0x7f] }
 0x2c5   :  { %6093 = vmatprep.subr.bf16.mxu1 %v6571_v58  ;;  %6095 = vmatprep.mubr.msk.bf16.mxu1 %vm6572_vm4, %v6571_v58  ;;  %v7250_v55 = vpop.f32.mrb[58].mxu0  ;;  %v2766_v57 = vpack.c.bf16 %v2756_v36, %v2756_v36 }
 0x2c6   :  { %v2648_v60 = vpop.permute.xlu1 %2647  ;;  %6168 = vmatmul.mubr.msk.bf16.vlgmr.msra.gmra.mrb[104].mxu0 %vm797_vm5, %v7210_v40  ;;  %v5978_v61 = vpop.f32.mrb[59].mxu0 }
 0x2c7   :  { %6180 = vmatpush3.bf16.msra.mxu0 %v2648_v60  ;;  %6183 = vmatprep.mubr.msk.bf16.mxu0 %vm6572_vm4, %v6571_v58  ;;  %v2601_v52 = vpop.permute.xlu0 %2600  ;;  %v2797_v39 = vand.u32 %v2795_v38, %v2766_v57 }
 0x2c8   :  { %6094 = vmatpush3.bf16.msra.mxu1 %v2111_v56  ;;  %6181 = vmatprep.subr.bf16.mxu0 %v6571_v58 }
 0x2c9   :  { %6107 = vmatprep.subr.bf16.mxu1 %v6571_v58 }
 0x2ca   :  { %v2650_v62 = vpop.permute.xlu1 %2649 }
 0x2cb   :  { %6096 = vmatmul.mubr.msk.bf16.vlgmr.msra.gmra.mrb[88].mxu1 %vm797_vm5, %v7138_v22  ;;  %6182 = vmatpush3.bf16.msra.mxu0 %v2650_v62  ;;  %v2603_v12 = vpop.permute.xlu0 %2602 }
 0x2cc   :  { %6108 = vmatpush3.bf16.msra.mxu1 %v2203_v46  ;;  %6111 = vmatprep.mubr.msk.bf16.mxu1 %vm6572_vm4, %v6571_v58 }
 0x2cd   :  { %6109 = vmatprep.subr.bf16.mxu1 %v6571_v58  ;;  %6207 = vmatprep.subr.bf16.mxu0 %v6571_v58 }
 0x2ce   :  { %6184 = vmatmul.mubr.msk.bf16.vlgmr.msra.gmra.mrb[108].mxu0 %vm797_vm5, %v7210_v40 }
 0x2cf   :  { %6209 = vmatprep.mubr.msk.bf16.mxu0 %vm6572_vm4, %v6571_v58 }
 0x2d0   :  { %6110 = vmatpush3.bf16.msra.mxu1 %v2205_v48 }
 0x2d1   :  { %6123 = vmatprep.subr.bf16.mxu1 %v6571_v58 }
 0x2d3   :  { %6112 = vmatmul.mubr.msk.bf16.vlgmr.msra.gmra.mrb[92].mxu1 %vm797_vm5, %v7138_v22  ;;  %v7271_v1 = vpop.f32.mrb[60].mxu0 }
 0x2d4   :  { %6124 = vmatpush3.bf16.msra.mxu1 %v2316_v54  ;;  %6127 = vmatprep.mubr.msk.bf16.mxu1 %vm6572_vm4, %v6571_v58  ;;  %v5993_v2 = vpop.f32.mrb[61].mxu0 }
 0x2d5   :  { %6125 = vmatprep.subr.bf16.mxu1 %v6571_v58  ;;  %v7276_v5 = vpop.f32.mrb[62].mxu0 }
 0x2d6   :  { %v5994_v7 = vpop.f32.mrb[63].mxu0 }
 0x2d8   :  { %6126 = vmatpush3.bf16.msra.mxu1 %v2318_v63 }
 0x2d9   :  { %6139 = vmatprep.subr.bf16.mxu1 %v6571_v58 }
 0x2db   :  { %6128 = vmatmul.mubr.msk.bf16.vlgmr.msra.gmra.mrb[96].mxu1 %vm797_vm5, %v7210_v40 }
 0x2dc   :  { %6140 = vmatpush3.bf16.msra.mxu1 %v2413_v0  ;;  %6143 = vmatprep.mubr.msk.bf16.mxu1 %vm6572_vm4, %v6571_v58 }
 0x2dd   :  { %6141 = vmatprep.subr.bf16.mxu1 %v6571_v58 }
 0x2e0   :  { %6142 = vmatpush3.bf16.msra.mxu1 %v2415_v9 }
 0x2e1   :  { %6155 = vmatprep.subr.bf16.mxu1 %v6571_v58 }
 0x2e3   :  { %6144 = vmatmul.mubr.msk.bf16.vlgmr.msra.gmra.mrb[100].mxu1 %vm797_vm5, %v7210_v40 }
 0x2e4   :  { %6156 = vmatpush3.bf16.msra.mxu1 %v2507_v10  ;;  %6159 = vmatprep.mubr.msk.bf16.mxu1 %vm6572_vm4, %v6571_v58 }
 0x2e5   :  { %6157 = vmatprep.subr.bf16.mxu1 %v6571_v58 }
 0x2e8   :  { %6158 = vmatpush3.bf16.msra.mxu1 %v2509_v11 }
 0x2e9   :  { %6171 = vmatprep.subr.bf16.mxu1 %v6571_v58 }
 0x2eb   :  { %6160 = vmatmul.mubr.msk.bf16.vlgmr.msra.gmra.mrb[104].mxu1 %vm797_vm5, %v7210_v40 }
 0x2ec   :  { %6172 = vmatpush3.bf16.msra.mxu1 %v2601_v52  ;;  %6175 = vmatprep.mubr.msk.bf16.mxu1 %vm6572_vm4, %v6571_v58 }
 0x2ed   :  { %6173 = vmatprep.subr.bf16.mxu1 %v6571_v58 }
 0x2f0   :  { %6174 = vmatpush3.bf16.msra.mxu1 %v2603_v12 }
 0x2f3   :  { %6176 = vmatmul.mubr.msk.bf16.vlgmr.msra.gmra.mrb[108].mxu1 %vm797_vm5, %v7210_v40 }
 0x30e   :  { %v835_v50 = vpop.f32.mrb[16].mxu1 }
 0x30f   :  { %v5873_v13 = vpop.f32.mrb[17].mxu1 }
 0x310   :  { %v7298_v8 = vpop.f32.mrb[18].mxu1 }
 0x311   :  { %v5874_v14 = vpop.f32.mrb[19].mxu1 }
 0x316   :  { %v884_v6 = vpop.f32.mrb[20].mxu1 }
 0x317   :  { %v1264_v15 = vadd.f32 %v7174_v29, %v884_v6  ;;  %v5881_v16 = vpop.f32.mrb[21].mxu1 }
 0x318   :  { %v887_v17 = vpop.f32.mrb[22].mxu1 }
 0x319   :  { %v1267_v18 = vadd.f32 %v7181_v31, %v887_v17  ;;  %v5882_v19 = vpop.f32.mrb[23].mxu1  ;;  %v2754_v31 = vld [vmem:[%s7835_s2 + $0x30] sm:$0xff] }
 0x31a   :  { %v2765_v35 = vpack.c.bf16 %v2755_v33, %v2754_v31 }
 0x31c   :  { %6187 = vmatprep.subr.bf16.mxu1 %v2765_v35 }
 0x31d   :  { %6188 = vmatpush3.bf16.msra.mxu1 %v2765_v35 }
 0x31e   :  { %v7302_v20 = vpop.f32.mrb[24].mxu1  ;;  %6189 = vmatprep.subr.bf16.mxu1 %v2797_v39 }
 0x31f   :  { %v5889_v21 = vpop.f32.mrb[25].mxu1 }
 0x320   :  { %v7304_v22 = vpop.f32.mrb[26].mxu1 }
 0x321   :  { %v5890_v23 = vpop.f32.mrb[27].mxu1  ;;  %6190 = vmatpush3.bf16.msra.mxu1 %v2797_v39 }
 0x322   :  { %6231 = vmatprep.subr.bf16.mxu1 %v6571_v58 }
 0x326   :  { %v982_v24 = vpop.f32.mrb[28].mxu1 }
 0x327   :  { %v1346_v4 = vadd.f32 %v7214_v41, %v982_v24  ;;  %v5897_v25 = vpop.f32.mrb[29].mxu1 }
 0x328   :  { %v985_v26 = vpop.f32.mrb[30].mxu1 }
 0x329   :  { %v1349_v27 = vadd.f32 %v7221_v43, %v985_v26  ;;  %v5898_v28 = vpop.f32.mrb[31].mxu1 }
 0x32e   :  { %v7308_v29 = vpop.f32.mrb[32].mxu1 }
 0x32f   :  { %v5905_v30 = vpop.f32.mrb[33].mxu1 }
 0x330   :  { %v7310_v32 = vpop.f32.mrb[34].mxu1 }
 0x331   :  { %v5906_v34 = vpop.f32.mrb[35].mxu1 }
 0x336   :  { %v1080_v40 = vpop.f32.mrb[36].mxu1 }
 0x337   :  { %v1428_v56 = vadd.f32 %v7244_v51, %v1080_v40  ;;  %v5913_v41 = vpop.f32.mrb[37].mxu1 }
 0x338   :  { %v1083_v42 = vpop.f32.mrb[38].mxu1 }
 0x339   :  { %v1431_v43 = vadd.f32 %v7250_v55, %v1083_v42  ;;  %v5914_v44 = vpop.f32.mrb[39].mxu1 }
 0x33e   :  { %v1129_v45 = vpop.f32.mrb[40].mxu1 }
 0x33f   :  { %v5921_v46 = vpop.f32.mrb[41].mxu1 }
 0x340   :  { %v1132_v47 = vpop.f32.mrb[42].mxu1 }
 0x341   :  { %v5922_v59 = vpop.f32.mrb[43].mxu1 }
 0x346   :  { %v1178_v48 = vpop.f32.mrb[44].mxu1 }
 0x347   :  { %v1510_v49 = vadd.f32 %v7271_v1, %v1178_v48  ;;  %v5929_v53 = vpop.f32.mrb[45].mxu1 }
 0x348   :  { %v1181_v54 = vpop.f32.mrb[46].mxu1 }
 0x349   :  { %v1513_v51 = vadd.f32 %v7276_v5, %v1181_v54  ;;  %v5930_v60 = vpop.f32.mrb[47].mxu1  ;;  %v1609_v61 = vpop.f32.mrb[64].mxu0 }
 0x34a   :  { %v1900_v62 = vadd.f32 %v1609_v61, %v1264_v15  ;;  %v6009_v63 = vpop.f32.mrb[65].mxu0 }
 0x34b   :  { %v1612_v0 = vpop.f32.mrb[66].mxu0 }
 0x34c   :  { %v1901_v55 = vadd.f32 %v1612_v0, %v1267_v18  ;;  %v6010_v2 = vpop.f32.mrb[67].mxu0 }
 0x34e   :  { %v1222_v7 = vpop.f32.mrb[48].mxu1 }
 0x34f   :  { %v1223_v9 = vadd.f32 %v1222_v7, %v835_v50  ;;  %v5937_v10 = vpop.f32.mrb[49].mxu1 }
 0x350   :  { %v1225_v11 = vpop.f32.mrb[50].mxu1 }
 0x351   :  { %v1226_v52 = vadd.f32 %v1225_v11, %v7298_v8  ;;  %v5938_v12 = vpop.f32.mrb[51].mxu1  ;;  %v1703_v13 = vpop.f32.mrb[68].mxu0 }
 0x352   :  { %v1904_v1 = vadd.f32 %v1703_v13, %v1346_v4  ;;  %v6025_v14 = vpop.f32.mrb[69].mxu0 }
 0x353   :  { %v1706_v6 = vpop.f32.mrb[70].mxu0 }
 0x354   :  { %v1905_v16 = vadd.f32 %v1706_v6, %v1349_v27  ;;  %v6026_v5 = vpop.f32.mrb[71].mxu0 }
 0x356   :  { %v1304_v17 = vpop.f32.mrb[52].mxu1 }
 0x357   :  { %v1305_v15 = vadd.f32 %v1304_v17, %v7302_v20  ;;  %v5953_v19 = vpop.f32.mrb[53].mxu1 }
 0x358   :  { %v1307_v21 = vpop.f32.mrb[54].mxu1 }
 0x359   :  { %v1308_v18 = vadd.f32 %v1307_v21, %v7304_v22  ;;  %v5954_v23 = vpop.f32.mrb[55].mxu1  ;;  %v1797_v50 = vpop.f32.mrb[72].mxu0 }
 0x35a   :  { %v1908_v24 = vadd.f32 %v1797_v50, %v1428_v56  ;;  %v6041_v25 = vpop.f32.mrb[73].mxu0 }
 0x35b   :  { %v1800_v26 = vpop.f32.mrb[74].mxu0 }
 0x35c   :  { %v1909_v8 = vadd.f32 %v1800_v26, %v1431_v43  ;;  %v6042_v28 = vpop.f32.mrb[75].mxu0 }
 0x35e   :  { %v1386_v30 = vpop.f32.mrb[56].mxu1 }
 0x35f   :  { %v1387_v4 = vadd.f32 %v1386_v30, %v7308_v29  ;;  %v5969_v31 = vpop.f32.mrb[57].mxu1 }
 0x360   :  { %v1389_v27 = vpop.f32.mrb[58].mxu1 }
 0x361   :  { %v1390_v33 = vadd.f32 %v1389_v27, %v7310_v32  ;;  %v5970_v34 = vpop.f32.mrb[59].mxu1  ;;  %v1891_v20 = vpop.f32.mrb[76].mxu0 }
 0x362   :  { %v1912_v35 = vadd.f32 %v1891_v20, %v1510_v49  ;;  %v6057_v36 = vpop.f32.mrb[77].mxu0 }
 0x363   :  { %v1894_v57 = vpop.f32.mrb[78].mxu0  ;;  %v7342_v36 = vpop.permute.xlu0 %2714 }
 0x364   :  { %v1913_v22 = vadd.f32 %v1894_v57, %v1513_v51  ;;  %v6058_v37 = vpop.f32.mrb[79].mxu0 }
 0x366   :  { %v1468_v38 = vpop.f32.mrb[60].mxu1 }
 0x367   :  { %v1469_v39 = vadd.f32 %v1468_v38, %v1129_v45  ;;  %v5985_v40 = vpop.f32.mrb[61].mxu1  ;;  %v7345_v38 = vpop.permute.xlu1 %2719 }
 0x368   :  { %v1471_v56 = vpop.f32.mrb[62].mxu1 }
 0x369   :  { %v1472_v41 = vadd.f32 %v1471_v56, %v1132_v47  ;;  %v5986_v42 = vpop.f32.mrb[63].mxu1  ;;  %v2007_v43 = vpop.f32.mrb[80].mxu0 }
 0x36a   :  { %v2298_v44 = vadd.f32 %v2007_v43, %v1900_v62  ;;  %v6073_v29 = vpop.f32.mrb[81].mxu0 }
 0x36b   :  { %v2010_v46 = vpop.f32.mrb[82].mxu0 }
 0x36c   :  { %v2299_v59 = vadd.f32 %v2010_v46, %v1901_v55  ;;  %v6074_v48 = vpop.f32.mrb[83].mxu0 }
 0x36e   :  { %v1562_v32 = vpop.f32.mrb[64].mxu1 }
 0x36f   :  { %v1898_v53 = vadd.f32 %v1562_v32, %v1223_v9  ;;  %v6001_v54 = vpop.f32.mrb[65].mxu1 }
 0x370   :  { %v1565_v49 = vpop.f32.mrb[66].mxu1 }
 0x371   :  { %v1899_v60 = vadd.f32 %v1565_v49, %v1226_v52  ;;  %v6002_v61 = vpop.f32.mrb[67].mxu1  ;;  %v2101_v51 = vpop.f32.mrb[84].mxu0 }
 0x372   :  { %v2302_v63 = vadd.f32 %v2101_v51, %v1904_v1  ;;  %v6089_v0 = vpop.f32.mrb[85].mxu0 }
 0x373   :  { %v2104_v45 = vpop.f32.mrb[86].mxu0 }
 0x374   :  { %v2303_v2 = vadd.f32 %v2104_v45, %v1905_v16  ;;  %v6090_v7 = vpop.f32.mrb[87].mxu0 }
 0x376   :  { %v1656_v47 = vpop.f32.mrb[68].mxu1 }
 0x377   :  { %v1902_v10 = vadd.f32 %v1656_v47, %v1305_v15  ;;  %v6017_v11 = vpop.f32.mrb[69].mxu1 }
 0x378   :  { %v1659_v62 = vpop.f32.mrb[70].mxu1 }
 0x379   :  { %v1903_v12 = vadd.f32 %v1659_v62, %v1308_v18  ;;  %v6018_v13 = vpop.f32.mrb[71].mxu1  ;;  %v2195_v55 = vpop.f32.mrb[88].mxu0 }
 0x37a   :  { %v2306_v14 = vadd.f32 %v2195_v55, %v1908_v24  ;;  %v6105_v6 = vpop.f32.mrb[89].mxu0 }
 0x37b   :  { %v2198_v9 = vpop.f32.mrb[90].mxu0 }
 0x37c   :  { %v2307_v5 = vadd.f32 %v2198_v9, %v1909_v8  ;;  %v6106_v17 = vpop.f32.mrb[91].mxu0 }
 0x37e   :  { %v1750_v52 = vpop.f32.mrb[72].mxu1 }
 0x37f   :  { %v1906_v19 = vadd.f32 %v1750_v52, %v1387_v4  ;;  %v6033_v21 = vpop.f32.mrb[73].mxu1 }
 0x380   :  { %v1753_v1 = vpop.f32.mrb[74].mxu1 }
 0x381   :  { %v7332_v23 = vadd.f32 %v1753_v1, %v1390_v33  ;;  %v6034_v16 = vpop.f32.mrb[75].mxu1  ;;  %v2289_v50 = vpop.f32.mrb[92].mxu0 }
 0x382   :  { %v7334_v25 = vadd.f32 %v2289_v50, %v1912_v35  ;;  %v6121_v15 = vpop.f32.mrb[93].mxu0 }
 0x383   :  { %v2292_v26 = vpop.f32.mrb[94].mxu0 }
 0x384   :  { %v7336_v18 = vadd.f32 %v2292_v26, %v1913_v22  ;;  %v6122_v28 = vpop.f32.mrb[95].mxu0 }
 0x386   :  { %v1844_v24 = vpop.f32.mrb[76].mxu1 }
 0x387   :  { %v7338_v30 = vadd.f32 %v1844_v24, %v1469_v39  ;;  %v6049_v8 = vpop.f32.mrb[77].mxu1 }
 0x388   :  { %v1847_v31 = vpop.f32.mrb[78].mxu1 }
 0x389   :  { %v7340_v27 = vadd.f32 %v1847_v31, %v1472_v41  ;;  %v6050_v4 = vpop.f32.mrb[79].mxu1  ;;  %v2405_v34 = vpop.f32.mrb[96].mxu0 }
 0x38a   :  { %v2696_v33 = vadd.f32 %v2405_v34, %v2298_v44  ;;  %v6137_v20 = vpop.f32.mrb[97].mxu0 }
 0x38b   :  { %v2408_v35 = vpop.f32.mrb[98].mxu0 }
 0x38c   :  { %v2724_v57 = vadd.f32 %v7342_v36, %v2696_v33  ;;  %v2697_v37 = vadd.f32 %v2408_v35, %v2299_v59  ;;  %v6138_v22 = vpop.f32.mrb[99].mxu0 }
 0x38e   :  { %v2725_v39 = vadd.f32 %v7345_v38, %v2697_v37  ;;  %v1960_v40 = vpop.f32.mrb[80].mxu1  ;;  %v2740_v41 = vmax.f32 %v2724_v57, 0.0 }
 0x38f   :  { %v2296_v56 = vadd.f32 %v1960_v40, %v1898_v53  ;;  %v6065_v42 = vpop.f32.mrb[81].mxu1 }
 0x390   :  { %v2741_v43 = vmax.f32 %v2725_v39, 0.0  ;;  %v1963_v29 = vpop.f32.mrb[82].mxu1 }
 0x391   :  { %v2297_v46 = vadd.f32 %v1963_v29, %v1899_v60  ;;  %v6066_v44 = vpop.f32.mrb[83].mxu1  ;;  %v2499_v48 = vpop.f32.mrb[100].mxu0 }
 0x392   :  { %v7348_v32 = vpack.c.bf16 %v2741_v43, %v2740_v41  ;;  %v2700_v54 = vadd.f32 %v2499_v48, %v2302_v63  ;;  %v6153_v49 = vpop.f32.mrb[101].mxu0 }
 0x393   :  { %v2502_v61 = vpop.f32.mrb[102].mxu0 }
 0x394   :  { %v2728_v59 = vadd.f32 %v7342_v36, %v2700_v54  ;;  %v2701_v51 = vadd.f32 %v2502_v61, %v2303_v2  ;;  %v6154_v0 = vpop.f32.mrb[103].mxu0 }
 0x396   :  { %v2729_v45 = vadd.f32 %v7345_v38, %v2701_v51  ;;  %v2054_v7 = vpop.f32.mrb[84].mxu1  ;;  %v2744_v11 = vmax.f32 %v2728_v59, 0.0 }
 0x397   :  { %v2300_v53 = vadd.f32 %v2054_v7, %v1902_v10  ;;  %v6081_v47 = vpop.f32.mrb[85].mxu1 }
 0x398   :  { %v2745_v62 = vmax.f32 %v2729_v45, 0.0  ;;  %v2057_v13 = vpop.f32.mrb[86].mxu1 }
 0x399   :  { %v2301_v60 = vadd.f32 %v2057_v13, %v1903_v12  ;;  %v6082_v55 = vpop.f32.mrb[87].mxu1  ;;  %v2593_v6 = vpop.f32.mrb[104].mxu0 }
 0x39a   :  { %v7352_v9 = vpack.c.bf16 %v2745_v62, %v2744_v11  ;;  %v2704_v63 = vadd.f32 %v2593_v6, %v2306_v14  ;;  %v6169_v17 = vpop.f32.mrb[105].mxu0 }
 0x39b   :  { %v2596_v52 = vpop.f32.mrb[106].mxu0 }
 0x39c   :  { %v2732_v21 = vadd.f32 %v7342_v36, %v2704_v63  ;;  %v2705_v2 = vadd.f32 %v2596_v52, %v2307_v5  ;;  %v6170_v1 = vpop.f32.mrb[107].mxu0 }
 0x39e   :  { %v2733_v16 = vadd.f32 %v7345_v38, %v2705_v2  ;;  %v2148_v50 = vpop.f32.mrb[88].mxu1  ;;  %v2748_v26 = vmax.f32 %v2732_v21, 0.0 }
 0x39f   :  { %v2304_v10 = vadd.f32 %v2148_v50, %v1906_v19  ;;  %v6097_v15 = vpop.f32.mrb[89].mxu1 }
 0x3a0   :  { %v2749_v28 = vmax.f32 %v2733_v16, 0.0  ;;  %v2151_v24 = vpop.f32.mrb[90].mxu1 }
 0x3a1   :  { %v2305_v12 = vadd.f32 %v2151_v24, %v7332_v23  ;;  %v6098_v8 = vpop.f32.mrb[91].mxu1  ;;  %v2687_v31 = vpop.f32.mrb[108].mxu0 }
 0x3a2   :  { %v7357_v4 = vpack.c.bf16 %v2749_v28, %v2748_v26  ;;  %v2708_v14 = vadd.f32 %v2687_v31, %v7334_v25  ;;  %v6185_v34 = vpop.f32.mrb[109].mxu0 }
 0x3a3   :  { %v2690_v33 = vpop.f32.mrb[110].mxu0 }
 0x3a4   :  { %v2736_v5 = vadd.f32 %v7342_v36, %v2708_v14  ;;  %v2709_v20 = vadd.f32 %v2690_v33, %v7336_v18  ;;  %v6186_v35 = vpop.f32.mrb[111].mxu0 }
 0x3a6   :  { %v2737_v19 = vadd.f32 %v7345_v38, %v2709_v20  ;;  %v2242_v57 = vpop.f32.mrb[92].mxu1  ;;  %v2752_v23 = vmax.f32 %v2736_v5, 0.0 }
 0x3a7   :  { %v2308_v37 = vadd.f32 %v2242_v57, %v7338_v30  ;;  %v6113_v22 = vpop.f32.mrb[93].mxu1 }
 0x3a8   :  { %v2753_v39 = vmax.f32 %v2737_v19, 0.0  ;;  %v2245_v40 = vpop.f32.mrb[94].mxu1 }
 0x3a9   :  { %v2309_v42 = vadd.f32 %v2245_v40, %v7340_v27  ;;  %v6114_v41 = vpop.f32.mrb[95].mxu1 }
 0x3aa   :  { %v2764_v25 = vpack.c.bf16 %v2753_v39, %v2752_v23 }
 0x3ae   :  { %v2358_v43 = vpop.f32.mrb[96].mxu1 }
 0x3af   :  { %v2694_v29 = vadd.f32 %v2358_v43, %v2296_v56  ;;  %v6129_v44 = vpop.f32.mrb[97].mxu1 }
 0x3b0   :  { %v2361_v48 = vpop.f32.mrb[98].mxu1 }
 0x3b1   :  { %v2722_v18 = vadd.f32 %v7342_v36, %v2694_v29  ;;  %v2695_v54 = vadd.f32 %v2361_v48, %v2297_v46  ;;  %v6130_v49 = vpop.f32.mrb[99].mxu1 }
 0x3b2   :  { %v4658_v49 = vld [vmem:[%s7835_s2 + $0x140] sm:$0xff] }
 0x3b3   :  { %v2723_v61 = vadd.f32 %v7345_v38, %v2695_v54  ;;  %v2738_v59 = vmax.f32 %v2722_v18, 0.0 }
 0x3b5   :  { %v2739_v30 = vmax.f32 %v2723_v61, 0.0  ;;  %v2906_v61 = vld [vmem:[%s7835_s2 + $0x120] sm:$0xff] }
 0x3b6   :  { %v2452_v51 = vpop.f32.mrb[100].mxu1 }
 0x3b7   :  { %v2757_v0 = vpack.c.bf16 %v2739_v30, %v2738_v59  ;;  %v2698_v45 = vadd.f32 %v2452_v51, %v2300_v53  ;;  %v6145_v7 = vpop.f32.mrb[101].mxu1  ;;  %v2907_v30 = vpack.c.bf16 %v2906_v61, %v2906_v61  ;;  %v4680_v61 = vld [vmem:[%s7835_s2 + $0x48] sm:$0xff] }
 0x3b8   :  { %v2455_v27 = vpop.f32.mrb[102].mxu1 }
 0x3b9   :  { %v2726_v47 = vadd.f32 %v7342_v36, %v2698_v45  ;;  %v2699_v11 = vadd.f32 %v2455_v27, %v2301_v60  ;;  %v6146_v56 = vpop.f32.mrb[103].mxu1  ;;  %6191 = vmatprep.mubr.msk.bf16.mxu1 %vm2767_vm8, %v2757_v0 }
 0x3ba   :  { %6192 = vmatmul.mubr.msk.bf16.vlgmr.msra.gmra.mrb[112].mxu1 %vm2767_vm8, %v7348_v32 }
 0x3bb   :  { %v2727_v46 = vadd.f32 %v7345_v38, %v2699_v11  ;;  %v2742_v62 = vmax.f32 %v2726_v47, 0.0  ;;  %v2896_v11 = vld [vmem:[%s7835_s2 + $0x118] sm:$0xff] }
 0x3bc   :  { %v2897_v56 = vpack.c.bf16 %v2896_v11, %v2896_v11 }
 0x3bd   :  { %v2743_v13 = vmax.f32 %v2727_v46, 0.0 }
 0x3be   :  { %v2546_v55 = vpop.f32.mrb[104].mxu1 }
 0x3bf   :  { %v2759_v6 = vpack.c.bf16 %v2743_v13, %v2742_v62  ;;  %v2702_v63 = vadd.f32 %v2546_v55, %v2304_v10  ;;  %v6161_v17 = vpop.f32.mrb[105].mxu1  ;;  %v3587_v13 = vld [vmem:[%s7835_s2 + $0x128] sm:$0xff] }
 0x3c0   :  { %v2549_v53 = vpop.f32.mrb[106].mxu1  ;;  %v3588_v55 = vpack.c.bf16 %v3587_v13, %v3587_v13 }
 0x3c1   :  { %v2730_v52 = vadd.f32 %v7342_v36, %v2702_v63  ;;  %v2703_v21 = vadd.f32 %v2549_v53, %v2305_v12  ;;  %v6162_v2 = vpop.f32.mrb[107].mxu1  ;;  %6195 = vmatprep.mubr.msk.bf16.mxu1 %vm2767_vm8, %v2759_v6 }
 0x3c2   :  { %6196 = vmatmul.mubr.msk.bf16.gmra.mrb[116].mxu1 %vm2767_vm8, %v7352_v9 }
 0x3c3   :  { %v2731_v32 = vadd.f32 %v7345_v38, %v2703_v21  ;;  %v2746_v60 = vmax.f32 %v2730_v52, 0.0 }
 0x3c5   :  { %v2747_v1 = vmax.f32 %v2731_v32, 0.0  ;;  %v3944_v32 = vld [vmem:[%s7835_s2 + $0x130] sm:$0xff] }
 0x3c6   :  { %v2640_v16 = vpop.f32.mrb[108].mxu1 }
 0x3c7   :  { %v2761_v50 = vpack.c.bf16 %v2747_v1, %v2746_v60  ;;  %v2706_v15 = vadd.f32 %v2640_v16, %v2308_v37  ;;  %v6177_v26 = vpop.f32.mrb[109].mxu1  ;;  %v3945_v60 = vpack.c.bf16 %v3944_v32, %v3944_v32 }
 0x3c8   :  { %v2643_v10 = vpop.f32.mrb[110].mxu1 }
 0x3c9   :  { %v2734_v28 = vadd.f32 %v7342_v36, %v2706_v15  ;;  %v2707_v24 = vadd.f32 %v2643_v10, %v2309_v42  ;;  %6199 = vmatprep.mubr.msk.bf16.mxu1 %vm2767_vm8, %v2761_v50  ;;  %v6178_v12 = vpop.f32.mrb[111].mxu1 }
 0x3ca   :  { %6200 = vmatmul.mubr.msk.bf16.gmra.mrb[120].mxu1 %vm2767_vm8, %v7357_v4  ;;  %v4301_v12 = vld [vmem:[%s7835_s2 + $0x138] sm:$0xff] }
 0x3cb   :  { %v2735_v9 = vadd.f32 %v7345_v38, %v2707_v24  ;;  %v2750_v8 = vmax.f32 %v2734_v28, 0.0 }
 0x3cd   :  { %v2751_v31 = vmax.f32 %v2735_v9, 0.0  ;;  %v4302_v9 = vpack.c.bf16 %v4301_v12, %v4301_v12 }
 0x3cf   :  { %v2763_v14 = vpack.c.bf16 %v2751_v31, %v2750_v8 }
 0x3d1   :  { %6203 = vmatprep.mubr.msk.bf16.mxu1 %vm2767_vm8, %v2763_v14 }
 0x3d2   :  { %6204 = vmatmul.mubr.msk.bf16.gmra.mrb[124].mxu1 %vm2767_vm8, %v2764_v25  ;;  %vm5082_vm8 = vcmask 376048  }
 0x3d3   :  { %6233 = vmatprep.mubr.msk.bf16.mxu1 %vm6572_vm4, %v6571_v58 }
 0x48d   :  { %v6193_v36 = vpop.f32.mrb[112].mxu1 }
 0x48e   :  { %v2833_v34 = vpop.f32.mrb[113].mxu1 }
 0x48f   :  { %v6194_v33 = vpop.f32.mrb[114].mxu1 }
 0x490   :  { %v7386_v5 = vpack.c.bf16 %v6194_v33, %v6193_v36  ;;  %v2836_v20 = vpop.f32.mrb[115].mxu1 }
 0x491   :  { %v7388_v35 = vpack.c.bf16 %v2836_v20, %v2833_v34 }
 0x492   :  { %2957 = vrot.lane.b32.xlu1 %v7386_v5, %s6573_s17 }
 0x493   :  { %2909 = vrot.lane.b32.xlu0 %v7388_v35, %s6573_s17 }
 0x495   :  { %v6197_v38 = vpop.f32.mrb[116].mxu1 }
 0x496   :  { %v2849_v4 = vpop.f32.mrb[117].mxu1 }
 0x497   :  { %v6198_v19 = vpop.f32.mrb[118].mxu1 }
 0x498   :  { %v7394_v57 = vpack.c.bf16 %v6198_v19, %v6197_v38  ;;  %v2852_v37 = vpop.f32.mrb[119].mxu1 }
 0x499   :  { %v7396_v22 = vpack.c.bf16 %v2852_v37, %v2849_v4 }
 0x49a   :  { %3045 = vrot.lane.b32.xlu1 %v7394_v57, %s6573_s17 }
 0x49b   :  { %3001 = vrot.lane.b32.xlu0 %v7396_v22, %s6573_s17 }
 0x49d   :  { %v6201_v23 = vpop.f32.mrb[120].mxu1 }
 0x49e   :  { %v2865_v39 = vpop.f32.mrb[121].mxu1 }
 0x49f   :  { %v6202_v40 = vpop.f32.mrb[122].mxu1 }
 0x4a0   :  { %v7402_v42 = vpack.c.bf16 %v6202_v40, %v6201_v23  ;;  %v2868_v41 = vpop.f32.mrb[123].mxu1 }
 0x4a1   :  { %v7404_v25 = vpack.c.bf16 %v2868_v41, %v2865_v39 }
 0x4a2   :  { %3133 = vrot.lane.b32.xlu1 %v7402_v42, %s6573_s17 }
 0x4a3   :  { %3089 = vrot.lane.b32.xlu0 %v7404_v25, %s6573_s17 }
 0x4a5   :  { %v6205_v43 = vpop.f32.mrb[124].mxu1 }
 0x4a6   :  { %v2881_v29 = vpop.f32.mrb[125].mxu1 }
 0x4a7   :  { %v6206_v44 = vpop.f32.mrb[126].mxu1 }
 0x4a8   :  { %v7410_v48 = vpack.c.bf16 %v6206_v44, %v6205_v43  ;;  %v2884_v18 = vpop.f32.mrb[127].mxu1 }
 0x4a9   :  { %v7412_v54 = vpack.c.bf16 %v2884_v18, %v2881_v29 }
 0x4aa   :  { %3221 = vrot.lane.b32.xlu1 %v7410_v48, %s6573_s17 }
 0x4ab   :  { %3177 = vrot.lane.b32.xlu0 %v7412_v54, %s6573_s17 }
 0x4ae   :  { %3635 = vrot.lane.b32.xlu1 %v7386_v5, %s6574_s22 }
 0x4af   :  { %3589 = vrot.lane.b32.xlu0 %v7388_v35, %s6574_s22 }
 0x4b2   :  { %3721 = vrot.lane.b32.xlu1 %v7394_v57, %s6574_s22 }
 0x4b3   :  { %3678 = vrot.lane.b32.xlu0 %v7396_v22, %s6574_s22 }
 0x4b6   :  { %3807 = vrot.lane.b32.xlu1 %v7402_v42, %s6574_s22 }
 0x4b7   :  { %3764 = vrot.lane.b32.xlu0 %v7404_v25, %s6574_s22 }
 0x4ba   :  { %3893 = vrot.lane.b32.xlu1 %v7410_v48, %s6574_s22 }
 0x4bb   :  { %3850 = vrot.lane.b32.xlu0 %v7412_v54, %s6574_s22 }
 0x4be   :  { %3992 = vrot.lane.b32.xlu1 %v7386_v5, %s6575_s23 }
 0x4bf   :  { %3946 = vrot.lane.b32.xlu0 %v7388_v35, %s6575_s23 }
 0x4c2   :  { %4078 = vrot.lane.b32.xlu1 %v7394_v57, %s6575_s23 }
 0x4c3   :  { %4035 = vrot.lane.b32.xlu0 %v7396_v22, %s6575_s23 }
 0x4c6   :  { %4164 = vrot.lane.b32.xlu1 %v7402_v42, %s6575_s23 }
 0x4c7   :  { %4121 = vrot.lane.b32.xlu0 %v7404_v25, %s6575_s23 }
 0x4ca   :  { %4250 = vrot.lane.b32.xlu1 %v7410_v48, %s6575_s23 }
 0x4cb   :  { %4207 = vrot.lane.b32.xlu0 %v7412_v54, %s6575_s23 }
 0x4ce   :  { %4349 = vrot.lane.b32.xlu1 %v7386_v5, %s6576_s28 }
 0x4cf   :  { %4303 = vrot.lane.b32.xlu0 %v7388_v35, %s6576_s28 }
 0x4d2   :  { %4435 = vrot.lane.b32.xlu1 %v7394_v57, %s6576_s28 }
 0x4d3   :  { %4392 = vrot.lane.b32.xlu0 %v7396_v22, %s6576_s28 }
 0x4d6   :  { %4521 = vrot.lane.b32.xlu1 %v7402_v42, %s6576_s28 }
 0x4d7   :  { %4478 = vrot.lane.b32.xlu0 %v7404_v25, %s6576_s28 }
 0x4da   :  { %4607 = vrot.lane.b32.xlu1 %v7410_v48, %s6576_s28 }
 0x4db   :  { %4564 = vrot.lane.b32.xlu0 %v7412_v54, %s6576_s28 }
 0x4df   :  { %4661 = vperm.xlu0 %6543, %v4658_v49  }
 0x504   :  { %v2958_v51 = vpop.permute.xlu1 %2957 }
 0x505   :  { %v2910_v59 = vpop.permute.xlu0 %2909 }
 0x506   :  { %6208 = vmatpush3.bf16.msra.mxu0 %v2910_v59  ;;  %v4681_v59 = vld [vmem:[%s7835_s2 + $0x50] sm:$0x7] }
 0x507   :  { %6213 = vmatprep.subr.bf16.mxu0 %v6571_v58 }
 0x509   :  { %6210 = vmatmul.mubr.msk.bf16.vlgmr.msra.gmra.mrb[112].mxu0 %vm2912_vm9, %v2907_v30 }
 0x50a   :  { %6214 = vmatpush3.bf16.msra.mxu0 %v2958_v51  ;;  %6215 = vmatprep.mubr.msk.bf16.mxu0 %vm6572_vm4, %v6571_v58 }
 0x50b   :  { %6219 = vmatprep.subr.bf16.mxu0 %v6571_v58 }
 0x50c   :  { %v3046_v7 = vpop.permute.xlu1 %3045 }
 0x50d   :  { %v3002_v0 = vpop.permute.xlu0 %3001 }
 0x511   :  { %6216 = vmatmul.mubr.msk.bf16.vlgmr.msra.gmra.mrb[116].mxu0 %vm2912_vm9, %v2907_v30 }
 0x512   :  { %6220 = vmatpush3.bf16.msra.mxu0 %v3002_v0  ;;  %6221 = vmatprep.mubr.msk.bf16.mxu0 %vm6572_vm4, %v6571_v58  ;;  %v4686_v0 = vpack.c.bf16 %v4681_v59, %v4680_v61 }
 0x513   :  { %6225 = vmatprep.subr.bf16.mxu0 %v6571_v58 }
 0x514   :  { %v3134_v47 = vpop.permute.xlu1 %3133 }
 0x515   :  { %v3090_v45 = vpop.permute.xlu0 %3089 }
 0x516   :  { %6232 = vmatpush3.bf16.msra.mxu1 %v3090_v45 }
 0x517   :  { %6243 = vmatprep.subr.bf16.mxu1 %v6571_v58 }
 0x519   :  { %6222 = vmatmul.mubr.msk.bf16.vlgmr.msra.gmra.mrb[120].mxu0 %vm2912_vm9, %v2907_v30  ;;  %6234 = vmatmul.mubr.msk.bf16.vlgmr.msra.gmra.mrb[128].mxu1 %vm2912_vm9, %v2907_v30 }
 0x51a   :  { %6226 = vmatpush3.bf16.msra.mxu0 %v3046_v7  ;;  %6227 = vmatprep.mubr.msk.bf16.mxu0 %vm6572_vm4, %v6571_v58 }
 0x51b   :  { %6237 = vmatprep.subr.bf16.mxu0 %v6571_v58  ;;  %6245 = vmatprep.mubr.msk.bf16.mxu1 %vm6572_vm4, %v6571_v58 }
 0x51c   :  { %v3222_v46 = vpop.permute.xlu1 %3221 }
 0x51d   :  { %v3178_v27 = vpop.permute.xlu0 %3177 }
 0x51e   :  { %6244 = vmatpush3.bf16.msra.mxu1 %v3178_v27  ;;  %v4702_v27 = vsel %vm4700_vm10, 4294967295, %v6569_v3 }
 0x51f   :  { %6255 = vmatprep.subr.bf16.mxu1 %v6571_v58 }
 0x520   :  { %v3636_v63 = vpop.permute.xlu1 %3635 }
 0x521   :  { %6228 = vmatmul.mubr.msk.bf16.vlgmr.msra.gmra.mrb[124].mxu0 %vm2912_vm9, %v2907_v30  ;;  %6246 = vmatmul.mubr.msk.bf16.vlgmr.msra.gmra.mrb[132].mxu1 %vm2912_vm9, %v2907_v30  ;;  %v3590_v62 = vpop.permute.xlu0 %3589 }
 0x522   :  { %6238 = vmatpush3.bf16.msra.mxu0 %v3134_v47  ;;  %6256 = vmatpush3.bf16.msra.mxu1 %v7388_v35  ;;  %v4703_v47 = vsel %vm4701_vm11, %v4702_v27, 0 }
 0x523   :  { %6239 = vmatprep.mubr.msk.bf16.mxu0 %vm6572_vm4, %v6571_v58  ;;  %6249 = vmatprep.subr.bf16.mxu0 %v6571_v58  ;;  %v4705_v11 = vand.u32 %v4703_v47, %v4686_v0 }
 0x524   :  { %6257 = vmatprep.mubr.msk.bf16.mxu1 %vm6572_vm4, %v6571_v58  ;;  %6267 = vmatprep.subr.bf16.mxu1 %v6571_v58  ;;  %v3722_v53 = vpop.permute.xlu1 %3721 }
 0x525   :  { %v3679_v6 = vpop.permute.xlu0 %3678 }
 0x528   :  { %v3808_v21 = vpop.permute.xlu1 %3807 }
 0x529   :  { %6240 = vmatmul.mubr.msk.bf16.vlgmr.msra.gmra.mrb[128].mxu0 %vm2912_vm9, %v2907_v30  ;;  %6258 = vmatmul.mubr.msk.bf16.vlgmr.msra.gmra.mrb[136].mxu1 %vm2912_vm9, %v2897_v56  ;;  %v3765_v17 = vpop.permute.xlu0 %3764 }
 0x52a   :  { %6250 = vmatpush3.bf16.msra.mxu0 %v3222_v46  ;;  %6268 = vmatpush3.bf16.msra.mxu1 %v7396_v22 }
 0x52b   :  { %6251 = vmatprep.mubr.msk.bf16.mxu0 %vm6572_vm4, %v6571_v58  ;;  %6261 = vmatprep.subr.bf16.mxu0 %v6571_v58 }
 0x52c   :  { %6269 = vmatprep.mubr.msk.bf16.mxu1 %vm6572_vm4, %v6571_v58  ;;  %6279 = vmatprep.subr.bf16.mxu1 %v6571_v58  ;;  %v3894_v1 = vpop.permute.xlu1 %3893 }
 0x52d   :  { %v3851_v52 = vpop.permute.xlu0 %3850 }
 0x530   :  { %v3993_v50 = vpop.permute.xlu1 %3992 }
 0x531   :  { %6252 = vmatmul.mubr.msk.bf16.vlgmr.msra.gmra.mrb[132].mxu0 %vm2912_vm9, %v2907_v30  ;;  %6270 = vmatmul.mubr.msk.bf16.vlgmr.msra.gmra.mrb[140].mxu1 %vm2912_vm9, %v2897_v56  ;;  %v3947_v2 = vpop.permute.xlu0 %3946 }
 0x532   :  { %6262 = vmatpush3.bf16.msra.mxu0 %v7386_v5  ;;  %6280 = vmatpush3.bf16.msra.mxu1 %v7404_v25 }
 0x533   :  { %6263 = vmatprep.mubr.msk.bf16.mxu0 %vm6572_vm4, %v6571_v58  ;;  %6273 = vmatprep.subr.bf16.mxu0 %v6571_v58 }
 0x534   :  { %6281 = vmatprep.mubr.msk.bf16.mxu1 %vm6572_vm4, %v6571_v58  ;;  %6291 = vmatprep.subr.bf16.mxu1 %v6571_v58  ;;  %v4079_v26 = vpop.permute.xlu1 %4078 }
 0x535   :  { %v4036_v16 = vpop.permute.xlu0 %4035 }
 0x538   :  { %v4165_v28 = vpop.permute.xlu1 %4164 }
 0x539   :  { %6264 = vmatmul.mubr.msk.bf16.vlgmr.msra.gmra.mrb[136].mxu0 %vm2912_vm9, %v2897_v56  ;;  %6282 = vmatmul.mubr.msk.bf16.vlgmr.msra.gmra.mrb[144].mxu1 %vm2912_vm9, %v2897_v56  ;;  %v4122_v15 = vpop.permute.xlu0 %4121 }
 0x53a   :  { %6274 = vmatpush3.bf16.msra.mxu0 %v7394_v57  ;;  %6292 = vmatpush3.bf16.msra.mxu1 %v7412_v54 }
 0x53b   :  { %6275 = vmatprep.mubr.msk.bf16.mxu0 %vm6572_vm4, %v6571_v58  ;;  %6285 = vmatprep.subr.bf16.mxu0 %v6571_v58 }
 0x53c   :  { %6293 = vmatprep.mubr.msk.bf16.mxu1 %vm6572_vm4, %v6571_v58  ;;  %6303 = vmatprep.subr.bf16.mxu1 %v6571_v58  ;;  %v4251_v8 = vpop.permute.xlu1 %4250 }
 0x53d   :  { %v4208_v10 = vpop.permute.xlu0 %4207 }
 0x540   :  { %v4350_v14 = vpop.permute.xlu1 %4349 }
 0x541   :  { %6276 = vmatmul.mubr.msk.bf16.vlgmr.msra.gmra.mrb[140].mxu0 %vm2912_vm9, %v2897_v56  ;;  %6294 = vmatmul.mubr.msk.bf16.vlgmr.msra.gmra.mrb[148].mxu1 %vm2912_vm9, %v2897_v56  ;;  %v4304_v24 = vpop.permute.xlu0 %4303 }
 0x542   :  { %6286 = vmatpush3.bf16.msra.mxu0 %v7402_v42  ;;  %6304 = vmatpush3.bf16.msra.mxu1 %v3590_v62 }
 0x543   :  { %6287 = vmatprep.mubr.msk.bf16.mxu0 %vm6572_vm4, %v6571_v58  ;;  %6297 = vmatprep.subr.bf16.mxu0 %v6571_v58 }
 0x544   :  { %6305 = vmatprep.mubr.msk.bf16.mxu1 %vm6572_vm4, %v6571_v58  ;;  %6315 = vmatprep.subr.bf16.mxu1 %v6571_v58  ;;  %v4436_v34 = vpop.permute.xlu1 %4435 }
 0x545   :  { %v4393_v31 = vpop.permute.xlu0 %4392 }
 0x548   :  { %v4522_v5 = vpop.permute.xlu1 %4521 }
 0x549   :  { %6288 = vmatmul.mubr.msk.bf16.vlgmr.msra.gmra.mrb[144].mxu0 %vm2912_vm9, %v2897_v56  ;;  %6306 = vmatmul.mubr.msk.bf16.vlgmr.msra.gmra.mrb[152].mxu1 %vm2912_vm9, %v3588_v55  ;;  %v4479_v36 = vpop.permute.xlu0 %4478 }
 0x54a   :  { %6298 = vmatpush3.bf16.msra.mxu0 %v7410_v48  ;;  %6316 = vmatpush3.bf16.msra.mxu1 %v3679_v6 }
 0x54b   :  { %6299 = vmatprep.mubr.msk.bf16.mxu0 %vm6572_vm4, %v6571_v58  ;;  %6309 = vmatprep.subr.bf16.mxu0 %v6571_v58 }
 0x54c   :  { %6317 = vmatprep.mubr.msk.bf16.mxu1 %vm6572_vm4, %v6571_v58  ;;  %6327 = vmatprep.subr.bf16.mxu1 %v6571_v58  ;;  %v4608_v20 = vpop.permute.xlu1 %4607 }
 0x54d   :  { %v4565_v33 = vpop.permute.xlu0 %4564 }
 0x551   :  { %6300 = vmatmul.mubr.msk.bf16.vlgmr.msra.gmra.mrb[148].mxu0 %vm2912_vm9, %v2897_v56  ;;  %6318 = vmatmul.mubr.msk.bf16.vlgmr.msra.gmra.mrb[156].mxu1 %vm2912_vm9, %v3588_v55 }
 0x552   :  { %6310 = vmatpush3.bf16.msra.mxu0 %v3636_v63  ;;  %6328 = vmatpush3.bf16.msra.mxu1 %v3765_v17 }
 0x553   :  { %6311 = vmatprep.mubr.msk.bf16.mxu0 %vm6572_vm4, %v6571_v58  ;;  %6321 = vmatprep.subr.bf16.mxu0 %v6571_v58 }
 0x554   :  { %6329 = vmatprep.mubr.msk.bf16.mxu1 %vm6572_vm4, %v6571_v58  ;;  %6339 = vmatprep.subr.bf16.mxu1 %v6571_v58 }
 0x559   :  { %6312 = vmatmul.mubr.msk.bf16.vlgmr.msra.gmra.mrb[152].mxu0 %vm2912_vm9, %v3588_v55  ;;  %6330 = vmatmul.mubr.msk.bf16.vlgmr.msra.gmra.mrb[160].mxu1 %vm2912_vm9, %v3588_v55 }
 0x55a   :  { %6322 = vmatpush3.bf16.msra.mxu0 %v3722_v53  ;;  %6340 = vmatpush3.bf16.msra.mxu1 %v3851_v52 }
 0x55b   :  { %6323 = vmatprep.mubr.msk.bf16.mxu0 %vm6572_vm4, %v6571_v58  ;;  %6333 = vmatprep.subr.bf16.mxu0 %v6571_v58 }
 0x55c   :  { %6341 = vmatprep.mubr.msk.bf16.mxu1 %vm6572_vm4, %v6571_v58  ;;  %6351 = vmatprep.subr.bf16.mxu1 %v6571_v58 }
 0x561   :  { %6324 = vmatmul.mubr.msk.bf16.vlgmr.msra.gmra.mrb[156].mxu0 %vm2912_vm9, %v3588_v55  ;;  %6342 = vmatmul.mubr.msk.bf16.vlgmr.msra.gmra.mrb[164].mxu1 %vm2912_vm9, %v3588_v55 }
 0x562   :  { %6334 = vmatpush3.bf16.msra.mxu0 %v3808_v21  ;;  %6352 = vmatpush3.bf16.msra.mxu1 %v3947_v2 }
 0x563   :  { %6335 = vmatprep.mubr.msk.bf16.mxu0 %vm6572_vm4, %v6571_v58  ;;  %6345 = vmatprep.subr.bf16.mxu0 %v6571_v58 }
 0x564   :  { %6353 = vmatprep.mubr.msk.bf16.mxu1 %vm6572_vm4, %v6571_v58  ;;  %6363 = vmatprep.subr.bf16.mxu1 %v6571_v58 }
 0x569   :  { %6336 = vmatmul.mubr.msk.bf16.vlgmr.msra.gmra.mrb[160].mxu0 %vm2912_vm9, %v3588_v55  ;;  %6354 = vmatmul.mubr.msk.bf16.vlgmr.msra.gmra.mrb[168].mxu1 %vm2912_vm9, %v3945_v60 }
 0x56a   :  { %6346 = vmatpush3.bf16.msra.mxu0 %v3894_v1  ;;  %6364 = vmatpush3.bf16.msra.mxu1 %v4036_v16 }
 0x56b   :  { %6347 = vmatprep.mubr.msk.bf16.mxu0 %vm6572_vm4, %v6571_v58  ;;  %6357 = vmatprep.subr.bf16.mxu0 %v6571_v58 }
 0x56c   :  { %6365 = vmatprep.mubr.msk.bf16.mxu1 %vm6572_vm4, %v6571_v58  ;;  %6375 = vmatprep.subr.bf16.mxu1 %v6571_v58 }
 0x571   :  { %6348 = vmatmul.mubr.msk.bf16.vlgmr.msra.gmra.mrb[164].mxu0 %vm2912_vm9, %v3588_v55  ;;  %6366 = vmatmul.mubr.msk.bf16.vlgmr.msra.gmra.mrb[172].mxu1 %vm2912_vm9, %v3945_v60 }
 0x572   :  { %6358 = vmatpush3.bf16.msra.mxu0 %v3993_v50  ;;  %6376 = vmatpush3.bf16.msra.mxu1 %v4122_v15 }
 0x573   :  { %6359 = vmatprep.mubr.msk.bf16.mxu0 %vm6572_vm4, %v6571_v58  ;;  %6369 = vmatprep.subr.bf16.mxu0 %v6571_v58 }
 0x574   :  { %6377 = vmatprep.mubr.msk.bf16.mxu1 %vm6572_vm4, %v6571_v58  ;;  %6387 = vmatprep.subr.bf16.mxu1 %v6571_v58 }
 0x579   :  { %6360 = vmatmul.mubr.msk.bf16.vlgmr.msra.gmra.mrb[168].mxu0 %vm2912_vm9, %v3945_v60  ;;  %6378 = vmatmul.mubr.msk.bf16.vlgmr.msra.gmra.mrb[176].mxu1 %vm2912_vm9, %v3945_v60 }
 0x57a   :  { %6370 = vmatpush3.bf16.msra.mxu0 %v4079_v26  ;;  %6388 = vmatpush3.bf16.msra.mxu1 %v4208_v10 }
 0x57b   :  { %6371 = vmatprep.mubr.msk.bf16.mxu0 %vm6572_vm4, %v6571_v58  ;;  %6381 = vmatprep.subr.bf16.mxu0 %v6571_v58 }
 0x57c   :  { %6389 = vmatprep.mubr.msk.bf16.mxu1 %vm6572_vm4, %v6571_v58  ;;  %6399 = vmatprep.subr.bf16.mxu1 %v6571_v58 }
 0x581   :  { %6372 = vmatmul.mubr.msk.bf16.vlgmr.msra.gmra.mrb[172].mxu0 %vm2912_vm9, %v3945_v60  ;;  %6390 = vmatmul.mubr.msk.bf16.vlgmr.msra.gmra.mrb[180].mxu1 %vm2912_vm9, %v3945_v60 }
 0x582   :  { %6382 = vmatpush3.bf16.msra.mxu0 %v4165_v28  ;;  %6400 = vmatpush3.bf16.msra.mxu1 %v4304_v24 }
 0x583   :  { %6383 = vmatprep.mubr.msk.bf16.mxu0 %vm6572_vm4, %v6571_v58  ;;  %6393 = vmatprep.subr.bf16.mxu0 %v6571_v58 }
 0x584   :  { %6401 = vmatprep.mubr.msk.bf16.mxu1 %vm6572_vm4, %v6571_v58  ;;  %6411 = vmatprep.subr.bf16.mxu1 %v6571_v58 }
 0x589   :  { %6384 = vmatmul.mubr.msk.bf16.vlgmr.msra.gmra.mrb[176].mxu0 %vm2912_vm9, %v3945_v60  ;;  %6402 = vmatmul.mubr.msk.bf16.vlgmr.msra.gmra.mrb[184].mxu1 %vm2912_vm9, %v4302_v9 }
 0x58a   :  { %6394 = vmatpush3.bf16.msra.mxu0 %v4251_v8  ;;  %6412 = vmatpush3.bf16.msra.mxu1 %v4393_v31 }
 0x58b   :  { %6395 = vmatprep.mubr.msk.bf16.mxu0 %vm6572_vm4, %v6571_v58  ;;  %6405 = vmatprep.subr.bf16.mxu0 %v6571_v58 }
 0x58c   :  { %6413 = vmatprep.mubr.msk.bf16.mxu1 %vm6572_vm4, %v6571_v58  ;;  %6423 = vmatprep.subr.bf16.mxu1 %v6571_v58 }
 0x591   :  { %6396 = vmatmul.mubr.msk.bf16.vlgmr.msra.gmra.mrb[180].mxu0 %vm2912_vm9, %v3945_v60  ;;  %6414 = vmatmul.mubr.msk.bf16.vlgmr.msra.gmra.mrb[188].mxu1 %vm2912_vm9, %v4302_v9 }
 0x592   :  { %6406 = vmatpush3.bf16.msra.mxu0 %v4350_v14  ;;  %6424 = vmatpush3.bf16.msra.mxu1 %v4479_v36 }
 0x593   :  { %6407 = vmatprep.mubr.msk.bf16.mxu0 %vm6572_vm4, %v6571_v58  ;;  %6417 = vmatprep.subr.bf16.mxu0 %v6571_v58 }
 0x594   :  { %6425 = vmatprep.mubr.msk.bf16.mxu1 %vm6572_vm4, %v6571_v58  ;;  %6435 = vmatprep.subr.bf16.mxu1 %v6571_v58 }
 0x599   :  { %6408 = vmatmul.mubr.msk.bf16.vlgmr.msra.gmra.mrb[184].mxu0 %vm2912_vm9, %v4302_v9  ;;  %6426 = vmatmul.mubr.msk.bf16.vlgmr.msra.gmra.mrb[192].mxu1 %vm2912_vm9, %v4302_v9 }
 0x59a   :  { %6418 = vmatpush3.bf16.msra.mxu0 %v4436_v34  ;;  %6436 = vmatpush3.bf16.msra.mxu1 %v4565_v33 }
 0x59b   :  { %6419 = vmatprep.mubr.msk.bf16.mxu0 %vm6572_vm4, %v6571_v58  ;;  %6429 = vmatprep.subr.bf16.mxu0 %v6571_v58 }
 0x59c   :  { %6437 = vmatprep.mubr.msk.bf16.mxu1 %vm6572_vm4, %v6571_v58  ;;  %6447 = vmatprep.subr.bf16.mxu1 %v4705_v11 }
 0x5a1   :  { %6420 = vmatmul.mubr.msk.bf16.vlgmr.msra.gmra.mrb[188].mxu0 %vm2912_vm9, %v4302_v9  ;;  %6438 = vmatmul.mubr.msk.bf16.vlgmr.msra.gmra.mrb[196].mxu1 %vm2912_vm9, %v4302_v9 }
 0x5a2   :  { %6430 = vmatpush3.bf16.msra.mxu0 %v4522_v5  ;;  %6431 = vmatprep.mubr.msk.bf16.mxu0 %vm6572_vm4, %v6571_v58 }
 0x5a3   :  { %6441 = vmatprep.subr.bf16.mxu0 %v6571_v58  ;;  %6448 = vmatpush3.bf16.msra.mxu1 %v4705_v11 }
 0x5a4   :  { %6469 = vmatprep.subr.bf16.mxu1 %v6571_v58 }
 0x5a9   :  { %6432 = vmatmul.mubr.msk.bf16.vlgmr.msra.gmra.mrb[192].mxu0 %vm2912_vm9, %v4302_v9 }
 0x5aa   :  { %6442 = vmatpush3.bf16.msra.mxu0 %v4608_v20  ;;  %6443 = vmatprep.mubr.msk.bf16.mxu0 %vm6572_vm4, %v6571_v58 }
 0x5b1   :  { %6444 = vmatmul.mubr.msk.bf16.vlgmr.msra.gmra.mrb[196].mxu0 %vm2912_vm9, %v4302_v9 }
 0x5dc   :  { %v2950_v35 = vpop.f32.mrb[112].mxu0 }
 0x5dd   :  { %v6211_v38 = vpop.f32.mrb[113].mxu0 }
 0x5de   :  { %v2953_v4 = vpop.f32.mrb[114].mxu0 }
 0x5df   :  { %v6212_v19 = vpop.f32.mrb[115].mxu0 }
 0x5e4   :  { %v2994_v57 = vpop.f32.mrb[116].mxu0 }
 0x5e5   :  { %v6217_v37 = vpop.f32.mrb[117].mxu0 }
 0x5e6   :  { %v2997_v22 = vpop.f32.mrb[118].mxu0 }
 0x5e7   :  { %v6218_v23 = vpop.f32.mrb[119].mxu0 }
 0x5ec   :  { %v3126_v39 = vpop.f32.mrb[128].mxu1  ;;  %v3038_v40 = vpop.f32.mrb[120].mxu0 }
 0x5ed   :  { %v6235_v42 = vpop.f32.mrb[129].mxu1  ;;  %v6223_v41 = vpop.f32.mrb[121].mxu0 }
 0x5ee   :  { %v3129_v25 = vpop.f32.mrb[130].mxu1  ;;  %v3041_v43 = vpop.f32.mrb[122].mxu0 }
 0x5ef   :  { %v6236_v29 = vpop.f32.mrb[131].mxu1  ;;  %v6224_v44 = vpop.f32.mrb[123].mxu0 }
 0x5f4   :  { %v3214_v48 = vpop.f32.mrb[132].mxu1  ;;  %v3082_v18 = vpop.f32.mrb[124].mxu0 }
 0x5f5   :  { %v6247_v54 = vpop.f32.mrb[133].mxu1  ;;  %v6229_v49 = vpop.f32.mrb[125].mxu0 }
 0x5f6   :  { %v3217_v30 = vpop.f32.mrb[134].mxu1  ;;  %v3085_v51 = vpop.f32.mrb[126].mxu0 }
 0x5f7   :  { %v6248_v45 = vpop.f32.mrb[135].mxu1  ;;  %v6230_v7 = vpop.f32.mrb[127].mxu0 }
 0x5fc   :  { %v3301_v56 = vpop.f32.mrb[136].mxu1  ;;  %v3170_v46 = vpop.f32.mrb[128].mxu0 }
 0x5fd   :  { %v3302_v62 = vadd.f32 %v3301_v56, %v2950_v35  ;;  %v6259_v13 = vpop.f32.mrb[137].mxu1  ;;  %v6241_v55 = vpop.f32.mrb[129].mxu0 }
 0x5fe   :  { %v3304_v6 = vpop.f32.mrb[138].mxu1  ;;  %v3173_v63 = vpop.f32.mrb[130].mxu0 }
 0x5ff   :  { %v6260_v17 = vpop.f32.mrb[139].mxu1  ;;  %v6242_v53 = vpop.f32.mrb[131].mxu0 }
 0x604   :  { %v3381_v52 = vpop.f32.mrb[140].mxu1  ;;  %v3258_v21 = vpop.f32.mrb[132].mxu0 }
 0x605   :  { %v3382_v2 = vadd.f32 %v3381_v52, %v3038_v40  ;;  %v6253_v32 = vpop.f32.mrb[133].mxu0  ;;  %v6271_v3 = vpop.f32.mrb[141].mxu1 }
 0x606   :  { %v3261_v60 = vpop.f32.mrb[134].mxu0  ;;  %v3384_v1 = vpop.f32.mrb[142].mxu1 }
 0x607   :  { %v6254_v16 = vpop.f32.mrb[135].mxu0  ;;  %v6272_v50 = vpop.f32.mrb[143].mxu1 }
 0x60c   :  { %v3341_v15 = vpop.f32.mrb[136].mxu0  ;;  %v3461_v26 = vpop.f32.mrb[144].mxu1 }
 0x60d   :  { %v3342_v10 = vadd.f32 %v3341_v15, %v2994_v57  ;;  %v3462_v28 = vadd.f32 %v3461_v26, %v3126_v39  ;;  %v6265_v24 = vpop.f32.mrb[137].mxu0  ;;  %v6283_v12 = vpop.f32.mrb[145].mxu1 }
 0x60e   :  { %v3344_v9 = vpop.f32.mrb[138].mxu0  ;;  %v3464_v8 = vpop.f32.mrb[146].mxu1 }
 0x60f   :  { %v6266_v31 = vpop.f32.mrb[139].mxu0  ;;  %v6284_v14 = vpop.f32.mrb[147].mxu1 }
 0x614   :  { %v3421_v36 = vpop.f32.mrb[140].mxu0  ;;  %v3541_v34 = vpop.f32.mrb[148].mxu1 }
 0x615   :  { %v3422_v33 = vadd.f32 %v3421_v36, %v3082_v18  ;;  %v3542_v5 = vadd.f32 %v3541_v34, %v3214_v48  ;;  %v6277_v20 = vpop.f32.mrb[141].mxu0  ;;  %v6295_v35 = vpop.f32.mrb[149].mxu1 }
 0x616   :  { %v3424_v38 = vpop.f32.mrb[142].mxu0  ;;  %v3544_v4 = vpop.f32.mrb[150].mxu1 }
 0x617   :  { %v6278_v19 = vpop.f32.mrb[143].mxu0  ;;  %v6296_v37 = vpop.f32.mrb[151].mxu1 }
 0x61c   :  { %v3501_v22 = vpop.f32.mrb[144].mxu0  ;;  %v3629_v23 = vpop.f32.mrb[152].mxu1 }
 0x61d   :  { %v3502_v57 = vadd.f32 %v3501_v22, %v3170_v46  ;;  %v3936_v39 = vadd.f32 %v3629_v23, %v3302_v62  ;;  %v6289_v40 = vpop.f32.mrb[145].mxu0  ;;  %v6307_v42 = vpop.f32.mrb[153].mxu1 }
 0x61e   :  { %v3504_v41 = vpop.f32.mrb[146].mxu0  ;;  %v3632_v25 = vpop.f32.mrb[154].mxu1 }
 0x61f   :  { %v6290_v43 = vpop.f32.mrb[147].mxu0  ;;  %v6308_v29 = vpop.f32.mrb[155].mxu1 }
 0x624   :  { %v3581_v44 = vpop.f32.mrb[148].mxu0  ;;  %v3715_v54 = vpop.f32.mrb[156].mxu1 }
 0x625   :  { %v3582_v18 = vadd.f32 %v3581_v44, %v3258_v21  ;;  %v3938_v48 = vadd.f32 %v3715_v54, %v3382_v2  ;;  %v6301_v49 = vpop.f32.mrb[149].mxu0  ;;  %v6319_v61 = vpop.f32.mrb[157].mxu1 }
 0x626   :  { %v3584_v59 = vpop.f32.mrb[150].mxu0  ;;  %v3718_v30 = vpop.f32.mrb[158].mxu1 }
 0x627   :  { %v6302_v51 = vpop.f32.mrb[151].mxu0  ;;  %v6320_v0 = vpop.f32.mrb[159].mxu1 }
 0x62c   :  { %v3672_v45 = vpop.f32.mrb[152].mxu0  ;;  %v3801_v7 = vpop.f32.mrb[160].mxu1 }
 0x62d   :  { %v3937_v27 = vadd.f32 %v3672_v45, %v3342_v10  ;;  %v3940_v47 = vadd.f32 %v3801_v7, %v3462_v28  ;;  %v6313_v11 = vpop.f32.mrb[153].mxu0  ;;  %v6331_v56 = vpop.f32.mrb[161].mxu1 }
 0x62e   :  { %v3675_v46 = vpop.f32.mrb[154].mxu0  ;;  %v3804_v62 = vpop.f32.mrb[162].mxu1 }
 0x62f   :  { %v6314_v13 = vpop.f32.mrb[155].mxu0  ;;  %v6332_v55 = vpop.f32.mrb[163].mxu1 }
 0x634   :  { %v3758_v6 = vpop.f32.mrb[156].mxu0  ;;  %v3887_v63 = vpop.f32.mrb[164].mxu1 }
 0x635   :  { %v3939_v17 = vadd.f32 %v3758_v6, %v3422_v33  ;;  %v3942_v53 = vadd.f32 %v3887_v63, %v3542_v5  ;;  %v6325_v52 = vpop.f32.mrb[157].mxu0  ;;  %v6343_v21 = vpop.f32.mrb[165].mxu1 }
 0x636   :  { %v3761_v2 = vpop.f32.mrb[158].mxu0  ;;  %v3890_v32 = vpop.f32.mrb[166].mxu1 }
 0x637   :  { %v6326_v3 = vpop.f32.mrb[159].mxu0  ;;  %v6344_v60 = vpop.f32.mrb[167].mxu1 }
 0x638   :  { %v4662_v32 = vpop.permute.xlu0 %4661 }
 0x63c   :  { %v3844_v1 = vpop.f32.mrb[160].mxu0  ;;  %v3986_v16 = vpop.f32.mrb[168].mxu1 }
 0x63d   :  { %v3941_v50 = vadd.f32 %v3844_v1, %v3502_v57  ;;  %v4293_v15 = vadd.f32 %v3986_v16, %v3936_v39  ;;  %v6337_v26 = vpop.f32.mrb[161].mxu0  ;;  %v6355_v10 = vpop.f32.mrb[169].mxu1 }
 0x63e   :  { %v3847_v28 = vpop.f32.mrb[162].mxu0  ;;  %v3989_v24 = vpop.f32.mrb[170].mxu1 }
 0x63f   :  { %v6338_v12 = vpop.f32.mrb[163].mxu0  ;;  %v6356_v9 = vpop.f32.mrb[171].mxu1 }
 0x644   :  { %v3930_v8 = vpop.f32.mrb[164].mxu0  ;;  %v4072_v31 = vpop.f32.mrb[172].mxu1 }
 0x645   :  { %v3943_v14 = vadd.f32 %v3930_v8, %v3582_v18  ;;  %v4295_v36 = vadd.f32 %v4072_v31, %v3938_v48  ;;  %v6349_v34 = vpop.f32.mrb[165].mxu0  ;;  %v6367_v33 = vpop.f32.mrb[173].mxu1 }
 0x646   :  { %v3933_v5 = vpop.f32.mrb[166].mxu0  ;;  %v4075_v20 = vpop.f32.mrb[174].mxu1 }
 0x647   :  { %v6350_v35 = vpop.f32.mrb[167].mxu0  ;;  %v6368_v38 = vpop.f32.mrb[175].mxu1 }
 0x64c   :  { %v4029_v4 = vpop.f32.mrb[168].mxu0  ;;  %v4158_v19 = vpop.f32.mrb[176].mxu1 }
 0x64d   :  { %v4294_v37 = vadd.f32 %v4029_v4, %v3937_v27  ;;  %v4297_v22 = vadd.f32 %v4158_v19, %v3940_v47  ;;  %v6361_v23 = vpop.f32.mrb[169].mxu0  ;;  %v6379_v57 = vpop.f32.mrb[177].mxu1 }
 0x64e   :  { %v4032_v39 = vpop.f32.mrb[170].mxu0  ;;  %v4161_v40 = vpop.f32.mrb[178].mxu1 }
 0x64f   :  { %v6362_v42 = vpop.f32.mrb[171].mxu0  ;;  %v6380_v41 = vpop.f32.mrb[179].mxu1 }
 0x654   :  { %v4115_v25 = vpop.f32.mrb[172].mxu0  ;;  %v4244_v43 = vpop.f32.mrb[180].mxu1 }
 0x655   :  { %v4296_v29 = vadd.f32 %v4115_v25, %v3939_v17  ;;  %v4299_v44 = vadd.f32 %v4244_v43, %v3942_v53  ;;  %v6373_v54 = vpop.f32.mrb[173].mxu0  ;;  %v6391_v18 = vpop.f32.mrb[181].mxu1 }
 0x656   :  { %v4118_v48 = vpop.f32.mrb[174].mxu0  ;;  %v4247_v49 = vpop.f32.mrb[182].mxu1 }
 0x657   :  { %v6374_v61 = vpop.f32.mrb[175].mxu0  ;;  %v6392_v59 = vpop.f32.mrb[183].mxu1 }
 0x65c   :  { %v4201_v30 = vpop.f32.mrb[176].mxu0  ;;  %v4343_v51 = vpop.f32.mrb[184].mxu1 }
 0x65d   :  { %v4298_v0 = vadd.f32 %v4201_v30, %v3941_v50  ;;  %v4650_v45 = vadd.f32 %v4343_v51, %v4293_v15  ;;  %v6385_v7 = vpop.f32.mrb[177].mxu0  ;;  %v6403_v27 = vpop.f32.mrb[185].mxu1 }
 0x65e   :  { %v4204_v47 = vpop.f32.mrb[178].mxu0  ;;  %v4346_v11 = vpop.f32.mrb[186].mxu1 }
 0x65f   :  { %v6386_v56 = vpop.f32.mrb[179].mxu0  ;;  %v6404_v46 = vpop.f32.mrb[187].mxu1  ;;  %v4664_v1 = vadd.f32 %v4662_v32, %v4650_v45 }
 0x660   :  { %v4772_v56 = vld [vmem:[%s7835_s2 + $0x58] sm:$0xff]  ;;  %v4773_v46 = vld [vmem:[%s7835_s2 + $0x60] sm:$0xff] }
 0x661   :  { %v4672_v8 = vmax.f32 %v4664_v1, 0.0 }
 0x664   :  { %v4287_v62 = vpop.f32.mrb[180].mxu0  ;;  %v4429_v13 = vpop.f32.mrb[188].mxu1 }
 0x665   :  { %v4300_v55 = vadd.f32 %v4287_v62, %v3943_v14  ;;  %v4652_v6 = vadd.f32 %v4429_v13, %v4295_v36  ;;  %v6397_v63 = vpop.f32.mrb[181].mxu0  ;;  %v6415_v17 = vpop.f32.mrb[189].mxu1  ;;  %v4776_v62 = vpack.c.bf16 %v4773_v46, %v4772_v56  ;;  %v5479_v13 = vld [vmem:[%s7835_s2 + $0x148] ss:$0 sm:$0xff] }
 0x666   :  { %v4290_v53 = vpop.f32.mrb[182].mxu0  ;;  %v4432_v52 = vpop.f32.mrb[190].mxu1  ;;  %4854 = vrot.lane.b32.xlu1 %v5479_v13, %s6577_s18  ;;  %4869 = vrot.lane.b32.xlu0 %v5479_v13, %s6578_s19 }
 0x667   :  { %v6398_v21 = vpop.f32.mrb[183].mxu0  ;;  %v6416_v2 = vpop.f32.mrb[191].mxu1  ;;  %v4666_v33 = vadd.f32 %v4662_v32, %v4652_v6  ;;  %6465 = vmatprep.mubr.msk.bf16.mxu0 %vm4782_vm13, %v4776_v62 }
 0x669   :  { %v4674_v57 = vmax.f32 %v4666_v33, 0.0  ;;  %v4914_v33 = vld [vmem:[%s7835_s2 + $0x168] sm:$0xff] }
 0x66a   :  { %4883 = vrot.lane.b32.xlu0 %v5479_v13, %s6579_s24 }
 0x66c   :  { %v4386_v3 = vpop.f32.mrb[184].mxu0  ;;  %v4515_v60 = vpop.f32.mrb[192].mxu1 }
 0x66d   :  { %v4651_v16 = vadd.f32 %v4386_v3, %v4294_v37  ;;  %v4654_v50 = vadd.f32 %v4515_v60, %v4297_v22  ;;  %v6409_v15 = vpop.f32.mrb[185].mxu0  ;;  %v6427_v26 = vpop.f32.mrb[193].mxu1 }
 0x66e   :  { %v4389_v10 = vpop.f32.mrb[186].mxu0  ;;  %v4518_v28 = vpop.f32.mrb[194].mxu1  ;;  %4897 = vrot.lane.b32.xlu0 %v5479_v13, %s6580_s25  ;;  %v4775_v15 = vld [vmem:[%s7835_s2 + $0x70] sm:$0xff] }
 0x66f   :  { %v4665_v24 = vadd.f32 %v4662_v32, %v4651_v16  ;;  %v6410_v12 = vpop.f32.mrb[187].mxu0  ;;  %v6428_v9 = vpop.f32.mrb[195].mxu1  ;;  %v4668_v41 = vadd.f32 %v4662_v32, %v4654_v50  ;;  %v4774_v50 = vld [vmem:[%s7835_s2 + $0x68] sm:$0xff]  ;;  %v4840_v10 = vld [vmem:[%s7833_s0] sm:$0xff] }
 0x670   :  { %v4777_v26 = vpack.c.bf16 %v4775_v15, %v4774_v50  ;;  %v4845_v28 = vmul.f32 %v5479_v13, %v4840_v10  ;;  %v5087_v15 = vld [vmem:[%s7835_s2 + $0x1c0] sm:$0xff]  ;;  %v5089_v10 = vld [vmem:[%s7835_s2 + $0x1d0] sm:$0xff] }
 0x671   :  { %v4673_v31 = vmax.f32 %v4665_v24, 0.0  ;;  %v4676_v18 = vmax.f32 %v4668_v41, 0.0 }
 0x673   :  { %v4682_v14 = vpack.c.bf16 %v4673_v31, %v4672_v8 }
 0x674   :  { %v4472_v36 = vpop.f32.mrb[188].mxu0  ;;  %v4601_v34 = vpop.f32.mrb[196].mxu1 }
 0x675   :  { %v4653_v5 = vadd.f32 %v4472_v36, %v4296_v29  ;;  %v4656_v20 = vadd.f32 %v4601_v34, %v4299_v44  ;;  %6449 = vmatprep.mubr.msk.bf16.mxu1 %vm4687_vm12, %v4682_v14  ;;  %v6421_v35 = vpop.f32.mrb[189].mxu0  ;;  %v6439_v38 = vpop.f32.mrb[197].mxu1  ;;  %v4912_v36 = vld [vmem:[%s7835_s2 + $0x158] sm:$0xff]  ;;  %v4913_v34 = vld [vmem:[%s7835_s2 + $0x160] sm:$0xff] }
 0x676   :  { %v4475_v4 = vpop.f32.mrb[190].mxu0  ;;  %v4604_v19 = vpop.f32.mrb[198].mxu1  ;;  %v4915_v35 = vld [vmem:[%s7835_s2 + $0x170] sm:$0x3f] }
 0x677   :  { %v4667_v37 = vadd.f32 %v4662_v32, %v4653_v5  ;;  %v6422_v22 = vpop.f32.mrb[191].mxu0  ;;  %v6440_v23 = vpop.f32.mrb[199].mxu1  ;;  %v4670_v59 = vadd.f32 %v4662_v32, %v4656_v20  ;;  %v4917_v20 = vpack.c.bf16 %v4913_v34, %v4912_v36  ;;  %v4918_v19 = vpack.c.bf16 %v4915_v35, %v4914_v33 }
 0x679   :  { %v4675_v39 = vmax.f32 %v4667_v37, 0.0  ;;  %v4678_v47 = vmax.f32 %v4670_v59, 0.0 }
 0x67b   :  { %v4683_v40 = vpack.c.bf16 %v4675_v39, %v4674_v57  ;;  %v4929_v57 = vsel %vm77_vm0, %v4918_v19, 0  ;;  %v5148_v19 = vld [vmem:[%s7835_s2 + $0x1f0] sm:$0xff] }
 0x67c   :  { %v4558_v42 = vpop.f32.mrb[192].mxu0 }
 0x67d   :  { %v4655_v25 = vadd.f32 %v4558_v42, %v4298_v0  ;;  %6450 = vmatmul.mubr.msk.bf16.vlgmr.msra.gmra.mrb[200].mxu1 %vm4687_vm12, %v4683_v40  ;;  %v6433_v43 = vpop.f32.mrb[193].mxu0 }
 0x67e   :  { %v4561_v29 = vpop.f32.mrb[194].mxu0  ;;  %6470 = vmatpush3.bf16.msra.mxu1 %v4917_v20 }
 0x67f   :  { %v4669_v44 = vadd.f32 %v4662_v32, %v4655_v25  ;;  %v6434_v54 = vpop.f32.mrb[195].mxu0  ;;  %6471 = vmatprep.subr.bf16.mxu1 %v6571_v58 }
 0x681   :  { %v4677_v48 = vmax.f32 %v4669_v44, 0.0 }
 0x682   :  { %6472 = vmatpush3.bf16.msra.mxu1 %v4929_v57 }
 0x683   :  { %v4684_v49 = vpack.c.bf16 %v4677_v48, %v4676_v18  ;;  %6483 = vmatprep.subr.bf16.mxu1 %v6571_v58 }
 0x684   :  { %v4644_v61 = vpop.f32.mrb[196].mxu0 }
 0x685   :  { %v4657_v30 = vadd.f32 %v4644_v61, %v4300_v55  ;;  %6453 = vmatprep.mubr.msk.bf16.mxu1 %vm4687_vm12, %v4684_v49  ;;  %v6445_v51 = vpop.f32.mrb[197].mxu0  ;;  %v5480_v55 = vld [vmem:[%s7835_s2 + $0x150] ss:$0 sm:$0xff] }
 0x686   :  { %v4647_v45 = vpop.f32.mrb[198].mxu0  ;;  %4859 = vrot.lane.b32.xlu1 %v5480_v55, %s6577_s18  ;;  %4901 = vrot.lane.b32.xlu0 %v5480_v55, %s6580_s25  ;;  %v4850_v24 = vadd.f32 %v5480_v55, %v4845_v28  ;;  %v4972_v51 = vld [vmem:[%s7835_s2 + $0x180] sm:$0xff] }
 0x687   :  { %v4671_v7 = vadd.f32 %v4662_v32, %v4657_v30  ;;  %v6446_v27 = vpop.f32.mrb[199].mxu0  ;;  %v4973_v45 = vld [vmem:[%s7835_s2 + $0x188] sm:$0xff] }
 0x688   :  { %4852 = vst.msk [vmem:[#allocation2] sm:$0xff] %vm4851_vm14, %v4850_v24  ;;  %v5481_v27 = vld [vmem:[%s7835_s2 + $0x178] ss:$0 sm:$0xff] }
 0x689   :  { %v4679_v0 = vmax.f32 %v4671_v7, 0.0  ;;  %v4975_v7 = vpack.c.bf16 %v4973_v45, %v4972_v51  ;;  %v5090_v24 = vld [vmem:[%s7835_s2 + $0x1d8] sm:$0x3f] }
 0x68a   :  { %4873 = vrot.lane.b32.xlu1 %v5480_v55, %s6578_s19  ;;  %v5260_v45 = vld [vmem:[%s7835_s2 + $0x218] sm:$0xff]  ;;  %s6587_s19 = smov [#allocation3]  }
 0x68b   :  { %v4685_v11 = vpack.c.bf16 %v4679_v0, %v4678_v47  ;;  %s5345_s20 = sshll.u32 %s6587_s19, 4  ;;  %s5346_s20 = int_to_ptr.vmem [resolvable:$true] %s5345_s20 }
 0x68c   :  { %s6545_s21 = scalar_lea.vmem %s5346_s20, 128  ;;  %p6550_p1 = scmp.lt.s32.totalorder %s5346_s20, %s5346_s20 }
 0x68d   :  { %6454 = vmatmul.mubr.msk.bf16.gmra.mrb[204].mxu1 %vm4687_vm12, %v4685_v11  ;;  %p6546_p0 = scmp.ne.s32.totalorder %s5346_s20, %s6545_s21  ;;  %p6551_p2 = scmp.lt.s32.totalorder %s6545_s21, %s6545_s21 }
 0x68e   :  { %6473 = vmatprep.mubr.msk.bf16.mxu1 %vm6572_vm4, %v6571_v58  ;;  %4887 = vrot.lane.b32.xlu1 %v5480_v55, %s6579_s24  ;;  %v5025_v55 = vld [vmem:[%s7835_s2 + $0x198] sm:$0xff] }
 0x68f   :  { %p6552_p3 = por %p6551_p2, %p6550_p1 }
 0x691   :  { %p6553_p4 = pnand %p6552_p3, %p6546_p0 }
 0x6d8   :  { %v4855_v12 = vpop.permute.xlu1 %4854  ;;  %v4870_v9 = vpop.permute.xlu0 %4869 }
 0x6dc   :  { %v4884_v31 = vpop.permute.xlu0 %4883 }
 0x6e0   :  { %v4898_v4 = vpop.permute.xlu0 %4897 }
 0x6f8   :  { %v4860_v8 = vpop.permute.xlu1 %4859  ;;  %v4902_v29 = vpop.permute.xlu0 %4901 }
 0x6fc   :  { %v4874_v14 = vpop.permute.xlu1 %4873 }
 0x700   :  { %v4888_v41 = vpop.permute.xlu1 %4887 }
 0x750   :  { %v6451_v6 = vpop.f32.mrb[200].mxu1 }
 0x751   :  { %v4741_v63 = vpop.f32.mrb[201].mxu1 }
 0x752   :  { %v6452_v17 = vpop.f32.mrb[202].mxu1 }
 0x753   :  { %v4779_v53 = vpack.c.bf16 %v6452_v17, %v6451_v6  ;;  %v4744_v52 = vpop.f32.mrb[203].mxu1  ;;  %v5026_v6 = vld [vmem:[%s7835_s2 + $0x1a0] sm:$0xff]  ;;  %v5483_v17 = vld [vmem:[%s7835_s2 + $0x190] ss:$0 sm:$0xff] }
 0x754   :  { %v4778_v21 = vpack.c.bf16 %v4744_v52, %v4741_v63  ;;  %v5028_v63 = vpack.c.bf16 %v5026_v6, %v5025_v55  ;;  %v5267_v55 = vld [vmem:[%s7835_s2 + $0x250] sm:$0x3f] }
 0x756   :  { %6457 = vmatprep.subr.bf16.mxu0 %v4778_v21 }
 0x757   :  { %6458 = vmatpush3.bf16.msra.mxu0 %v4778_v21 }
 0x758   :  { %6459 = vmatprep.subr.bf16.mxu0 %v4779_v53 }
 0x75b   :  { %6460 = vmatpush3.bf16.msra.mxu0 %v4779_v53 }
 0x760   :  { %v6455_v2 = vpop.f32.mrb[204].mxu1 }
 0x761   :  { %v4757_v32 = vpop.f32.mrb[205].mxu1 }
 0x762   :  { %v6456_v3 = vpop.f32.mrb[206].mxu1 }
 0x763   :  { %v4781_v60 = vpack.c.bf16 %v6456_v3, %v6455_v2  ;;  %v4760_v1 = vpop.f32.mrb[207].mxu1 }
 0x764   :  { %v4780_v16 = vpack.c.bf16 %v4760_v1, %v4757_v32  ;;  %v5085_v1 = vld [vmem:[%s7835_s2 + $0x1b0] sm:$0xff] }
 0x766   :  { %6461 = vmatprep.subr.bf16.mxu0 %v4780_v16 }
 0x767   :  { %6462 = vmatpush3.bf16.msra.mxu0 %v4780_v16  ;;  %v5086_v16 = vld [vmem:[%s7835_s2 + $0x1b8] sm:$0xff] }
 0x768   :  { %6463 = vmatprep.subr.bf16.mxu0 %v4781_v60  ;;  %v5092_v50 = vpack.c.bf16 %v5086_v16, %v5085_v1  ;;  %v5493_v16 = vld [vmem:[%s7835_s2 + $0x258] ss:$0 sm:$0xff] }
 0x76b   :  { %6464 = vmatpush3.bf16.msra.mxu0 %v4781_v60 }
 0x76c   :  { %6477 = vmatprep.subr.bf16.mxu0 %v6571_v58 }
 0x76e   :  { %6466 = vmatmul.mubr.msk.bf16.vlgmr.msra.gmra.mrb[200].mxu0 %vm4782_vm13, %v4777_v26  ;;  %v5088_v26 = vld [vmem:[%s7835_s2 + $0x1c8] sm:$0xff] }
 0x76f   :  { %6479 = vmatprep.mubr.msk.bf16.mxu0 %vm6572_vm4, %v6571_v58  ;;  %6478 = vmatpush3.bf16.msra.mxu0 %v4975_v7  ;;  %v5093_v28 = vpack.c.bf16 %v5088_v26, %v5087_v15  ;;  %v5261_v7 = vld [vmem:[%s7835_s2 + $0x220] sm:$0xff] }
 0x770   :  { %6489 = vmatprep.subr.bf16.mxu0 %v6571_v58 }
 0x841   :  { %v6467_v5 = vpop.f32.mrb[200].mxu0 }
 0x842   :  { %v4823_v38 = vpop.f32.mrb[201].mxu0  ;;  %v4886_v39 = vmul.f32 %v6467_v5, %v4884_v31 }
 0x843   :  { %v4857_v37 = vmul.f32 %v4855_v12, %v4823_v38  ;;  %v6468_v22 = vpop.f32.mrb[202].mxu0  ;;  %v5094_v12 = vpack.c.bf16 %v5090_v24, %v5089_v10  ;;  %v5495_v10 = vld [vmem:[%s7835_s2 + $0x260] ss:$0 sm:$0xff] }
 0x844   :  { %v4826_v23 = vpop.f32.mrb[203].mxu0  ;;  %v4900_v43 = vmul.f32 %v6468_v22, %v4898_v4  ;;  %v4890_v44 = vadd.f32 %v4888_v41, %v4886_v39  ;;  %v5147_v4 = vld [vmem:[%s7835_s2 + $0x1e8] sm:$0xff]  ;;  %v5487_v22 = vld [vmem:[%s7835_s2 + $0x1e0] ss:$0 sm:$0xff] }
 0x845   :  { %v4862_v40 = vadd.f32 %v4860_v8, %v4857_v37  ;;  %v4872_v42 = vmul.f32 %v4870_v9, %v4826_v23  ;;  %v5104_v9 = vsel %vm77_vm0, %v5094_v12, 0  ;;  %v5485_v8 = vld [vmem:[%s7835_s2 + $0x1a8] ss:$0 sm:$0xff]  ;;  %v5150_v37 = vpack.c.bf16 %v5148_v19, %v5147_v4 }
 0x846   :  { %v4904_v54 = vadd.f32 %v4902_v29, %v4900_v43  ;;  %v5200_v43 = vld [vmem:[%s7835_s2 + $0x200] sm:$0xff]  ;;  %v5201_v29 = vld [vmem:[%s7835_s2 + $0x208] sm:$0xff] }
 0x847   :  { %v4876_v25 = vadd.f32 %v4874_v14, %v4872_v42  ;;  %4864 = vrot.lane.b32.xlu1 %v4862_v40, %s6581_s8 }
 0x849   :  { %4878 = vrot.lane.b32.xlu0 %v4876_v25, %s6582_s9  ;;  %s6585_s9 = smov 30  }
 0x84b   :  { %4892 = vrot.lane.b32.xlu1 %v4890_v44, %s6583_s10  ;;  %v5203_v44 = vpack.c.bf16 %v5201_v29, %v5200_v43 }
 0x84d   :  { %4906 = vrot.lane.b32.xlu0 %v4904_v54, %s6584_s11  ;;  %v5489_v54 = vld [vmem:[%s7835_s2 + $0x1f8] ss:$0 sm:$0xff]  ;;  %s6586_s11 = smov 46  }
 0x8b9   :  { %v4865_v18 = vpop.permute.xlu1 %4864 }
 0x8ba   :  { %4868 = vst.msk [vmem:[#allocation2] sm:$0xff] %vm4867_vm15, %v4865_v18 }
 0x8bb   :  { %v4879_v48 = vpop.permute.xlu0 %4878 }
 0x8bc   :  { %4882 = vst.msk [vmem:[#allocation2] sm:$0xff] %vm4881_vm1, %v4879_v48 }
 0x8bd   :  { %v4893_v49 = vpop.permute.xlu1 %4892 }
 0x8be   :  { %4896 = vst.msk [vmem:[#allocation2] sm:$0xff] %vm4895_vm2, %v4893_v49 }
 0x8bf   :  { %v4907_v61 = vpop.permute.xlu0 %4906 }
 0x8c0   :  { %4910 = vst.msk [vmem:[#allocation2] sm:$0xff] %vm4909_vm6, %v4907_v61 }
 0x8c7   :  { %v4911_v59 = vld [vmem:[#allocation2] sm:$0xff] }
 0x8c8   :  { %v4916_v30 = vpack.c.bf16 %v4911_v59, %v4911_v59 }
 0x8ca   :  { %6474 = vmatmul.mubr.msk.bf16.vlgmr.msra.gmra.mrb[208].mxu1 %vm4924_vm7, %v4916_v30 }
 0x8cb   :  { %6485 = vmatprep.mubr.msk.bf16.mxu1 %vm6572_vm4, %v6571_v58  ;;  %6484 = vmatpush3.bf16.msra.mxu1 %v5028_v63 }
 0x8cc   :  { %6499 = vmatprep.subr.bf16.mxu1 %v6571_v58 }
 0x99d   :  { %v4965_v47 = vpop.f32.mrb[208].mxu1 }
 0x99e   :  { %v4966_v0 = vadd.f32 %v5481_v27, %v4965_v47  ;;  %v6475_v11 = vpop.f32.mrb[209].mxu1  ;;  %v5262_v27 = vld [vmem:[%s7835_s2 + $0x228] sm:$0xff]  ;;  %v5269_v47 = vpack.c.bf16 %v5261_v7, %v5260_v45 }
 0x99f   :  { %v4968_v56 = vpop.f32.mrb[210].mxu1 }
 0x9a0   :  { %v4971_v46 = vmax.f32 %v4966_v0, 0.0  ;;  %v6476_v62 = vpop.f32.mrb[211].mxu1  ;;  %v5263_v0 = vld [vmem:[%s7835_s2 + $0x230] sm:$0xff]  ;;  %v5264_v56 = vld [vmem:[%s7835_s2 + $0x238] sm:$0xff] }
 0x9a1   :  { %v5270_v11 = vpack.c.bf16 %v5263_v0, %v5262_v27  ;;  %v5266_v62 = vld [vmem:[%s7835_s2 + $0x248] sm:$0xff] }
 0x9a2   :  { %v4974_v13 = vpack.c.bf16 %v4971_v46, %v4971_v46  ;;  %v5265_v46 = vld [vmem:[%s7835_s2 + $0x240] sm:$0xff]  ;;  %v5272_v6 = vpack.c.bf16 %v5267_v55, %v5266_v62 }
 0x9a4   :  { %6480 = vmatmul.mubr.msk.bf16.vlgmr.msra.gmra.mrb[204].mxu0 %vm2912_vm9, %v4974_v13  ;;  %v5271_v13 = vpack.c.bf16 %v5265_v46, %v5264_v56  ;;  %v5283_v63 = vsel %vm77_vm0, %v5272_v6, 0 }
 0x9a5   :  { %6495 = vmatprep.mubr.msk.bf16.mxu0 %vm6572_vm4, %v6571_v58  ;;  %6490 = vmatpush3.bf16.msra.mxu0 %v5092_v50 }
 0x9a6   :  { %6491 = vmatprep.subr.bf16.mxu0 %v6571_v58 }
 0x9a9   :  { %6492 = vmatpush3.bf16.msra.mxu0 %v5093_v28 }
 0x9aa   :  { %6493 = vmatprep.subr.bf16.mxu0 %v6571_v58 }
 0x9ad   :  { %6494 = vmatpush3.bf16.msra.mxu0 %v5104_v9  ;;  %v5496_v9 = vld [vmem:[%s7835_s2 + $0x268] ss:$0 sm:$0xff] }
 0x9ae   :  { %6505 = vmatprep.subr.bf16.mxu0 %v6571_v58 }
 0xa77   :  { %v5018_v53 = vpop.f32.mrb[204].mxu0 }
 0xa78   :  { %v5019_v52 = vadd.f32 %v5483_v17, %v5018_v53  ;;  %v6481_v21 = vpop.f32.mrb[205].mxu0  ;;  %v5491_v17 = vld [vmem:[%s7835_s2 + $0x210] ss:$0 sm:$0xff] }
 0xa79   :  { %v5021_v2 = vpop.f32.mrb[206].mxu0 }
 0xa7a   :  { %v5024_v32 = vmax.f32 %v5019_v52, 0.0  ;;  %v6482_v3 = vpop.f32.mrb[207].mxu0 }
 0xa7c   :  { %v5027_v60 = vpack.c.bf16 %v5024_v32, %v5024_v32 }
 0xa7e   :  { %6486 = vmatmul.mubr.msk.bf16.vlgmr.msra.gmra.mrb[212].mxu1 %vm2912_vm9, %v5027_v60 }
 0xa7f   :  { %6501 = vmatprep.mubr.msk.bf16.mxu1 %vm6572_vm4, %v6571_v58  ;;  %6500 = vmatpush3.bf16.msra.mxu1 %v5150_v37 }
 0xa80   :  { %6511 = vmatprep.subr.bf16.mxu1 %v6571_v58 }
 0xb51   :  { %v5071_v31 = vpop.f32.mrb[212].mxu1 }
 0xb52   :  { %v5072_v14 = vadd.f32 %v5485_v8, %v5071_v31  ;;  %v6487_v36 = vpop.f32.mrb[213].mxu1 }
 0xb53   :  { %v5074_v34 = vpop.f32.mrb[214].mxu1 }
 0xb54   :  { %v5077_v33 = vmax.f32 %v5072_v14, 0.0  ;;  %v6488_v5 = vpop.f32.mrb[215].mxu1 }
 0xb56   :  { %5079 = vrot.lane.b32.xlu1 %v5077_v33, %s6585_s9 }
 0xbc8   :  { %v5080_v20 = vpop.permute.xlu1 %5079 }
 0xbc9   :  { %5083 = vst.msk [vmem:[#allocation2] sm:$0xff] %vm5082_vm8, %v5080_v20 }
 0xbd0   :  { %v5084_v35 = vld [vmem:[#allocation2] sm:$0xff] }
 0xbd1   :  { %v5091_v38 = vpack.c.bf16 %v5084_v35, %v5084_v35 }
 0xbd3   :  { %6496 = vmatmul.mubr.msk.bf16.vlgmr.msra.gmra.mrb[208].mxu0 %vm554_vm3, %v5091_v38  ;;  %vm5257_vm3 = vcmask 507248  }
 0xbd4   :  { %6507 = vmatprep.mubr.msk.bf16.mxu0 %vm6572_vm4, %v6571_v58  ;;  %6506 = vmatpush3.bf16.msra.mxu0 %v5203_v44 }
 0xca6   :  { %v5140_v23 = vpop.f32.mrb[208].mxu0 }
 0xca7   :  { %v5141_v57 = vadd.f32 %v5487_v22, %v5140_v23  ;;  %v6497_v39 = vpop.f32.mrb[209].mxu0 }
 0xca8   :  { %v5143_v40 = vpop.f32.mrb[210].mxu0 }
 0xca9   :  { %v5146_v42 = vmax.f32 %v5141_v57, 0.0  ;;  %v6498_v41 = vpop.f32.mrb[211].mxu0 }
 0xcab   :  { %v5149_v25 = vpack.c.bf16 %v5146_v42, %v5146_v42 }
 0xcad   :  { %6502 = vmatmul.mubr.msk.bf16.vlgmr.msra.gmra.mrb[216].mxu1 %vm2912_vm9, %v5149_v25 }
 0xcae   :  { %6519 = vmatprep.mubr.msk.bf16.mxu1 %vm6572_vm4, %v6571_v58  ;;  %6512 = vmatpush3.bf16.msra.mxu1 %v5269_v47  ;;  %vm5278_vm4 = vcmask 506880  }
 0xcaf   :  { %6513 = vmatprep.subr.bf16.mxu1 %v6571_v58 }
 0xcb2   :  { %6514 = vmatpush3.bf16.msra.mxu1 %v5270_v11 }
 0xcb3   :  { %6515 = vmatprep.subr.bf16.mxu1 %v6571_v58 }
 0xcb6   :  { %6516 = vmatpush3.bf16.msra.mxu1 %v5271_v13 }
 0xcb7   :  { %6517 = vmatprep.subr.bf16.mxu1 %v6571_v58 }
 0xcba   :  { %6518 = vmatpush3.bf16.msra.mxu1 %v5283_v63 }
 0xd80   :  { %v5193_v18 = vpop.f32.mrb[216].mxu1 }
 0xd81   :  { %v5194_v48 = vadd.f32 %v5489_v54, %v5193_v18  ;;  %v6503_v49 = vpop.f32.mrb[217].mxu1 }
 0xd82   :  { %v5196_v61 = vpop.f32.mrb[218].mxu1 }
 0xd83   :  { %v5199_v59 = vmax.f32 %v5194_v48, 0.0  ;;  %v6504_v30 = vpop.f32.mrb[219].mxu1 }
 0xd85   :  { %v5202_v51 = vpack.c.bf16 %v5199_v59, %v5199_v59 }
 0xd87   :  { %6508 = vmatmul.mubr.msk.bf16.vlgmr.msra.gmra.mrb[212].mxu0 %vm2912_vm9, %v5202_v51 }
 0xe5a   :  { %v5246_v53 = vpop.f32.mrb[212].mxu0 }
 0xe5b   :  { %v5247_v52 = vadd.f32 %v5491_v17, %v5246_v53  ;;  %v6509_v21 = vpop.f32.mrb[213].mxu0 }
 0xe5c   :  { %v5249_v2 = vpop.f32.mrb[214].mxu0 }
 0xe5d   :  { %v5252_v32 = vmax.f32 %v5247_v52, 0.0  ;;  %v6510_v3 = vpop.f32.mrb[215].mxu0 }
 0xe5f   :  { %5254 = vrot.lane.b32.xlu0 %v5252_v32, %s6586_s11 }
 0xed1   :  { %v5255_v60 = vpop.permute.xlu0 %5254 }
 0xed2   :  { %5258 = vst.msk [vmem:[#allocation2] sm:$0xff] %vm5257_vm3, %v5255_v60 }
 0xed9   :  { %v5259_v1 = vld [vmem:[#allocation2] sm:$0xff] }
 0xeda   :  { %v5268_v58 = vpack.c.bf16 %v5259_v1, %v5259_v1 }
 0xedc   :  { %6520 = vmatmul.mubr.msk.bf16.vlgmr.msra.gmra.mrb[220].mxu1 %vm5278_vm4, %v5268_v58 }
 0xfaf   :  { %v5319_v50 = vpop.f32.mrb[220].mxu1 }
 0xfb0   :  { %v5320_v15 = vadd.f32 %v5493_v16, %v5319_v50  ;;  %v6521_v26 = vpop.f32.mrb[221].mxu1 }
 0xfb1   :  { %v5322_v28 = vpop.f32.mrb[222].mxu1 }
 0xfb2   :  { %v5325_v24 = vmax.f32 %v5320_v15, 0.0  ;;  %v6522_v12 = vpop.f32.mrb[223].mxu1 }
 0xfb4   :  { %v5331_v8 = vmul.f32 %v5495_v10, %v5325_v24 }
 0xfb6   :  { %v5337_v31 = vadd.f32 %v5496_v9, %v5331_v8 }
 0xfb8   :  { %5338 = vst.msk [vmem:[#allocation3] sm:$0xff] %vm797_vm5, %v5337_v31 }
 0xfb9   :  { %6556 = shalt.err (!%p6553_p4)
}
 0xfba   :  { %s6557_s17 = scalar_lea.hbm %s7836_s3, 128 }
 0xfbb   :  { %p6558_p5 = scmp.ne.s32.totalorder %s7836_s3, %s6557_s17  ;;  %p6561_p6 = scmp.lt.u32.totalorder %s6557_s17, %s7836_s3 }
 0xfbd   :  { %p6563_p7 = pnand %p6561_p6, %p6558_p5 }
 0xfbf   :  { %6566 = shalt.err (!%p6563_p7)
}
 0xfc0   :  { %5348 = dma.vmem_to_hbm [thread:$0]  %s5346_s20, 128, %s7836_s3, [#allocation4]  }
 0xfc1   :  { %6567 = dma.done.wait [#allocation4], 128  }
 0xfc2   :  { %6568 = vsyncadd [#allocation4], 4294967168 }
 0xfc3   :  { %5352 = vsyncpa [#allocation4], 1 }

</bundles_post_ra>
